<compile_context>
chip_gen: v5e
topology: v5e:2x2
jax: 0.10.0
libtpu: 0.0.40
codegen_flags: <defaults>
</compile_context>

<pallas_src>
import functools

import jax
import jax.numpy as jnp
from jax.experimental import pallas as pl
from jax.experimental.pallas import tpu as pltpu


# ---------------------------------------------------------------------------
# In-kernel helpers
# ---------------------------------------------------------------------------
def _flat_starts(W):
    # Flat-row offset of the (di, dj) shifted view inside a padded-flat image
    # (padded width is W + 2).
    return [di * (W + 2) + dj for di in range(3) for dj in range(3)]


def _conv3x3_accumulate(read_rows, w_ref, W, Hw):
    """sum_t  view_t @ w[t]  over the 9 taps.  read_rows(start) -> (Hw, Cin)."""
    acc = None
    for t, start in enumerate(_flat_starts(W)):
        lhs = read_rows(start).astype(jnp.bfloat16)
        rhs = w_ref[t].astype(jnp.bfloat16)
        part = jnp.dot(lhs, rhs, preferred_element_type=jnp.float32)
        acc = part if acc is None else acc + part
    return acc


# ---------------------------------------------------------------------------
# DownConv stage kernel: conv3x3+ReLU -> conv3x3+ReLU -> (2x2 maxpool)
# ---------------------------------------------------------------------------
def _downconv_kernel(x_ref, w1_ref, b1_ref, w2_ref, b2_ref, mask_ref,
                     bp_ref, *rest, H, W, pooling):
    if pooling:
        pooled_ref, pad2 = rest
    else:
        (pad2,) = rest

    Hw = H * (W + 2)
    mask = mask_ref[...]                          # (Hw, 1) 1.0 valid / 0.0 junk col

    # conv1 + ReLU, result stored in padded-flat VMEM scratch
    y1 = _conv3x3_accumulate(lambda s: x_ref[0, pl.ds(s, Hw), :], w1_ref, W, Hw)
    y1 = jnp.maximum(y1 + b1_ref[...], 0.0) * mask
    pad2[...] = jnp.zeros_like(pad2)
    pad2[pl.ds(W + 3, Hw), :] = y1

    # conv2 + ReLU -> before_pool output (padded-flat layout for the skip conn.)
    y2 = _conv3x3_accumulate(lambda s: pad2[pl.ds(s, Hw), :], w2_ref, W, Hw)
    y2 = jnp.maximum(y2 + b2_ref[...], 0.0) * mask
    bp_ref[...] = jnp.zeros_like(bp_ref)
    bp_ref[0, pl.ds(W + 3, Hw), :] = y2

    if pooling:
        Hp, Wp = H // 2, W // 2
        jj = jax.lax.broadcasted_iota(jnp.int32, (Wp, W), 0)
        ww = jax.lax.broadcasted_iota(jnp.int32, (Wp, W), 1)
        pe = (ww == 2 * jj).astype(jnp.float32)        # selects even columns
        po = (ww == 2 * jj + 1).astype(jnp.float32)    # selects odd columns
        pooled_ref[...] = jnp.zeros_like(pooled_ref)
        for i in range(Hp):
            r0 = bp_ref[0, pl.ds((2 * i + 1) * (W + 2) + 1, W), :]
            r1 = bp_ref[0, pl.ds((2 * i + 2) * (W + 2) + 1, W), :]
            rm = jnp.maximum(r0, r1)
            prow = jnp.maximum(
                jnp.dot(pe, rm, preferred_element_type=jnp.float32),
                jnp.dot(po, rm, preferred_element_type=jnp.float32))
            pooled_ref[0, pl.ds((i + 1) * (Wp + 2) + 1, Wp), :] = prow


def downconv_stage(x_padflat, w1, b1, w2, b2, *, H, W, pooling):
    """x_padflat: (N, (H+3)*(W+2), Cin) padded-flat.  Returns (before_pool[, pooled])."""
    N, Rin, Cin = x_padflat.shape
    C1 = w1.shape[0]
    R = (H + 3) * (W + 2)
    Hw = H * (W + 2)
    assert Rin == R, (Rin, R)

    w1t = jnp.transpose(w1, (2, 3, 1, 0)).reshape(9, Cin, C1)   # (tap, Cin, Cout)
    w2t = jnp.transpose(w2, (2, 3, 1, 0)).reshape(9, C1, C1)
    mask = (jnp.arange(Hw) % (W + 2) < W).astype(jnp.float32).reshape(Hw, 1)

    in_specs = [
        pl.BlockSpec((1, R, Cin), lambda n: (n, 0, 0)),
        pl.BlockSpec((9, Cin, C1), lambda n: (0, 0, 0)),
        pl.BlockSpec((1, C1), lambda n: (0, 0)),
        pl.BlockSpec((9, C1, C1), lambda n: (0, 0, 0)),
        pl.BlockSpec((1, C1), lambda n: (0, 0)),
        pl.BlockSpec((Hw, 1), lambda n: (0, 0)),
    ]
    if pooling:
        Hp, Wp = H // 2, W // 2
        Rp = (Hp + 3) * (Wp + 2)
        out_shape = (jax.ShapeDtypeStruct((N, R, C1), jnp.float32),
                     jax.ShapeDtypeStruct((N, Rp, C1), jnp.float32))
        out_specs = (pl.BlockSpec((1, R, C1), lambda n: (n, 0, 0)),
                     pl.BlockSpec((1, Rp, C1), lambda n: (n, 0, 0)))
    else:
        out_shape = jax.ShapeDtypeStruct((N, R, C1), jnp.float32)
        out_specs = pl.BlockSpec((1, R, C1), lambda n: (n, 0, 0))

    kernel = functools.partial(_downconv_kernel, H=H, W=W, pooling=pooling)
    res = pl.pallas_call(
        kernel,
        grid=(N,),
        in_specs=in_specs,
        out_specs=out_specs,
        out_shape=out_shape,
        scratch_shapes=[pltpu.VMEM((R, C1), jnp.float32)],
        compiler_params=pltpu.CompilerParams(dimension_semantics=("parallel",)),
    )(x_padflat, w1t, b1.reshape(1, C1), w2t, b2.reshape(1, C1), mask)
    return res if pooling else (res,)


# ---------------------------------------------------------------------------
# UpConv stage kernel: upconv2x2 -> concat(split-K) -> conv1+ReLU -> conv2+ReLU
#                      (+ optional fused final 1x1 conv + sigmoid)
# ---------------------------------------------------------------------------
def _upconv_kernel(fu_ref, fd_ref, wu_ref, bu_ref, w1u_ref, w1d_ref, b1_ref,
                   w2_ref, b2_ref, mask_ref, *rest, Hu, Wu, final):
    if final:
        wf_ref, bf_ref, out_ref, upad, pad2 = rest
    else:
        out_ref, upad, pad2 = rest

    H, W = 2 * Hu, 2 * Wu
    Hw = H * (W + 2)
    mask = mask_ref[...]

    # ---- ConvTranspose2d(kernel=2, stride=2): per half-res row compute the two
    #      full-res rows, interleaving even/odd columns with exact 0/1 matmuls,
    #      and write them into a zero padded-flat VMEM scratch (conv1 input).
    upad[...] = jnp.zeros_like(upad)
    ii = jax.lax.broadcasted_iota(jnp.int32, (W, Wu), 0)
    jj = jax.lax.broadcasted_iota(jnp.int32, (W, Wu), 1)
    se = (ii == 2 * jj).astype(jnp.float32)          # places values at even cols
    so = (ii == 2 * jj + 1).astype(jnp.float32)      # places values at odd cols
    bu = bu_ref[...]
    for h in range(Hu):
        xrow = fu_ref[0, pl.ds((h + 1) * (Wu + 2) + 1, Wu), :].astype(jnp.bfloat16)
        for di in range(2):
            u0 = jnp.dot(xrow, wu_ref[2 * di + 0].astype(jnp.bfloat16),
                         preferred_element_type=jnp.float32) + bu
            u1 = jnp.dot(xrow, wu_ref[2 * di + 1].astype(jnp.bfloat16),
                         preferred_element_type=jnp.float32) + bu
            row = (jnp.dot(se, u0, preferred_element_type=jnp.float32) +
                   jnp.dot(so, u1, preferred_element_type=jnp.float32))
            upad[pl.ds((2 * h + di + 1) * (W + 2) + 1, W), :] = row

    # ---- conv1 over concat([from_up, from_down], channel) fused as split-K
    acc = None
    for t, start in enumerate(_flat_starts(W)):
        a = jnp.dot(upad[pl.ds(start, Hw), :].astype(jnp.bfloat16),
                    w1u_ref[t].astype(jnp.bfloat16),
                    preferred_element_type=jnp.float32)
        b = jnp.dot(fd_ref[0, pl.ds(start, Hw), :].astype(jnp.bfloat16),
                    w1d_ref[t].astype(jnp.bfloat16),
                    preferred_element_type=jnp.float32)
        part = a + b
        acc = part if acc is None else acc + part
    y1 = jnp.maximum(acc + b1_ref[...], 0.0) * mask
    pad2[...] = jnp.zeros_like(pad2)
    pad2[pl.ds(W + 3, Hw), :] = y1

    # ---- conv2 + ReLU
    y2 = _conv3x3_accumulate(lambda s: pad2[pl.ds(s, Hw), :], w2_ref, W, Hw)
    y2 = jnp.maximum(y2 + b2_ref[...], 0.0) * mask

    if final:
        # fused final 1x1 conv + sigmoid (junk columns stripped by the wrapper)
        o = jnp.dot(y2, wf_ref[...], preferred_element_type=jnp.float32) + bf_ref[...]
        out_ref[0, :, :] = jax.nn.sigmoid(o)
    else:
        out_ref[...] = jnp.zeros_like(out_ref)
        out_ref[0, pl.ds(W + 3, Hw), :] = y2


def upconv_stage(from_up, from_down, wu, bu, w1, b1, w2, b2, *,
                 Hu, Wu, final=False, wf=None, bf=None):
    """from_up: (N, (Hu+3)*(Wu+2), Cin) padded-flat.
       from_down: (N, (2Hu+3)*(2Wu+2), Cu) padded-flat (skip connection)."""
    N, Ru_in, Cin = from_up.shape
    Cu = wu.shape[1]                       # ConvTranspose2d weight: (Cin, Cout, 2, 2)
    Cd = from_down.shape[-1]
    assert Cd == Cu, (Cd, Cu)
    H, W = 2 * Hu, 2 * Wu
    R = (H + 3) * (W + 2)
    Ru = (Hu + 3) * (Wu + 2)
    Hw = H * (W + 2)
    assert Ru_in == Ru and from_down.shape[1] == R

    wut = jnp.transpose(wu, (2, 3, 0, 1)).reshape(4, Cin, Cu)       # (tap, Cin, Cout)
    w1u = jnp.transpose(w1[:, :Cu], (2, 3, 1, 0)).reshape(9, Cu, Cu)
    w1d = jnp.transpose(w1[:, Cu:], (2, 3, 1, 0)).reshape(9, Cu, Cu)
    w2t = jnp.transpose(w2, (2, 3, 1, 0)).reshape(9, Cu, Cu)
    mask = (jnp.arange(Hw) % (W + 2) < W).astype(jnp.float32).reshape(Hw, 1)

    inputs = [from_up, from_down, wut, bu.reshape(1, Cu), w1u, w1d,
              b1.reshape(1, Cu), w2t, b2.reshape(1, Cu), mask]
    in_specs = [
        pl.BlockSpec((1, Ru, Cin), lambda n: (n, 0, 0)),
        pl.BlockSpec((1, R, Cd), lambda n: (n, 0, 0)),
        pl.BlockSpec((4, Cin, Cu), lambda n: (0, 0, 0)),
        pl.BlockSpec((1, Cu), lambda n: (0, 0)),
        pl.BlockSpec((9, Cu, Cu), lambda n: (0, 0, 0)),
        pl.BlockSpec((9, Cu, Cu), lambda n: (0, 0, 0)),
        pl.BlockSpec((1, Cu), lambda n: (0, 0)),
        pl.BlockSpec((9, Cu, Cu), lambda n: (0, 0, 0)),
        pl.BlockSpec((1, Cu), lambda n: (0, 0)),
        pl.BlockSpec((Hw, 1), lambda n: (0, 0)),
    ]
    if final:
        nc = wf.shape[0]
        wft = jnp.transpose(wf.reshape(nc, Cu), (1, 0))             # (Cu, nc)
        inputs += [wft, bf.reshape(1, nc)]
        in_specs += [pl.BlockSpec((Cu, nc), lambda n: (0, 0)),
                     pl.BlockSpec((1, nc), lambda n: (0, 0))]
        out_shape = jax.ShapeDtypeStruct((N, Hw, nc), jnp.float32)
        out_specs = pl.BlockSpec((1, Hw, nc), lambda n: (n, 0, 0))
    else:
        out_shape = jax.ShapeDtypeStruct((N, R, Cu), jnp.float32)
        out_specs = pl.BlockSpec((1, R, Cu), lambda n: (n, 0, 0))

    kernel = functools.partial(_upconv_kernel, Hu=Hu, Wu=Wu, final=final)
    return pl.pallas_call(
        kernel,
        grid=(N,),
        in_specs=in_specs,
        out_specs=out_specs,
        out_shape=out_shape,
        scratch_shapes=[pltpu.VMEM((R, Cu), jnp.float32),   # upsampled from_up (padded)
                        pltpu.VMEM((R, Cu), jnp.float32)],  # conv1 output (padded)
        compiler_params=pltpu.CompilerParams(dimension_semantics=("parallel",)),
    )(*inputs)


# ---------------------------------------------------------------------------
# Parameter init (deterministic: xavier-normal weights / zero biases,
# PyTorch weight layouts).  use_spectral_norm defaults to False in UNetSOURCE.
# ---------------------------------------------------------------------------
def _xavier_normal(key, shape):
    fan_out = shape[0] * shape[2] * shape[3]
    fan_in = shape[1] * shape[2] * shape[3]
    std = (2.0 / (fan_in + fan_out)) ** 0.5
    return std * jax.random.normal(key, shape, dtype=jnp.float32)


def init_unet_params(key, num_classes, in_channels, depth, start_filts):
    keys = iter(jax.random.split(key, 8 * depth + 8))
    params = {"down": [], "up": []}
    outs = in_channels
    for i in range(depth):
        ins = in_channels if i == 0 else outs
        outs = start_filts * (2 ** i)
        params["down"].append({
            "w1": _xavier_normal(next(keys), (outs, ins, 3, 3)),
            "b1": jnp.zeros((outs,), jnp.float32),
            "w2": _xavier_normal(next(keys), (outs, outs, 3, 3)),
            "b2": jnp.zeros((outs,), jnp.float32),
        })
    for i in range(depth - 1):
        ins = outs
        outs = ins // 2
        params["up"].append({
            # ConvTranspose2d weight layout: [Cin, Cout, 2, 2]
            "wu": _xavier_normal(next(keys), (ins, outs, 2, 2)),
            "bu": 0.01 * jax.random.normal(next(keys), (outs,), dtype=jnp.float32),
            "w1": _xavier_normal(next(keys), (outs, 2 * outs, 3, 3)),
            "b1": jnp.zeros((outs,), jnp.float32),
            "w2": _xavier_normal(next(keys), (outs, outs, 3, 3)),
            "b2": jnp.zeros((outs,), jnp.float32),
        })
    params["wf"] = _xavier_normal(next(keys), (num_classes, outs, 1, 1))
    params["bf"] = jnp.zeros((num_classes,), jnp.float32)
    return params


# ---------------------------------------------------------------------------
# UNetSOURCE forward
# ---------------------------------------------------------------------------
def unet_forward(x_nchw, params):
    N, _, H0, W0 = x_nchw.shape
    depth = len(params["down"])
    num_classes = params["wf"].shape[0]

    # NCHW -> padded-flat NHWC (1 top / 2 bottom / 1 left / 1 right zero pad)
    x = jnp.transpose(x_nchw, (0, 2, 3, 1))
    x = jnp.pad(x, ((0, 0), (1, 2), (1, 1), (0, 0)))
    x = x.reshape(N, (H0 + 3) * (W0 + 2), x.shape[-1])

    # encoder
    encoder_outs = []
    H, W = H0, W0
    for i, p in enumerate(params["down"]):
        pooling = i < depth - 1
        outs = downconv_stage(x, p["w1"], p["b1"], p["w2"], p["b2"],
                              H=H, W=W, pooling=pooling)
        encoder_outs.append(outs[0])          # before_pool (padded-flat)
        if pooling:
            x = outs[1]                       # pooled (padded-flat, half res)
            H //= 2
            W //= 2
        else:
            x = outs[0]

    # decoder (merge_mode='concat', up_mode='transpose'); final 1x1+sigmoid fused
    n_up = len(params["up"])
    for i, p in enumerate(params["up"]):
        from_down = encoder_outs[-(i + 2)]
        final = (i == n_up - 1)
        x = upconv_stage(x, from_down, p["wu"], p["bu"], p["w1"], p["b1"],
                         p["w2"], p["b2"], Hu=H, Wu=W, final=final,
                         wf=params["wf"] if final else None,
                         bf=params["bf"] if final else None)
        H, W = 2 * H, 2 * W

    # last kernel output: (N, H*(W+2), num_classes) with junk padding columns
    x = x.reshape(N, H, W + 2, num_classes)[:, :, :W, :]
    return jnp.transpose(x, (0, 3, 1, 2))     # NHWC -> NCHW


# ---------------------------------------------------------------------------
if __name__ == "__main__":
    # UNetSOURCE(num_classes=1, in_channels=3, depth=3, start_filts=8,
    #            up_mode='transpose', merge_mode='concat',
    #            use_spectral_norm=False, Sigmoid=True)
    num_classes, in_channels, depth, start_filts = 1, 3, 3, 8
    N, H, W = 2, 16, 16

    key = jax.random.PRNGKey(0)
    k_params, k_x = jax.random.split(key)
    params = init_unet_params(k_params, num_classes, in_channels, depth, start_filts)
    x = jax.random.normal(k_x, (N, in_channels, H, W), dtype=jnp.float32)

    out = unet_forward(x, params)
    out = jax.block_until_ready(out)

    assert out.shape == (N, num_classes, H, W), out.shape
    assert out.dtype == jnp.float32
    assert bool(jnp.all(jnp.isfinite(out)))
    assert bool(jnp.all((out >= 0.0) & (out <= 1.0)))   # sigmoid range
    print("KERNEL_OK")
</pallas_src>

<mosaic_0001>
module attributes {stable_mosaic.version = 11 : i64} {
  func.func @_downconv_kernel(%arg0: i32, %arg1: memref<1x342x3xf32, #tpu.memory_space<vmem>>, %arg2: memref<9x3x8xf32, #tpu.memory_space<vmem>>, %arg3: memref<1x8xf32, #tpu.memory_space<vmem>>, %arg4: memref<9x8x8xf32, #tpu.memory_space<vmem>>, %arg5: memref<1x8xf32, #tpu.memory_space<vmem>>, %arg6: memref<288x1xf32, #tpu.memory_space<vmem>>, %arg7: memref<1x342x8xf32, #tpu.memory_space<vmem>>, %arg8: memref<1x110x8xf32, #tpu.memory_space<vmem>>, %arg9: memref<342x8xf32, #tpu.memory_space<vmem>>) attributes {dimension_semantics = [#tpu.dimension_semantics<parallel>], iteration_bounds = array<i64: 2>, scalar_prefetch = 0 : i64, scratch_operands = 1 : i64, tpu.core_type = #tpu.core_type<tc>, window_params = [{transform_indices = @transform_0, window_bounds = array<i64: 1, 342, 3>}, {pipeline_mode = #tpu.pipeline_mode<synchronous>, transform_indices = @transform_1, window_bounds = array<i64: 9, 3, 8>}, {pipeline_mode = #tpu.pipeline_mode<synchronous>, transform_indices = @transform_2, window_bounds = array<i64: 1, 8>}, {pipeline_mode = #tpu.pipeline_mode<synchronous>, transform_indices = @transform_3, window_bounds = array<i64: 9, 8, 8>}, {pipeline_mode = #tpu.pipeline_mode<synchronous>, transform_indices = @transform_4, window_bounds = array<i64: 1, 8>}, {pipeline_mode = #tpu.pipeline_mode<synchronous>, transform_indices = @transform_5, window_bounds = array<i64: 288, 1>}, {transform_indices = @transform_6, window_bounds = array<i64: 1, 342, 8>}, {transform_indices = @transform_7, window_bounds = array<i64: 1, 110, 8>}]} {
    %c0 = arith.constant 0 : index
    %c0_0 = arith.constant 0 : index
    %0 = vector.load %arg6[%c0, %c0_0] : memref<288x1xf32, #tpu.memory_space<vmem>>, vector<288x1xf32>
    %c0_1 = arith.constant 0 : index
    %c0_2 = arith.constant 0 : index
    %c0_3 = arith.constant 0 : index
    %1 = vector.load %arg1[%c0_1, %c0_2, %c0_3] : memref<1x342x3xf32, #tpu.memory_space<vmem>>, vector<1x288x3xf32>
    %2 = vector.shape_cast %1 : vector<1x288x3xf32> to vector<288x3xf32>
    %3 = arith.truncf %2 : vector<288x3xf32> to vector<288x3xbf16>
    %c0_4 = arith.constant 0 : index
    %c0_5 = arith.constant 0 : index
    %c0_6 = arith.constant 0 : index
    %4 = vector.load %arg2[%c0_4, %c0_5, %c0_6] : memref<9x3x8xf32, #tpu.memory_space<vmem>>, vector<1x3x8xf32>
    %5 = vector.shape_cast %4 : vector<1x3x8xf32> to vector<3x8xf32>
    %6 = arith.truncf %5 : vector<3x8xf32> to vector<3x8xbf16>
    %cst = arith.constant dense<0.000000e+00> : vector<288x8xf32>
    %7 = tpu.matmul %3, %6, %cst {dimension_numbers = #tpu.dot_dimension_numbers<[1], [0], [0], [1], [0, 0, 1, 1], [], []>} : vector<288x3xbf16>, vector<3x8xbf16>, vector<288x8xf32> -> vector<288x8xf32>
    %c0_7 = arith.constant 0 : index
    %c1 = arith.constant 1 : index
    %c0_8 = arith.constant 0 : index
    %8 = vector.load %arg1[%c0_7, %c1, %c0_8] : memref<1x342x3xf32, #tpu.memory_space<vmem>>, vector<1x288x3xf32>
    %9 = vector.shape_cast %8 : vector<1x288x3xf32> to vector<288x3xf32>
    %10 = arith.truncf %9 : vector<288x3xf32> to vector<288x3xbf16>
    %c1_9 = arith.constant 1 : index
    %c0_10 = arith.constant 0 : index
    %c0_11 = arith.constant 0 : index
    %11 = vector.load %arg2[%c1_9, %c0_10, %c0_11] : memref<9x3x8xf32, #tpu.memory_space<vmem>>, vector<1x3x8xf32>
    %12 = vector.shape_cast %11 : vector<1x3x8xf32> to vector<3x8xf32>
    %13 = arith.truncf %12 : vector<3x8xf32> to vector<3x8xbf16>
    %cst_12 = arith.constant dense<0.000000e+00> : vector<288x8xf32>
    %14 = tpu.matmul %10, %13, %cst_12 {dimension_numbers = #tpu.dot_dimension_numbers<[1], [0], [0], [1], [0, 0, 1, 1], [], []>} : vector<288x3xbf16>, vector<3x8xbf16>, vector<288x8xf32> -> vector<288x8xf32>
    %15 = arith.addf %7, %14 : vector<288x8xf32>
    %c0_13 = arith.constant 0 : index
    %c2 = arith.constant 2 : index
    %c0_14 = arith.constant 0 : index
    %16 = vector.load %arg1[%c0_13, %c2, %c0_14] : memref<1x342x3xf32, #tpu.memory_space<vmem>>, vector<1x288x3xf32>
    %17 = vector.shape_cast %16 : vector<1x288x3xf32> to vector<288x3xf32>
    %18 = arith.truncf %17 : vector<288x3xf32> to vector<288x3xbf16>
    %c2_15 = arith.constant 2 : index
    %c0_16 = arith.constant 0 : index
    %c0_17 = arith.constant 0 : index
    %19 = vector.load %arg2[%c2_15, %c0_16, %c0_17] : memref<9x3x8xf32, #tpu.memory_space<vmem>>, vector<1x3x8xf32>
    %20 = vector.shape_cast %19 : vector<1x3x8xf32> to vector<3x8xf32>
    %21 = arith.truncf %20 : vector<3x8xf32> to vector<3x8xbf16>
    %cst_18 = arith.constant dense<0.000000e+00> : vector<288x8xf32>
    %22 = tpu.matmul %18, %21, %cst_18 {dimension_numbers = #tpu.dot_dimension_numbers<[1], [0], [0], [1], [0, 0, 1, 1], [], []>} : vector<288x3xbf16>, vector<3x8xbf16>, vector<288x8xf32> -> vector<288x8xf32>
    %23 = arith.addf %15, %22 : vector<288x8xf32>
    %c0_19 = arith.constant 0 : index
    %c18 = arith.constant 18 : index
    %c0_20 = arith.constant 0 : index
    %24 = vector.load %arg1[%c0_19, %c18, %c0_20] : memref<1x342x3xf32, #tpu.memory_space<vmem>>, vector<1x288x3xf32>
    %25 = vector.shape_cast %24 : vector<1x288x3xf32> to vector<288x3xf32>
    %26 = arith.truncf %25 : vector<288x3xf32> to vector<288x3xbf16>
    %c3 = arith.constant 3 : index
    %c0_21 = arith.constant 0 : index
    %c0_22 = arith.constant 0 : index
    %27 = vector.load %arg2[%c3, %c0_21, %c0_22] : memref<9x3x8xf32, #tpu.memory_space<vmem>>, vector<1x3x8xf32>
    %28 = vector.shape_cast %27 : vector<1x3x8xf32> to vector<3x8xf32>
    %29 = arith.truncf %28 : vector<3x8xf32> to vector<3x8xbf16>
    %cst_23 = arith.constant dense<0.000000e+00> : vector<288x8xf32>
    %30 = tpu.matmul %26, %29, %cst_23 {dimension_numbers = #tpu.dot_dimension_numbers<[1], [0], [0], [1], [0, 0, 1, 1], [], []>} : vector<288x3xbf16>, vector<3x8xbf16>, vector<288x8xf32> -> vector<288x8xf32>
    %31 = arith.addf %23, %30 : vector<288x8xf32>
    %c0_24 = arith.constant 0 : index
    %c19 = arith.constant 19 : index
    %c0_25 = arith.constant 0 : index
    %32 = vector.load %arg1[%c0_24, %c19, %c0_25] : memref<1x342x3xf32, #tpu.memory_space<vmem>>, vector<1x288x3xf32>
    %33 = vector.shape_cast %32 : vector<1x288x3xf32> to vector<288x3xf32>
    %34 = arith.truncf %33 : vector<288x3xf32> to vector<288x3xbf16>
    %c4 = arith.constant 4 : index
    %c0_26 = arith.constant 0 : index
    %c0_27 = arith.constant 0 : index
    %35 = vector.load %arg2[%c4, %c0_26, %c0_27] : memref<9x3x8xf32, #tpu.memory_space<vmem>>, vector<1x3x8xf32>
    %36 = vector.shape_cast %35 : vector<1x3x8xf32> to vector<3x8xf32>
    %37 = arith.truncf %36 : vector<3x8xf32> to vector<3x8xbf16>
    %cst_28 = arith.constant dense<0.000000e+00> : vector<288x8xf32>
    %38 = tpu.matmul %34, %37, %cst_28 {dimension_numbers = #tpu.dot_dimension_numbers<[1], [0], [0], [1], [0, 0, 1, 1], [], []>} : vector<288x3xbf16>, vector<3x8xbf16>, vector<288x8xf32> -> vector<288x8xf32>
    %39 = arith.addf %31, %38 : vector<288x8xf32>
    %c0_29 = arith.constant 0 : index
    %c20 = arith.constant 20 : index
    %c0_30 = arith.constant 0 : index
    %40 = vector.load %arg1[%c0_29, %c20, %c0_30] : memref<1x342x3xf32, #tpu.memory_space<vmem>>, vector<1x288x3xf32>
    %41 = vector.shape_cast %40 : vector<1x288x3xf32> to vector<288x3xf32>
    %42 = arith.truncf %41 : vector<288x3xf32> to vector<288x3xbf16>
    %c5 = arith.constant 5 : index
    %c0_31 = arith.constant 0 : index
    %c0_32 = arith.constant 0 : index
    %43 = vector.load %arg2[%c5, %c0_31, %c0_32] : memref<9x3x8xf32, #tpu.memory_space<vmem>>, vector<1x3x8xf32>
    %44 = vector.shape_cast %43 : vector<1x3x8xf32> to vector<3x8xf32>
    %45 = arith.truncf %44 : vector<3x8xf32> to vector<3x8xbf16>
    %cst_33 = arith.constant dense<0.000000e+00> : vector<288x8xf32>
    %46 = tpu.matmul %42, %45, %cst_33 {dimension_numbers = #tpu.dot_dimension_numbers<[1], [0], [0], [1], [0, 0, 1, 1], [], []>} : vector<288x3xbf16>, vector<3x8xbf16>, vector<288x8xf32> -> vector<288x8xf32>
    %47 = arith.addf %39, %46 : vector<288x8xf32>
    %c0_34 = arith.constant 0 : index
    %c36 = arith.constant 36 : index
    %c0_35 = arith.constant 0 : index
    %48 = vector.load %arg1[%c0_34, %c36, %c0_35] : memref<1x342x3xf32, #tpu.memory_space<vmem>>, vector<1x288x3xf32>
    %49 = vector.shape_cast %48 : vector<1x288x3xf32> to vector<288x3xf32>
    %50 = arith.truncf %49 : vector<288x3xf32> to vector<288x3xbf16>
    %c6 = arith.constant 6 : index
    %c0_36 = arith.constant 0 : index
    %c0_37 = arith.constant 0 : index
    %51 = vector.load %arg2[%c6, %c0_36, %c0_37] : memref<9x3x8xf32, #tpu.memory_space<vmem>>, vector<1x3x8xf32>
    %52 = vector.shape_cast %51 : vector<1x3x8xf32> to vector<3x8xf32>
    %53 = arith.truncf %52 : vector<3x8xf32> to vector<3x8xbf16>
    %cst_38 = arith.constant dense<0.000000e+00> : vector<288x8xf32>
    %54 = tpu.matmul %50, %53, %cst_38 {dimension_numbers = #tpu.dot_dimension_numbers<[1], [0], [0], [1], [0, 0, 1, 1], [], []>} : vector<288x3xbf16>, vector<3x8xbf16>, vector<288x8xf32> -> vector<288x8xf32>
    %55 = arith.addf %47, %54 : vector<288x8xf32>
    %c0_39 = arith.constant 0 : index
    %c37 = arith.constant 37 : index
    %c0_40 = arith.constant 0 : index
    %56 = vector.load %arg1[%c0_39, %c37, %c0_40] : memref<1x342x3xf32, #tpu.memory_space<vmem>>, vector<1x288x3xf32>
    %57 = vector.shape_cast %56 : vector<1x288x3xf32> to vector<288x3xf32>
    %58 = arith.truncf %57 : vector<288x3xf32> to vector<288x3xbf16>
    %c7 = arith.constant 7 : index
    %c0_41 = arith.constant 0 : index
    %c0_42 = arith.constant 0 : index
    %59 = vector.load %arg2[%c7, %c0_41, %c0_42] : memref<9x3x8xf32, #tpu.memory_space<vmem>>, vector<1x3x8xf32>
    %60 = vector.shape_cast %59 : vector<1x3x8xf32> to vector<3x8xf32>
    %61 = arith.truncf %60 : vector<3x8xf32> to vector<3x8xbf16>
    %cst_43 = arith.constant dense<0.000000e+00> : vector<288x8xf32>
    %62 = tpu.matmul %58, %61, %cst_43 {dimension_numbers = #tpu.dot_dimension_numbers<[1], [0], [0], [1], [0, 0, 1, 1], [], []>} : vector<288x3xbf16>, vector<3x8xbf16>, vector<288x8xf32> -> vector<288x8xf32>
    %63 = arith.addf %55, %62 : vector<288x8xf32>
    %c0_44 = arith.constant 0 : index
    %c38 = arith.constant 38 : index
    %c0_45 = arith.constant 0 : index
    %64 = vector.load %arg1[%c0_44, %c38, %c0_45] : memref<1x342x3xf32, #tpu.memory_space<vmem>>, vector<1x288x3xf32>
    %65 = vector.shape_cast %64 : vector<1x288x3xf32> to vector<288x3xf32>
    %66 = arith.truncf %65 : vector<288x3xf32> to vector<288x3xbf16>
    %c8 = arith.constant 8 : index
    %c0_46 = arith.constant 0 : index
    %c0_47 = arith.constant 0 : index
    %67 = vector.load %arg2[%c8, %c0_46, %c0_47] : memref<9x3x8xf32, #tpu.memory_space<vmem>>, vector<1x3x8xf32>
    %68 = vector.shape_cast %67 : vector<1x3x8xf32> to vector<3x8xf32>
    %69 = arith.truncf %68 : vector<3x8xf32> to vector<3x8xbf16>
    %cst_48 = arith.constant dense<0.000000e+00> : vector<288x8xf32>
    %70 = tpu.matmul %66, %69, %cst_48 {dimension_numbers = #tpu.dot_dimension_numbers<[1], [0], [0], [1], [0, 0, 1, 1], [], []>} : vector<288x3xbf16>, vector<3x8xbf16>, vector<288x8xf32> -> vector<288x8xf32>
    %71 = arith.addf %63, %70 : vector<288x8xf32>
    %c0_49 = arith.constant 0 : index
    %c0_50 = arith.constant 0 : index
    %72 = vector.load %arg3[%c0_49, %c0_50] : memref<1x8xf32, #tpu.memory_space<vmem>>, vector<1x8xf32>
    %73 = vector.broadcast %72 : vector<1x8xf32> to vector<288x8xf32>
    %74 = arith.addf %71, %73 : vector<288x8xf32>
    %cst_51 = arith.constant 0.000000e+00 : f32
    %75 = vector.broadcast %cst_51 : f32 to vector<288x8xf32>
    %76 = arith.maximumf %74, %75 : vector<288x8xf32>
    %77 = vector.broadcast %0 : vector<288x1xf32> to vector<288x8xf32>
    %78 = arith.mulf %76, %77 : vector<288x8xf32>
    %cst_52 = arith.constant 0.000000e+00 : f32
    %79 = vector.broadcast %cst_52 : f32 to vector<342x8xf32>
    %c0_53 = arith.constant 0 : index
    %c0_54 = arith.constant 0 : index
    %80 = vector.load %arg9[%c0_53, %c0_54] : memref<342x8xf32, #tpu.memory_space<vmem>>, vector<342x8xf32>
    tpu.vector_store %arg9[%c0_53, %c0_54], %79 {strides = array<i32>} : memref<342x8xf32, #tpu.memory_space<vmem>>, vector<342x8xf32>,
    %c19_55 = arith.constant 19 : index
    %c0_56 = arith.constant 0 : index
    %81 = vector.load %arg9[%c19_55, %c0_56] : memref<342x8xf32, #tpu.memory_space<vmem>>, vector<288x8xf32>
    tpu.vector_store %arg9[%c19_55, %c0_56], %78 {strides = array<i32>} : memref<342x8xf32, #tpu.memory_space<vmem>>, vector<288x8xf32>,
    %c0_57 = arith.constant 0 : index
    %c0_58 = arith.constant 0 : index
    %82 = vector.load %arg9[%c0_57, %c0_58] : memref<342x8xf32, #tpu.memory_space<vmem>>, vector<288x8xf32>
    %83 = arith.truncf %82 : vector<288x8xf32> to vector<288x8xbf16>
    %c0_59 = arith.constant 0 : index
    %c0_60 = arith.constant 0 : index
    %c0_61 = arith.constant 0 : index
    %84 = vector.load %arg4[%c0_59, %c0_60, %c0_61] : memref<9x8x8xf32, #tpu.memory_space<vmem>>, vector<1x8x8xf32>
    %85 = vector.shape_cast %84 : vector<1x8x8xf32> to vector<8x8xf32>
    %86 = arith.truncf %85 : vector<8x8xf32> to vector<8x8xbf16>
    %cst_62 = arith.constant dense<0.000000e+00> : vector<288x8xf32>
    %87 = tpu.matmul %83, %86, %cst_62 {dimension_numbers = #tpu.dot_dimension_numbers<[1], [0], [0], [1], [0, 0, 1, 1], [], []>} : vector<288x8xbf16>, vector<8x8xbf16>, vector<288x8xf32> -> vector<288x8xf32>
    %c1_63 = arith.constant 1 : index
    %c0_64 = arith.constant 0 : index
    %88 = vector.load %arg9[%c1_63, %c0_64] : memref<342x8xf32, #tpu.memory_space<vmem>>, vector<288x8xf32>
    %89 = arith.truncf %88 : vector<288x8xf32> to vector<288x8xbf16>
    %c1_65 = arith.constant 1 : index
    %c0_66 = arith.constant 0 : index
    %c0_67 = arith.constant 0 : index
    %90 = vector.load %arg4[%c1_65, %c0_66, %c0_67] : memref<9x8x8xf32, #tpu.memory_space<vmem>>, vector<1x8x8xf32>
    %91 = vector.shape_cast %90 : vector<1x8x8xf32> to vector<8x8xf32>
    %92 = arith.truncf %91 : vector<8x8xf32> to vector<8x8xbf16>
    %cst_68 = arith.constant dense<0.000000e+00> : vector<288x8xf32>
    %93 = tpu.matmul %89, %92, %cst_68 {dimension_numbers = #tpu.dot_dimension_numbers<[1], [0], [0], [1], [0, 0, 1, 1], [], []>} : vector<288x8xbf16>, vector<8x8xbf16>, vector<288x8xf32> -> vector<288x8xf32>
    %94 = arith.addf %87, %93 : vector<288x8xf32>
    %c2_69 = arith.constant 2 : index
    %c0_70 = arith.constant 0 : index
    %95 = vector.load %arg9[%c2_69, %c0_70] : memref<342x8xf32, #tpu.memory_space<vmem>>, vector<288x8xf32>
    %96 = arith.truncf %95 : vector<288x8xf32> to vector<288x8xbf16>
    %c2_71 = arith.constant 2 : index
    %c0_72 = arith.constant 0 : index
    %c0_73 = arith.constant 0 : index
    %97 = vector.load %arg4[%c2_71, %c0_72, %c0_73] : memref<9x8x8xf32, #tpu.memory_space<vmem>>, vector<1x8x8xf32>
    %98 = vector.shape_cast %97 : vector<1x8x8xf32> to vector<8x8xf32>
    %99 = arith.truncf %98 : vector<8x8xf32> to vector<8x8xbf16>
    %cst_74 = arith.constant dense<0.000000e+00> : vector<288x8xf32>
    %100 = tpu.matmul %96, %99, %cst_74 {dimension_numbers = #tpu.dot_dimension_numbers<[1], [0], [0], [1], [0, 0, 1, 1], [], []>} : vector<288x8xbf16>, vector<8x8xbf16>, vector<288x8xf32> -> vector<288x8xf32>
    %101 = arith.addf %94, %100 : vector<288x8xf32>
    %c18_75 = arith.constant 18 : index
    %c0_76 = arith.constant 0 : index
    %102 = vector.load %arg9[%c18_75, %c0_76] : memref<342x8xf32, #tpu.memory_space<vmem>>, vector<288x8xf32>
    %103 = arith.truncf %102 : vector<288x8xf32> to vector<288x8xbf16>
    %c3_77 = arith.constant 3 : index
    %c0_78 = arith.constant 0 : index
    %c0_79 = arith.constant 0 : index
    %104 = vector.load %arg4[%c3_77, %c0_78, %c0_79] : memref<9x8x8xf32, #tpu.memory_space<vmem>>, vector<1x8x8xf32>
    %105 = vector.shape_cast %104 : vector<1x8x8xf32> to vector<8x8xf32>
    %106 = arith.truncf %105 : vector<8x8xf32> to vector<8x8xbf16>
    %cst_80 = arith.constant dense<0.000000e+00> : vector<288x8xf32>
    %107 = tpu.matmul %103, %106, %cst_80 {dimension_numbers = #tpu.dot_dimension_numbers<[1], [0], [0], [1], [0, 0, 1, 1], [], []>} : vector<288x8xbf16>, vector<8x8xbf16>, vector<288x8xf32> -> vector<288x8xf32>
    %108 = arith.addf %101, %107 : vector<288x8xf32>
    %c19_81 = arith.constant 19 : index
    %c0_82 = arith.constant 0 : index
    %109 = vector.load %arg9[%c19_81, %c0_82] : memref<342x8xf32, #tpu.memory_space<vmem>>, vector<288x8xf32>
    %110 = arith.truncf %109 : vector<288x8xf32> to vector<288x8xbf16>
    %c4_83 = arith.constant 4 : index
    %c0_84 = arith.constant 0 : index
    %c0_85 = arith.constant 0 : index
    %111 = vector.load %arg4[%c4_83, %c0_84, %c0_85] : memref<9x8x8xf32, #tpu.memory_space<vmem>>, vector<1x8x8xf32>
    %112 = vector.shape_cast %111 : vector<1x8x8xf32> to vector<8x8xf32>
    %113 = arith.truncf %112 : vector<8x8xf32> to vector<8x8xbf16>
    %cst_86 = arith.constant dense<0.000000e+00> : vector<288x8xf32>
    %114 = tpu.matmul %110, %113, %cst_86 {dimension_numbers = #tpu.dot_dimension_numbers<[1], [0], [0], [1], [0, 0, 1, 1], [], []>} : vector<288x8xbf16>, vector<8x8xbf16>, vector<288x8xf32> -> vector<288x8xf32>
    %115 = arith.addf %108, %114 : vector<288x8xf32>
    %c20_87 = arith.constant 20 : index
    %c0_88 = arith.constant 0 : index
    %116 = vector.load %arg9[%c20_87, %c0_88] : memref<342x8xf32, #tpu.memory_space<vmem>>, vector<288x8xf32>
    %117 = arith.truncf %116 : vector<288x8xf32> to vector<288x8xbf16>
    %c5_89 = arith.constant 5 : index
    %c0_90 = arith.constant 0 : index
    %c0_91 = arith.constant 0 : index
    %118 = vector.load %arg4[%c5_89, %c0_90, %c0_91] : memref<9x8x8xf32, #tpu.memory_space<vmem>>, vector<1x8x8xf32>
    %119 = vector.shape_cast %118 : vector<1x8x8xf32> to vector<8x8xf32>
    %120 = arith.truncf %119 : vector<8x8xf32> to vector<8x8xbf16>
    %cst_92 = arith.constant dense<0.000000e+00> : vector<288x8xf32>
    %121 = tpu.matmul %117, %120, %cst_92 {dimension_numbers = #tpu.dot_dimension_numbers<[1], [0], [0], [1], [0, 0, 1, 1], [], []>} : vector<288x8xbf16>, vector<8x8xbf16>, vector<288x8xf32> -> vector<288x8xf32>
    %122 = arith.addf %115, %121 : vector<288x8xf32>
    %c36_93 = arith.constant 36 : index
    %c0_94 = arith.constant 0 : index
    %123 = vector.load %arg9[%c36_93, %c0_94] : memref<342x8xf32, #tpu.memory_space<vmem>>, vector<288x8xf32>
    %124 = arith.truncf %123 : vector<288x8xf32> to vector<288x8xbf16>
    %c6_95 = arith.constant 6 : index
    %c0_96 = arith.constant 0 : index
    %c0_97 = arith.constant 0 : index
    %125 = vector.load %arg4[%c6_95, %c0_96, %c0_97] : memref<9x8x8xf32, #tpu.memory_space<vmem>>, vector<1x8x8xf32>
    %126 = vector.shape_cast %125 : vector<1x8x8xf32> to vector<8x8xf32>
    %127 = arith.truncf %126 : vector<8x8xf32> to vector<8x8xbf16>
    %cst_98 = arith.constant dense<0.000000e+00> : vector<288x8xf32>
    %128 = tpu.matmul %124, %127, %cst_98 {dimension_numbers = #tpu.dot_dimension_numbers<[1], [0], [0], [1], [0, 0, 1, 1], [], []>} : vector<288x8xbf16>, vector<8x8xbf16>, vector<288x8xf32> -> vector<288x8xf32>
    %129 = arith.addf %122, %128 : vector<288x8xf32>
    %c37_99 = arith.constant 37 : index
    %c0_100 = arith.constant 0 : index
    %130 = vector.load %arg9[%c37_99, %c0_100] : memref<342x8xf32, #tpu.memory_space<vmem>>, vector<288x8xf32>
    %131 = arith.truncf %130 : vector<288x8xf32> to vector<288x8xbf16>
    %c7_101 = arith.constant 7 : index
    %c0_102 = arith.constant 0 : index
    %c0_103 = arith.constant 0 : index
    %132 = vector.load %arg4[%c7_101, %c0_102, %c0_103] : memref<9x8x8xf32, #tpu.memory_space<vmem>>, vector<1x8x8xf32>
    %133 = vector.shape_cast %132 : vector<1x8x8xf32> to vector<8x8xf32>
    %134 = arith.truncf %133 : vector<8x8xf32> to vector<8x8xbf16>
    %cst_104 = arith.constant dense<0.000000e+00> : vector<288x8xf32>
    %135 = tpu.matmul %131, %134, %cst_104 {dimension_numbers = #tpu.dot_dimension_numbers<[1], [0], [0], [1], [0, 0, 1, 1], [], []>} : vector<288x8xbf16>, vector<8x8xbf16>, vector<288x8xf32> -> vector<288x8xf32>
    %136 = arith.addf %129, %135 : vector<288x8xf32>
    %c38_105 = arith.constant 38 : index
    %c0_106 = arith.constant 0 : index
    %137 = vector.load %arg9[%c38_105, %c0_106] : memref<342x8xf32, #tpu.memory_space<vmem>>, vector<288x8xf32>
    %138 = arith.truncf %137 : vector<288x8xf32> to vector<288x8xbf16>
    %c8_107 = arith.constant 8 : index
    %c0_108 = arith.constant 0 : index
    %c0_109 = arith.constant 0 : index
    %139 = vector.load %arg4[%c8_107, %c0_108, %c0_109] : memref<9x8x8xf32, #tpu.memory_space<vmem>>, vector<1x8x8xf32>
    %140 = vector.shape_cast %139 : vector<1x8x8xf32> to vector<8x8xf32>
    %141 = arith.truncf %140 : vector<8x8xf32> to vector<8x8xbf16>
    %cst_110 = arith.constant dense<0.000000e+00> : vector<288x8xf32>
    %142 = tpu.matmul %138, %141, %cst_110 {dimension_numbers = #tpu.dot_dimension_numbers<[1], [0], [0], [1], [0, 0, 1, 1], [], []>} : vector<288x8xbf16>, vector<8x8xbf16>, vector<288x8xf32> -> vector<288x8xf32>
    %143 = arith.addf %136, %142 : vector<288x8xf32>
    %c0_111 = arith.constant 0 : index
    %c0_112 = arith.constant 0 : index
    %144 = vector.load %arg5[%c0_111, %c0_112] : memref<1x8xf32, #tpu.memory_space<vmem>>, vector<1x8xf32>
    %145 = vector.broadcast %144 : vector<1x8xf32> to vector<288x8xf32>
    %146 = arith.addf %143, %145 : vector<288x8xf32>
    %cst_113 = arith.constant 0.000000e+00 : f32
    %147 = vector.broadcast %cst_113 : f32 to vector<288x8xf32>
    %148 = arith.maximumf %146, %147 : vector<288x8xf32>
    %149 = vector.broadcast %0 : vector<288x1xf32> to vector<288x8xf32>
    %150 = arith.mulf %148, %149 : vector<288x8xf32>
    %cst_114 = arith.constant 0.000000e+00 : f32
    %151 = vector.broadcast %cst_114 : f32 to vector<1x342x8xf32>
    %c0_115 = arith.constant 0 : index
    %c0_116 = arith.constant 0 : index
    %c0_117 = arith.constant 0 : index
    %152 = vector.load %arg7[%c0_115, %c0_116, %c0_117] : memref<1x342x8xf32, #tpu.memory_space<vmem>>, vector<1x342x8xf32>
    tpu.vector_store %arg7[%c0_115, %c0_116, %c0_117], %151 {strides = array<i32>} : memref<1x342x8xf32, #tpu.memory_space<vmem>>, vector<1x342x8xf32>,
    %c0_118 = arith.constant 0 : index
    %c19_119 = arith.constant 19 : index
    %c0_120 = arith.constant 0 : index
    %153 = vector.load %arg7[%c0_118, %c19_119, %c0_120] : memref<1x342x8xf32, #tpu.memory_space<vmem>>, vector<1x288x8xf32>
    %154 = vector.shape_cast %153 : vector<1x288x8xf32> to vector<288x8xf32>
    %155 = vector.shape_cast %150 : vector<288x8xf32> to vector<1x288x8xf32>
    tpu.vector_store %arg7[%c0_118, %c19_119, %c0_120], %155 {strides = array<i32>} : memref<1x342x8xf32, #tpu.memory_space<vmem>>, vector<1x288x8xf32>,
    %156 = tpu.iota {dimensions = array<i32: 0>} : vector<8x16xi32>
    %157 = tpu.iota {dimensions = array<i32: 1>} : vector<8x16xi32>
    %c2_i32 = arith.constant 2 : i32
    %158 = vector.broadcast %c2_i32 : i32 to vector<8x16xi32>
    %159 = arith.muli %158, %156 : vector<8x16xi32>
    %160 = arith.cmpi eq, %157, %159 : vector<8x16xi32>
    %161 = arith.extui %160 : vector<8x16xi1> to vector<8x16xi32>
    %162 = arith.sitofp %161 : vector<8x16xi32> to vector<8x16xf32>
    %c2_i32_121 = arith.constant 2 : i32
    %163 = vector.broadcast %c2_i32_121 : i32 to vector<8x16xi32>
    %164 = arith.muli %163, %156 : vector<8x16xi32>
    %c1_i32 = arith.constant 1 : i32
    %165 = vector.broadcast %c1_i32 : i32 to vector<8x16xi32>
    %166 = arith.addi %164, %165 : vector<8x16xi32>
    %167 = arith.cmpi eq, %157, %166 : vector<8x16xi32>
    %168 = arith.extui %167 : vector<8x16xi1> to vector<8x16xi32>
    %169 = arith.sitofp %168 : vector<8x16xi32> to vector<8x16xf32>
    %cst_122 = arith.constant 0.000000e+00 : f32
    %170 = vector.broadcast %cst_122 : f32 to vector<1x110x8xf32>
    %c0_123 = arith.constant 0 : index
    %c0_124 = arith.constant 0 : index
    %c0_125 = arith.constant 0 : index
    %171 = vector.load %arg8[%c0_123, %c0_124, %c0_125] : memref<1x110x8xf32, #tpu.memory_space<vmem>>, vector<1x110x8xf32>
    tpu.vector_store %arg8[%c0_123, %c0_124, %c0_125], %170 {strides = array<i32>} : memref<1x110x8xf32, #tpu.memory_space<vmem>>, vector<1x110x8xf32>,
    %c0_126 = arith.constant 0 : index
    %c19_127 = arith.constant 19 : index
    %c0_128 = arith.constant 0 : index
    %172 = vector.load %arg7[%c0_126, %c19_127, %c0_128] : memref<1x342x8xf32, #tpu.memory_space<vmem>>, vector<1x16x8xf32>
    %173 = vector.shape_cast %172 : vector<1x16x8xf32> to vector<16x8xf32>
    %c0_129 = arith.constant 0 : index
    %c37_130 = arith.constant 37 : index
    %c0_131 = arith.constant 0 : index
    %174 = vector.load %arg7[%c0_129, %c37_130, %c0_131] : memref<1x342x8xf32, #tpu.memory_space<vmem>>, vector<1x16x8xf32>
    %175 = vector.shape_cast %174 : vector<1x16x8xf32> to vector<16x8xf32>
    %176 = arith.maximumf %173, %175 : vector<16x8xf32>
    %cst_132 = arith.constant dense<0.000000e+00> : vector<8x8xf32>
    %177 = tpu.matmul %162, %176, %cst_132 {dimension_numbers = #tpu.dot_dimension_numbers<[1], [0], [0], [1], [0, 0, 1, 1], [], []>} : vector<8x16xf32>, vector<16x8xf32>, vector<8x8xf32> -> vector<8x8xf32>
    %cst_133 = arith.constant dense<0.000000e+00> : vector<8x8xf32>
    %178 = tpu.matmul %169, %176, %cst_133 {dimension_numbers = #tpu.dot_dimension_numbers<[1], [0], [0], [1], [0, 0, 1, 1], [], []>} : vector<8x16xf32>, vector<16x8xf32>, vector<8x8xf32> -> vector<8x8xf32>
    %179 = arith.maximumf %177, %178 : vector<8x8xf32>
    %c0_134 = arith.constant 0 : index
    %c11 = arith.constant 11 : index
    %c0_135 = arith.constant 0 : index
    %180 = vector.load %arg8[%c0_134, %c11, %c0_135] : memref<1x110x8xf32, #tpu.memory_space<vmem>>, vector<1x8x8xf32>
    %181 = vector.shape_cast %180 : vector<1x8x8xf32> to vector<8x8xf32>
    %182 = vector.shape_cast %179 : vector<8x8xf32> to vector<1x8x8xf32>
    tpu.vector_store %arg8[%c0_134, %c11, %c0_135], %182 {strides = array<i32>} : memref<1x110x8xf32, #tpu.memory_space<vmem>>, vector<1x8x8xf32>,
    %c0_136 = arith.constant 0 : index
    %c55 = arith.constant 55 : index
    %c0_137 = arith.constant 0 : index
    %183 = vector.load %arg7[%c0_136, %c55, %c0_137] : memref<1x342x8xf32, #tpu.memory_space<vmem>>, vector<1x16x8xf32>
    %184 = vector.shape_cast %183 : vector<1x16x8xf32> to vector<16x8xf32>
    %c0_138 = arith.constant 0 : index
    %c73 = arith.constant 73 : index
    %c0_139 = arith.constant 0 : index
    %185 = vector.load %arg7[%c0_138, %c73, %c0_139] : memref<1x342x8xf32, #tpu.memory_space<vmem>>, vector<1x16x8xf32>
    %186 = vector.shape_cast %185 : vector<1x16x8xf32> to vector<16x8xf32>
    %187 = arith.maximumf %184, %186 : vector<16x8xf32>
    %cst_140 = arith.constant dense<0.000000e+00> : vector<8x8xf32>
    %188 = tpu.matmul %162, %187, %cst_140 {dimension_numbers = #tpu.dot_dimension_numbers<[1], [0], [0], [1], [0, 0, 1, 1], [], []>} : vector<8x16xf32>, vector<16x8xf32>, vector<8x8xf32> -> vector<8x8xf32>
    %cst_141 = arith.constant dense<0.000000e+00> : vector<8x8xf32>
    %189 = tpu.matmul %169, %187, %cst_141 {dimension_numbers = #tpu.dot_dimension_numbers<[1], [0], [0], [1], [0, 0, 1, 1], [], []>} : vector<8x16xf32>, vector<16x8xf32>, vector<8x8xf32> -> vector<8x8xf32>
    %190 = arith.maximumf %188, %189 : vector<8x8xf32>
    %c0_142 = arith.constant 0 : index
    %c21 = arith.constant 21 : index
    %c0_143 = arith.constant 0 : index
    %191 = vector.load %arg8[%c0_142, %c21, %c0_143] : memref<1x110x8xf32, #tpu.memory_space<vmem>>, vector<1x8x8xf32>
    %192 = vector.shape_cast %191 : vector<1x8x8xf32> to vector<8x8xf32>
    %193 = vector.shape_cast %190 : vector<8x8xf32> to vector<1x8x8xf32>
    tpu.vector_store %arg8[%c0_142, %c21, %c0_143], %193 {strides = array<i32>} : memref<1x110x8xf32, #tpu.memory_space<vmem>>, vector<1x8x8xf32>,
    %c0_144 = arith.constant 0 : index
    %c91 = arith.constant 91 : index
    %c0_145 = arith.constant 0 : index
    %194 = vector.load %arg7[%c0_144, %c91, %c0_145] : memref<1x342x8xf32, #tpu.memory_space<vmem>>, vector<1x16x8xf32>
    %195 = vector.shape_cast %194 : vector<1x16x8xf32> to vector<16x8xf32>
    %c0_146 = arith.constant 0 : index
    %c109 = arith.constant 109 : index
    %c0_147 = arith.constant 0 : index
    %196 = vector.load %arg7[%c0_146, %c109, %c0_147] : memref<1x342x8xf32, #tpu.memory_space<vmem>>, vector<1x16x8xf32>
    %197 = vector.shape_cast %196 : vector<1x16x8xf32> to vector<16x8xf32>
    %198 = arith.maximumf %195, %197 : vector<16x8xf32>
    %cst_148 = arith.constant dense<0.000000e+00> : vector<8x8xf32>
    %199 = tpu.matmul %162, %198, %cst_148 {dimension_numbers = #tpu.dot_dimension_numbers<[1], [0], [0], [1], [0, 0, 1, 1], [], []>} : vector<8x16xf32>, vector<16x8xf32>, vector<8x8xf32> -> vector<8x8xf32>
    %cst_149 = arith.constant dense<0.000000e+00> : vector<8x8xf32>
    %200 = tpu.matmul %169, %198, %cst_149 {dimension_numbers = #tpu.dot_dimension_numbers<[1], [0], [0], [1], [0, 0, 1, 1], [], []>} : vector<8x16xf32>, vector<16x8xf32>, vector<8x8xf32> -> vector<8x8xf32>
    %201 = arith.maximumf %199, %200 : vector<8x8xf32>
    %c0_150 = arith.constant 0 : index
    %c31 = arith.constant 31 : index
    %c0_151 = arith.constant 0 : index
    %202 = vector.load %arg8[%c0_150, %c31, %c0_151] : memref<1x110x8xf32, #tpu.memory_space<vmem>>, vector<1x8x8xf32>
    %203 = vector.shape_cast %202 : vector<1x8x8xf32> to vector<8x8xf32>
    %204 = vector.shape_cast %201 : vector<8x8xf32> to vector<1x8x8xf32>
    tpu.vector_store %arg8[%c0_150, %c31, %c0_151], %204 {strides = array<i32>} : memref<1x110x8xf32, #tpu.memory_space<vmem>>, vector<1x8x8xf32>,
    %c0_152 = arith.constant 0 : index
    %c127 = arith.constant 127 : index
    %c0_153 = arith.constant 0 : index
    %205 = vector.load %arg7[%c0_152, %c127, %c0_153] : memref<1x342x8xf32, #tpu.memory_space<vmem>>, vector<1x16x8xf32>
    %206 = vector.shape_cast %205 : vector<1x16x8xf32> to vector<16x8xf32>
    %c0_154 = arith.constant 0 : index
    %c145 = arith.constant 145 : index
    %c0_155 = arith.constant 0 : index
    %207 = vector.load %arg7[%c0_154, %c145, %c0_155] : memref<1x342x8xf32, #tpu.memory_space<vmem>>, vector<1x16x8xf32>
    %208 = vector.shape_cast %207 : vector<1x16x8xf32> to vector<16x8xf32>
    %209 = arith.maximumf %206, %208 : vector<16x8xf32>
    %cst_156 = arith.constant dense<0.000000e+00> : vector<8x8xf32>
    %210 = tpu.matmul %162, %209, %cst_156 {dimension_numbers = #tpu.dot_dimension_numbers<[1], [0], [0], [1], [0, 0, 1, 1], [], []>} : vector<8x16xf32>, vector<16x8xf32>, vector<8x8xf32> -> vector<8x8xf32>
    %cst_157 = arith.constant dense<0.000000e+00> : vector<8x8xf32>
    %211 = tpu.matmul %169, %209, %cst_157 {dimension_numbers = #tpu.dot_dimension_numbers<[1], [0], [0], [1], [0, 0, 1, 1], [], []>} : vector<8x16xf32>, vector<16x8xf32>, vector<8x8xf32> -> vector<8x8xf32>
    %212 = arith.maximumf %210, %211 : vector<8x8xf32>
    %c0_158 = arith.constant 0 : index
    %c41 = arith.constant 41 : index
    %c0_159 = arith.constant 0 : index
    %213 = vector.load %arg8[%c0_158, %c41, %c0_159] : memref<1x110x8xf32, #tpu.memory_space<vmem>>, vector<1x8x8xf32>
    %214 = vector.shape_cast %213 : vector<1x8x8xf32> to vector<8x8xf32>
    %215 = vector.shape_cast %212 : vector<8x8xf32> to vector<1x8x8xf32>
    tpu.vector_store %arg8[%c0_158, %c41, %c0_159], %215 {strides = array<i32>} : memref<1x110x8xf32, #tpu.memory_space<vmem>>, vector<1x8x8xf32>,
    %c0_160 = arith.constant 0 : index
    %c163 = arith.constant 163 : index
    %c0_161 = arith.constant 0 : index
    %216 = vector.load %arg7[%c0_160, %c163, %c0_161] : memref<1x342x8xf32, #tpu.memory_space<vmem>>, vector<1x16x8xf32>
    %217 = vector.shape_cast %216 : vector<1x16x8xf32> to vector<16x8xf32>
    %c0_162 = arith.constant 0 : index
    %c181 = arith.constant 181 : index
    %c0_163 = arith.constant 0 : index
    %218 = vector.load %arg7[%c0_162, %c181, %c0_163] : memref<1x342x8xf32, #tpu.memory_space<vmem>>, vector<1x16x8xf32>
    %219 = vector.shape_cast %218 : vector<1x16x8xf32> to vector<16x8xf32>
    %220 = arith.maximumf %217, %219 : vector<16x8xf32>
    %cst_164 = arith.constant dense<0.000000e+00> : vector<8x8xf32>
    %221 = tpu.matmul %162, %220, %cst_164 {dimension_numbers = #tpu.dot_dimension_numbers<[1], [0], [0], [1], [0, 0, 1, 1], [], []>} : vector<8x16xf32>, vector<16x8xf32>, vector<8x8xf32> -> vector<8x8xf32>
    %cst_165 = arith.constant dense<0.000000e+00> : vector<8x8xf32>
    %222 = tpu.matmul %169, %220, %cst_165 {dimension_numbers = #tpu.dot_dimension_numbers<[1], [0], [0], [1], [0, 0, 1, 1], [], []>} : vector<8x16xf32>, vector<16x8xf32>, vector<8x8xf32> -> vector<8x8xf32>
    %223 = arith.maximumf %221, %222 : vector<8x8xf32>
    %c0_166 = arith.constant 0 : index
    %c51 = arith.constant 51 : index
    %c0_167 = arith.constant 0 : index
    %224 = vector.load %arg8[%c0_166, %c51, %c0_167] : memref<1x110x8xf32, #tpu.memory_space<vmem>>, vector<1x8x8xf32>
    %225 = vector.shape_cast %224 : vector<1x8x8xf32> to vector<8x8xf32>
    %226 = vector.shape_cast %223 : vector<8x8xf32> to vector<1x8x8xf32>
    tpu.vector_store %arg8[%c0_166, %c51, %c0_167], %226 {strides = array<i32>} : memref<1x110x8xf32, #tpu.memory_space<vmem>>, vector<1x8x8xf32>,
    %c0_168 = arith.constant 0 : index
    %c199 = arith.constant 199 : index
    %c0_169 = arith.constant 0 : index
    %227 = vector.load %arg7[%c0_168, %c199, %c0_169] : memref<1x342x8xf32, #tpu.memory_space<vmem>>, vector<1x16x8xf32>
    %228 = vector.shape_cast %227 : vector<1x16x8xf32> to vector<16x8xf32>
    %c0_170 = arith.constant 0 : index
    %c217 = arith.constant 217 : index
    %c0_171 = arith.constant 0 : index
    %229 = vector.load %arg7[%c0_170, %c217, %c0_171] : memref<1x342x8xf32, #tpu.memory_space<vmem>>, vector<1x16x8xf32>
    %230 = vector.shape_cast %229 : vector<1x16x8xf32> to vector<16x8xf32>
    %231 = arith.maximumf %228, %230 : vector<16x8xf32>
    %cst_172 = arith.constant dense<0.000000e+00> : vector<8x8xf32>
    %232 = tpu.matmul %162, %231, %cst_172 {dimension_numbers = #tpu.dot_dimension_numbers<[1], [0], [0], [1], [0, 0, 1, 1], [], []>} : vector<8x16xf32>, vector<16x8xf32>, vector<8x8xf32> -> vector<8x8xf32>
    %cst_173 = arith.constant dense<0.000000e+00> : vector<8x8xf32>
    %233 = tpu.matmul %169, %231, %cst_173 {dimension_numbers = #tpu.dot_dimension_numbers<[1], [0], [0], [1], [0, 0, 1, 1], [], []>} : vector<8x16xf32>, vector<16x8xf32>, vector<8x8xf32> -> vector<8x8xf32>
    %234 = arith.maximumf %232, %233 : vector<8x8xf32>
    %c0_174 = arith.constant 0 : index
    %c61 = arith.constant 61 : index
    %c0_175 = arith.constant 0 : index
    %235 = vector.load %arg8[%c0_174, %c61, %c0_175] : memref<1x110x8xf32, #tpu.memory_space<vmem>>, vector<1x8x8xf32>
    %236 = vector.shape_cast %235 : vector<1x8x8xf32> to vector<8x8xf32>
    %237 = vector.shape_cast %234 : vector<8x8xf32> to vector<1x8x8xf32>
    tpu.vector_store %arg8[%c0_174, %c61, %c0_175], %237 {strides = array<i32>} : memref<1x110x8xf32, #tpu.memory_space<vmem>>, vector<1x8x8xf32>,
    %c0_176 = arith.constant 0 : index
    %c235 = arith.constant 235 : index
    %c0_177 = arith.constant 0 : index
    %238 = vector.load %arg7[%c0_176, %c235, %c0_177] : memref<1x342x8xf32, #tpu.memory_space<vmem>>, vector<1x16x8xf32>
    %239 = vector.shape_cast %238 : vector<1x16x8xf32> to vector<16x8xf32>
    %c0_178 = arith.constant 0 : index
    %c253 = arith.constant 253 : index
    %c0_179 = arith.constant 0 : index
    %240 = vector.load %arg7[%c0_178, %c253, %c0_179] : memref<1x342x8xf32, #tpu.memory_space<vmem>>, vector<1x16x8xf32>
    %241 = vector.shape_cast %240 : vector<1x16x8xf32> to vector<16x8xf32>
    %242 = arith.maximumf %239, %241 : vector<16x8xf32>
    %cst_180 = arith.constant dense<0.000000e+00> : vector<8x8xf32>
    %243 = tpu.matmul %162, %242, %cst_180 {dimension_numbers = #tpu.dot_dimension_numbers<[1], [0], [0], [1], [0, 0, 1, 1], [], []>} : vector<8x16xf32>, vector<16x8xf32>, vector<8x8xf32> -> vector<8x8xf32>
    %cst_181 = arith.constant dense<0.000000e+00> : vector<8x8xf32>
    %244 = tpu.matmul %169, %242, %cst_181 {dimension_numbers = #tpu.dot_dimension_numbers<[1], [0], [0], [1], [0, 0, 1, 1], [], []>} : vector<8x16xf32>, vector<16x8xf32>, vector<8x8xf32> -> vector<8x8xf32>
    %245 = arith.maximumf %243, %244 : vector<8x8xf32>
    %c0_182 = arith.constant 0 : index
    %c71 = arith.constant 71 : index
    %c0_183 = arith.constant 0 : index
    %246 = vector.load %arg8[%c0_182, %c71, %c0_183] : memref<1x110x8xf32, #tpu.memory_space<vmem>>, vector<1x8x8xf32>
    %247 = vector.shape_cast %246 : vector<1x8x8xf32> to vector<8x8xf32>
    %248 = vector.shape_cast %245 : vector<8x8xf32> to vector<1x8x8xf32>
    tpu.vector_store %arg8[%c0_182, %c71, %c0_183], %248 {strides = array<i32>} : memref<1x110x8xf32, #tpu.memory_space<vmem>>, vector<1x8x8xf32>,
    %c0_184 = arith.constant 0 : index
    %c271 = arith.constant 271 : index
    %c0_185 = arith.constant 0 : index
    %249 = vector.load %arg7[%c0_184, %c271, %c0_185] : memref<1x342x8xf32, #tpu.memory_space<vmem>>, vector<1x16x8xf32>
    %250 = vector.shape_cast %249 : vector<1x16x8xf32> to vector<16x8xf32>
    %c0_186 = arith.constant 0 : index
    %c289 = arith.constant 289 : index
    %c0_187 = arith.constant 0 : index
    %251 = vector.load %arg7[%c0_186, %c289, %c0_187] : memref<1x342x8xf32, #tpu.memory_space<vmem>>, vector<1x16x8xf32>
    %252 = vector.shape_cast %251 : vector<1x16x8xf32> to vector<16x8xf32>
    %253 = arith.maximumf %250, %252 : vector<16x8xf32>
    %cst_188 = arith.constant dense<0.000000e+00> : vector<8x8xf32>
    %254 = tpu.matmul %162, %253, %cst_188 {dimension_numbers = #tpu.dot_dimension_numbers<[1], [0], [0], [1], [0, 0, 1, 1], [], []>} : vector<8x16xf32>, vector<16x8xf32>, vector<8x8xf32> -> vector<8x8xf32>
    %cst_189 = arith.constant dense<0.000000e+00> : vector<8x8xf32>
    %255 = tpu.matmul %169, %253, %cst_189 {dimension_numbers = #tpu.dot_dimension_numbers<[1], [0], [0], [1], [0, 0, 1, 1], [], []>} : vector<8x16xf32>, vector<16x8xf32>, vector<8x8xf32> -> vector<8x8xf32>
    %256 = arith.maximumf %254, %255 : vector<8x8xf32>
    %c0_190 = arith.constant 0 : index
    %c81 = arith.constant 81 : index
    %c0_191 = arith.constant 0 : index
    %257 = vector.load %arg8[%c0_190, %c81, %c0_191] : memref<1x110x8xf32, #tpu.memory_space<vmem>>, vector<1x8x8xf32>
    %258 = vector.shape_cast %257 : vector<1x8x8xf32> to vector<8x8xf32>
    %259 = vector.shape_cast %256 : vector<8x8xf32> to vector<1x8x8xf32>
    tpu.vector_store %arg8[%c0_190, %c81, %c0_191], %259 {strides = array<i32>} : memref<1x110x8xf32, #tpu.memory_space<vmem>>, vector<1x8x8xf32>,
    return
  }
  func.func @transform_0(%arg0: i32) -> (i32, i32, i32) {
    %c0_i32 = arith.constant 0 : i32
    %c0_i32_0 = arith.constant 0 : i32
    %c0_i32_1 = arith.constant 0 : i32
    return %arg0, %c0_i32, %c0_i32_0 : i32, i32, i32
  }
  func.func @transform_1(%arg0: i32) -> (i32, i32, i32) {
    %c0_i32 = arith.constant 0 : i32
    %c0_i32_0 = arith.constant 0 : i32
    %c0_i32_1 = arith.constant 0 : i32
    %c0_i32_2 = arith.constant 0 : i32
    return %c0_i32, %c0_i32_0, %c0_i32_1 : i32, i32, i32
  }
  func.func @transform_2(%arg0: i32) -> (i32, i32) {
    %c0_i32 = arith.constant 0 : i32
    %c0_i32_0 = arith.constant 0 : i32
    %c0_i32_1 = arith.constant 0 : i32
    return %c0_i32, %c0_i32_0 : i32, i32
  }
  func.func @transform_3(%arg0: i32) -> (i32, i32, i32) {
    %c0_i32 = arith.constant 0 : i32
    %c0_i32_0 = arith.constant 0 : i32
    %c0_i32_1 = arith.constant 0 : i32
    %c0_i32_2 = arith.constant 0 : i32
    return %c0_i32, %c0_i32_0, %c0_i32_1 : i32, i32, i32
  }
  func.func @transform_4(%arg0: i32) -> (i32, i32) {
    %c0_i32 = arith.constant 0 : i32
    %c0_i32_0 = arith.constant 0 : i32
    %c0_i32_1 = arith.constant 0 : i32
    return %c0_i32, %c0_i32_0 : i32, i32
  }
  func.func @transform_5(%arg0: i32) -> (i32, i32) {
    %c0_i32 = arith.constant 0 : i32
    %c0_i32_0 = arith.constant 0 : i32
    %c0_i32_1 = arith.constant 0 : i32
    return %c0_i32, %c0_i32_0 : i32, i32
  }
  func.func @transform_6(%arg0: i32) -> (i32, i32, i32) {
    %c0_i32 = arith.constant 0 : i32
    %c0_i32_0 = arith.constant 0 : i32
    %c0_i32_1 = arith.constant 0 : i32
    return %arg0, %c0_i32, %c0_i32_0 : i32, i32, i32
  }
  func.func @transform_7(%arg0: i32) -> (i32, i32, i32) {
    %c0_i32 = arith.constant 0 : i32
    %c0_i32_0 = arith.constant 0 : i32
    %c0_i32_1 = arith.constant 0 : i32
    return %arg0, %c0_i32, %c0_i32_0 : i32, i32, i32
  }
}

</mosaic_0001>

<bundles_post_ra>
// kernel: tpu_custom_call.1
= control target key start
LH: loop header
LB: loop body
LE: loop exit
PB: predicated region body
PF: predicated region fallthrough
CT: control target
= control target key end

     0   :  { %s6181_s24 = smov 0   ;;  %s8975_s0 = inlined_call_operand.vmem [shape: f32[2,342,3], index: 0, kind: input, shape index: {}]   ;;  %s8976_s1 = inlined_call_operand.vmem [shape: f32[9,3,8], index: 1, kind: input, shape index: {}]   ;;  %s8977_s2 = inlined_call_operand.vmem [shape: f32[1,8], index: 2, kind: input, shape index: {}]   ;;  %s8978_s3 = inlined_call_operand.vmem [shape: f32[9,8,8], index: 3, kind: input, shape index: {}]   ;;  %s8979_s4 = inlined_call_operand.vmem [shape: f32[1,8], index: 4, kind: input, shape index: {}]   ;;  %s8980_s5 = inlined_call_operand.vmem [shape: f32[288,1], index: 5, kind: input, shape index: {}]   ;;  %s8981_s6 = inlined_call_operand.vmem [shape: f32[2,342,8], index: 6, kind: output, shape index: {0}]   ;;  %s8982_s7 = inlined_call_operand.vmem [shape: f32[2,110,8], index: 7, kind: output, shape index: {1}]  }
   0x1 LB: > { %s5740_s25 = sadd.s32 4294967295, %s6136_s24   ;;  %p5744_p0 = scmp.ge.s32.totalorder %s6136_s24, 1  ;;  %s6136_s24 = sphi %s6181_s24, %s18_s24  }
   0x2   : > { %p240_p1 = scmp.lt.s32.totalorder %s6136_s24, 3 }
   0x4   : > { %p241_p2 = pnand %p5744_p0, %p240_p1 }
   0x6   : > { %244 = sbr.rel (%p241_p2) target bundleno = 1759 (0x6df), region = 44 }
   0xb   : > { %v5748_v0 = vld [vmem:[%s8976_s1 + $0x4] sm:$0x7]  ;;  %vm497_vm0 = vcmask 1040384   ;;  %vm498_vm1 = vcmask 1041408   ;;  %p277_p3 = scmp.lt.s32.totalorder %s5740_s25, 1  ;;  %v6138_v2 = vmov 65535  }
   0xc   : > { %v441_v1 = vpack.c.bf16 %v5748_v0, %v5748_v0  ;;  %v499_v3 = vsel %vm497_vm0, 4294967295, %v6138_v2  ;;  %v383_v4 = vld [vmem:[%s8976_s1] sm:$0x7]  ;;  %vm442_vm2 = vcmask 23552   ;;  %v5823_v57 = vld [vmem:[%s8976_s1 + $0x10] sm:$0x7] }
   0xd   : > { %v6195_v5 = vsel %vm498_vm1, %v499_v3, 0  ;;  %v384_v6 = vpack.c.bf16 %v383_v4, %v383_v4  ;;  %s9095_s25 = smov (!%p277_p3, %s5740_s25), 1  ;;  %v1313_v58 = vpack.c.bf16 %v5823_v57, %v5823_v57  ;;  %vm3042_vm3 = vcmask 1043456  }
   0xe   : > { %v502_v7 = vand.u32 %v6195_v5, %v441_v1  ;;  %s6110_s30 = smul.u32 344, %s9095_s25  ;;  %vm2794_vm4 = vcmask 64512   ;;  %vm5267_vm7 = vcmask 130048   ;;  %vm2837_vm8 = vcmask 62464  }
   0xf   : > { %v658_v8 = vand.u32 %v6195_v5, %v384_v6  ;;  %v1369_v59 = vand.u32 %v1313_v58, %v6195_v5  ;;  %s6111_s29 = smul.u32 112, %s9095_s25 }
  0x10   : > { %511 = vmatpush.bf16.msra.mxu0 %v502_v7  ;;  %6108 = vmatpush.bf16.msra.mxu2 %v502_v7  ;;  %s6207_s10 = scalar_lea.vmem %s8975_s0, %s6110_s30  ;;  %s8287_s27 = scalar_lea.vmem %s8981_s6, %s6110_s30 }
  0x11   : > { %667 = vmatpush.bf16.msra.mxu1 %v658_v8  ;;  %6109 = vmatpush.bf16.msra.mxu3 %v658_v8  ;;  %v385_v9 = vld [vmem:[%s6207_s10 + $0x1] sm:$0xff]  ;;  %v386_v10 = vld [vmem:[%s6207_s10 + $0x9] sm:$0xff]  ;;  %v407_v11 = vld [vmem:[%s6207_s10 + $0xb1] sm:$0xff]  ;;  %s8799_s11 = scalar_lea.vmem %s8982_s7, %s6111_s29 }
  0x12   : > { %v421_v12 = vpack.c.bf16 %v386_v10, %v385_v9  ;;  %v408_v13 = vld [vmem:[%s6207_s10 + $0xb9] sm:$0xff]  ;;  %v330_v15 = vld [vmem:[%s6207_s10 + $0x8] sm:$0xff]  ;;  %v351_v18 = vld [vmem:[%s6207_s10 + $0xb0] sm:$0xff] }
  0x13   : > { %v329_v14 = vld [vmem:[%s6207_s10] sm:$0xff]  ;;  %v432_v16 = vpack.c.bf16 %v408_v13, %v407_v11  ;;  %v352_v19 = vld [vmem:[%s6207_s10 + $0xb8] sm:$0xff]  ;;  %v410_v24 = vld [vmem:[%s6207_s10 + $0xc9] sm:$0xff] }
  0x14   : > { %v365_v17 = vpack.c.bf16 %v330_v15, %v329_v14  ;;  %5749 = vmatmul.msk.bf16.vlgmr.msra.gmra.mxu0 %vm442_vm2, %v421_v12  ;;  %v376_v20 = vpack.c.bf16 %v352_v19, %v351_v18  ;;  %v387_v21 = vld [vmem:[%s6207_s10 + $0x11] sm:$0xff]  ;;  %v388_v22 = vld [vmem:[%s6207_s10 + $0x19] sm:$0xff]  ;;  %v409_v23 = vld [vmem:[%s6207_s10 + $0xc1] sm:$0xff] }
  0x15   : > { %5760 = vmatmul.msk.bf16.vlgmr.msra.gmra.mxu2 %vm442_vm2, %v432_v16  ;;  %v331_v25 = vld [vmem:[%s6207_s10 + $0x10] sm:$0xff]  ;;  %v332_v26 = vld [vmem:[%s6207_s10 + $0x18] sm:$0xff]  ;;  %v353_v27 = vld [vmem:[%s6207_s10 + $0xc0] sm:$0xff]  ;;  %v422_v29 = vpack.c.bf16 %v388_v22, %v387_v21  ;;  %v433_v30 = vpack.c.bf16 %v410_v24, %v409_v23  ;;  %1378 = vmatpush.bf16.msrb.mxu0 %v1369_v59 }
  0x16   : > { %5767 = vmatmul.msk.bf16.vlgmr.msra.gmra.mxu1 %vm442_vm2, %v365_v17  ;;  %5778 = vmatmul.msk.bf16.vlgmr.msra.gmra.mxu3 %vm442_vm2, %v376_v20  ;;  %v354_v28 = vld [vmem:[%s6207_s10 + $0xc8] sm:$0xff]  ;;  %v366_v31 = vpack.c.bf16 %v332_v26, %v331_v25  ;;  %v411_v35 = vld [vmem:[%s6207_s10 + $0xd1] sm:$0xff]  ;;  %v412_v36 = vld [vmem:[%s6207_s10 + $0xd9] sm:$0xff] }
  0x17   : > { %v377_v32 = vpack.c.bf16 %v354_v28, %v353_v27  ;;  %v389_v33 = vld [vmem:[%s6207_s10 + $0x21] sm:$0xff]  ;;  %v390_v34 = vld [vmem:[%s6207_s10 + $0x29] sm:$0xff]  ;;  %v356_v40 = vld [vmem:[%s6207_s10 + $0xd8] sm:$0xff]  ;;  %v434_v42 = vpack.c.bf16 %v412_v36, %v411_v35 }
  0x18   : > { %v333_v37 = vld [vmem:[%s6207_s10 + $0x20] sm:$0xff]  ;;  %v334_v38 = vld [vmem:[%s6207_s10 + $0x28] sm:$0xff]  ;;  %v355_v39 = vld [vmem:[%s6207_s10 + $0xd0] sm:$0xff]  ;;  %v423_v41 = vpack.c.bf16 %v390_v34, %v389_v33 }
  0x19   : > { %v367_v43 = vpack.c.bf16 %v334_v38, %v333_v37  ;;  %v378_v44 = vpack.c.bf16 %v356_v40, %v355_v39  ;;  %v391_v45 = vld [vmem:[%s6207_s10 + $0x31] sm:$0xff]  ;;  %v392_v46 = vld [vmem:[%s6207_s10 + $0x39] sm:$0xff]  ;;  %v413_v47 = vld [vmem:[%s6207_s10 + $0xe1] sm:$0xff] }
  0x1a   : > { %v414_v48 = vld [vmem:[%s6207_s10 + $0xe9] sm:$0xff]  ;;  %v336_v50 = vld [vmem:[%s6207_s10 + $0x38] sm:$0xff]  ;;  %v357_v51 = vld [vmem:[%s6207_s10 + $0xe0] sm:$0xff]  ;;  %v424_v53 = vpack.c.bf16 %v392_v46, %v391_v45 }
  0x1b   : > { %v335_v49 = vld [vmem:[%s6207_s10 + $0x30] sm:$0xff]  ;;  %v358_v52 = vld [vmem:[%s6207_s10 + $0xe8] sm:$0xff]  ;;  %v435_v54 = vpack.c.bf16 %v414_v48, %v413_v47  ;;  %v416_v63 = vld [vmem:[%s6207_s10 + $0xf9] sm:$0xff] }
  0x1c   : > { %v368_v55 = vpack.c.bf16 %v336_v50, %v335_v49  ;;  %v379_v56 = vpack.c.bf16 %v358_v52, %v357_v51  ;;  %v393_v60 = vld [vmem:[%s6207_s10 + $0x41] sm:$0xff]  ;;  %v394_v61 = vld [vmem:[%s6207_s10 + $0x49] sm:$0xff]  ;;  %v415_v62 = vld [vmem:[%s6207_s10 + $0xf1] sm:$0xff] }
  0x1d   : > { %v337_v0 = vld [vmem:[%s6207_s10 + $0x40] sm:$0xff]  ;;  %v338_v1 = vld [vmem:[%s6207_s10 + $0x48] sm:$0xff]  ;;  %v359_v2 = vld [vmem:[%s6207_s10 + $0xf0] sm:$0xff]  ;;  %v425_v4 = vpack.c.bf16 %v394_v61, %v393_v60  ;;  %v436_v6 = vpack.c.bf16 %v416_v63, %v415_v62 }
  0x1e   : > { %v360_v3 = vld [vmem:[%s6207_s10 + $0xf8] sm:$0xff]  ;;  %v369_v7 = vpack.c.bf16 %v338_v1, %v337_v0  ;;  %v5785_v9 = vld [vmem:[%s8976_s1 + $0x8] sm:$0x7]  ;;  %v5804_v10 = vld [vmem:[%s8976_s1 + $0xc] sm:$0x7] }
  0x1f   : > { %v380_v8 = vpack.c.bf16 %v360_v3, %v359_v2  ;;  %v815_v11 = vpack.c.bf16 %v5785_v9, %v5785_v9  ;;  %v1064_v12 = vpack.c.bf16 %v5804_v10, %v5804_v10  ;;  %v395_v15 = vld [vmem:[%s6207_s10 + $0x51] sm:$0xff]  ;;  %v396_v16 = vld [vmem:[%s6207_s10 + $0x59] sm:$0xff]  ;;  %v417_v17 = vld [vmem:[%s6207_s10 + $0x101] sm:$0xff] }
  0x20   : > { %v418_v18 = vld [vmem:[%s6207_s10 + $0x109] sm:$0xff]  ;;  %v340_v20 = vld [vmem:[%s6207_s10 + $0x58] sm:$0xff]  ;;  %v361_v21 = vld [vmem:[%s6207_s10 + $0x100] sm:$0xff]  ;;  %v426_v23 = vpack.c.bf16 %v396_v16, %v395_v15 }
  0x21   : > { %v871_v13 = vand.u32 %v815_v11, %v6195_v5  ;;  %v1120_v14 = vand.u32 %v1064_v12, %v6195_v5  ;;  %v339_v19 = vld [vmem:[%s6207_s10 + $0x50] sm:$0xff]  ;;  %v362_v22 = vld [vmem:[%s6207_s10 + $0x108] sm:$0xff]  ;;  %v437_v24 = vpack.c.bf16 %v418_v18, %v417_v17  ;;  %v364_v34 = vld [vmem:[%s6207_s10 + $0x118] sm:$0xff] }
  0x22   : > { %v370_v25 = vpack.c.bf16 %v340_v20, %v339_v19  ;;  %v381_v26 = vpack.c.bf16 %v362_v22, %v361_v21  ;;  %v397_v27 = vld [vmem:[%s6207_s10 + $0x61] sm:$0xff]  ;;  %v398_v28 = vld [vmem:[%s6207_s10 + $0x69] sm:$0xff]  ;;  %v399_v39 = vld [vmem:[%s6207_s10 + $0x71] sm:$0xff] }
  0x23   : > { %880 = vmatpush.bf16.msrb.mxu2 %v871_v13  ;;  %1129 = vmatpush.bf16.msrb.mxu3 %v1120_v14  ;;  %v363_v33 = vld [vmem:[%s6207_s10 + $0x110] sm:$0xff]  ;;  %v427_v35 = vpack.c.bf16 %v398_v28, %v397_v27  ;;  %v400_v40 = vld [vmem:[%s6207_s10 + $0x79] sm:$0xff]  ;;  %v401_v51 = vld [vmem:[%s6207_s10 + $0x81] sm:$0xff] }
  0x24   : > { %5750 = vmatmul.msk.bf16.gmra.mxu0 %vm442_vm2, %v422_v29  ;;  %v419_v29 = vld [vmem:[%s6207_s10 + $0x111] sm:$0xff]  ;;  %v382_v38 = vpack.c.bf16 %v364_v34, %v363_v33  ;;  %v1009_v46 = vld [vmem:[%s6207_s10 + $0x1a] sm:$0xff]  ;;  %v428_v47 = vpack.c.bf16 %v400_v40, %v399_v39  ;;  %v402_v52 = vld [vmem:[%s6207_s10 + $0x89] sm:$0xff] }
  0x25   : > { %5761 = vmatmul.msk.bf16.gmra.mxu2 %vm442_vm2, %v433_v30  ;;  %v420_v30 = vld [vmem:[%s6207_s10 + $0x119] sm:$0xff]  ;;  %v429_v57 = vpack.c.bf16 %v402_v52, %v401_v51  ;;  %v5842_v14 = vld [vmem:[%s8976_s1 + $0x14] sm:$0x7]  ;;  %v350_v33 = vld [vmem:[%s6207_s10 + $0xa8] sm:$0xff] }
  0x26   : > { %5768 = vmatmul.msk.bf16.gmra.mxu1 %vm442_vm2, %v366_v31  ;;  %5779 = vmatmul.msk.bf16.gmra.mxu3 %vm442_vm2, %v377_v32  ;;  %v341_v31 = vld [vmem:[%s6207_s10 + $0x60] sm:$0xff]  ;;  %v342_v32 = vld [vmem:[%s6207_s10 + $0x68] sm:$0xff]  ;;  %v438_v36 = vpack.c.bf16 %v420_v30, %v419_v29  ;;  %v1008_v45 = vld [vmem:[%s6207_s10 + $0x12] sm:$0xff]  ;;  %v1562_v18 = vpack.c.bf16 %v5842_v14, %v5842_v14 }
  0x27   : > { %v371_v37 = vpack.c.bf16 %v342_v32, %v341_v31  ;;  %v1044_v50 = vpack.c.bf16 %v1009_v46, %v1008_v45  ;;  %v348_v9 = vld [vmem:[%s6207_s10 + $0x98] sm:$0xff]  ;;  %v405_v30 = vld [vmem:[%s6207_s10 + $0xa1] sm:$0xff]  ;;  %v406_v31 = vld [vmem:[%s6207_s10 + $0xa9] sm:$0xff] }
  0x28   : > { %v1012_v10 = vld [vmem:[%s6207_s10 + $0x32] sm:$0xff]  ;;  %v1013_v11 = vld [vmem:[%s6207_s10 + $0x3a] sm:$0xff]  ;;  %v1014_v34 = vld [vmem:[%s6207_s10 + $0x42] sm:$0xff] }
  0x29   : > { %v1046_v21 = vpack.c.bf16 %v1013_v11, %v1012_v10  ;;  %v349_v32 = vld [vmem:[%s6207_s10 + $0xa0] sm:$0xff]  ;;  %v1257_v51 = vld [vmem:[%s6207_s10 + $0x13] sm:$0xff] }
  0x2a   : > { %v375_v40 = vpack.c.bf16 %v350_v33, %v349_v32  ;;  %v1258_v52 = vld [vmem:[%s6207_s10 + $0x1b] sm:$0xff]  ;;  %v1508_v14 = vld [vmem:[%s6207_s10 + $0x24] sm:$0xff] }
  0x34   : > { %5751 = vmatmul.msk.bf16.gmra.mxu0 %vm442_vm2, %v423_v41  ;;  %v343_v41 = vld [vmem:[%s6207_s10 + $0x70] sm:$0xff] }
  0x35   : > { %5762 = vmatmul.msk.bf16.gmra.mxu2 %vm442_vm2, %v434_v42  ;;  %v344_v42 = vld [vmem:[%s6207_s10 + $0x78] sm:$0xff] }
  0x36   : > { %5769 = vmatmul.msk.bf16.gmra.mxu1 %vm442_vm2, %v367_v43  ;;  %5780 = vmatmul.msk.bf16.gmra.mxu3 %vm442_vm2, %v378_v44  ;;  %v759_v43 = vld [vmem:[%s6207_s10 + $0x2] sm:$0xff]  ;;  %v760_v44 = vld [vmem:[%s6207_s10 + $0xa] sm:$0xff]  ;;  %v372_v48 = vpack.c.bf16 %v344_v42, %v343_v41 }
  0x37   : > { %v795_v49 = vpack.c.bf16 %v760_v44, %v759_v43 }
  0x44   : > { %5752 = vmatmul.msk.bf16.gmra.mxu0 %vm442_vm2, %v424_v53  ;;  %v345_v53 = vld [vmem:[%s6207_s10 + $0x80] sm:$0xff] }
  0x45   : > { %5763 = vmatmul.msk.bf16.gmra.mxu2 %vm442_vm2, %v435_v54  ;;  %v346_v54 = vld [vmem:[%s6207_s10 + $0x88] sm:$0xff] }
  0x46   : > { %5770 = vmatmul.msk.bf16.gmra.mxu1 %vm442_vm2, %v368_v55  ;;  %5781 = vmatmul.msk.bf16.gmra.mxu3 %vm442_vm2, %v379_v56  ;;  %v1010_v55 = vld [vmem:[%s6207_s10 + $0x22] sm:$0xff]  ;;  %v1011_v56 = vld [vmem:[%s6207_s10 + $0x2a] sm:$0xff]  ;;  %v373_v59 = vpack.c.bf16 %v346_v54, %v345_v53  ;;  %v1506_v53 = vld [vmem:[%s6207_s10 + $0x14] sm:$0xff] }
  0x47   : > { %v1045_v61 = vpack.c.bf16 %v1011_v56, %v1010_v55  ;;  %v1507_v54 = vld [vmem:[%s6207_s10 + $0x1c] sm:$0xff]  ;;  %v1016_v55 = vld [vmem:[%s6207_s10 + $0x52] sm:$0xff] }
  0x48   : > { %v1017_v56 = vld [vmem:[%s6207_s10 + $0x5a] sm:$0xff] }
  0x54   : > { %5753 = vmatmul.msk.bf16.gmra.mxu0 %vm442_vm2, %v425_v4 }
  0x55   : > { %5764 = vmatmul.msk.bf16.gmra.mxu2 %vm442_vm2, %v436_v6  ;;  %v403_v6 = vld [vmem:[%s6207_s10 + $0x91] sm:$0xff] }
  0x56   : > { %5771 = vmatmul.msk.bf16.gmra.mxu1 %vm442_vm2, %v369_v7  ;;  %5782 = vmatmul.msk.bf16.gmra.mxu3 %vm442_vm2, %v380_v8  ;;  %v404_v7 = vld [vmem:[%s6207_s10 + $0x99] sm:$0xff]  ;;  %v347_v8 = vld [vmem:[%s6207_s10 + $0x90] sm:$0xff] }
  0x57   : > { %v430_v13 = vpack.c.bf16 %v404_v7, %v403_v6  ;;  %v374_v17 = vpack.c.bf16 %v348_v9, %v347_v8 }
  0x64   : > { %5754 = vmatmul.msk.bf16.gmra.mxu0 %vm442_vm2, %v426_v23  ;;  %v1618_v23 = vand.u32 %v1562_v18, %v6195_v5 }
  0x65   : > { %5765 = vmatmul.msk.bf16.gmra.mxu2 %vm442_vm2, %v437_v24 }
  0x66   : > { %5772 = vmatmul.msk.bf16.gmra.mxu1 %vm442_vm2, %v370_v25  ;;  %5783 = vmatmul.msk.bf16.gmra.mxu3 %vm442_vm2, %v381_v26 }
  0x67   : > { %1627 = vmatpush.bf16.msrb.mxu1 %v1618_v23 }
  0x74   : > { %5755 = vmatmul.msk.bf16.gmra.mxu0 %vm442_vm2, %v427_v35  ;;  %v1015_v35 = vld [vmem:[%s6207_s10 + $0x4a] sm:$0xff] }
  0x75   : > { %5766 = vmatmul.msk.bf16.gmra.mxu2 %vm442_vm2, %v438_v36  ;;  %v1047_v43 = vpack.c.bf16 %v1015_v35, %v1014_v34 }
  0x76   : > { %5773 = vmatmul.msk.bf16.gmra.mxu1 %vm442_vm2, %v371_v37  ;;  %5784 = vmatmul.msk.bf16.gmra.mxu3 %vm442_vm2, %v382_v38  ;;  %v431_v37 = vpack.c.bf16 %v406_v31, %v405_v30 }
  0x84   : > { %5756 = vmatmul.msk.bf16.gmra.mxu0 %vm442_vm2, %v428_v47 }
  0x85   : > { %5786 = vmatmul.msk.bf16.vlgmr.msrb.gmra.mxu2 %vm442_vm2, %v795_v49 }
  0x86   : > { %5774 = vmatmul.msk.bf16.gmra.mxu1 %vm442_vm2, %v372_v48  ;;  %5805 = vmatmul.msk.bf16.vlgmr.msrb.gmra.mxu3 %vm442_vm2, %v1044_v50 }
  0x91   : > { %v513_v58 = vpop.f32.mrf.mxu0 }
  0x93   : > { %v669_v60 = vpop.f32.mrf.mxu1 }
  0x94   : > { %v6323_v62 = vadd.f32 %v669_v60, %v513_v58  ;;  %5757 = vmatmul.msk.bf16.gmra.mxu0 %vm442_vm2, %v429_v57  ;;  %v1293_v58 = vpack.c.bf16 %v1258_v52, %v1257_v51 }
  0x95   : > { %5787 = vmatmul.msk.bf16.gmra.mxu2 %vm442_vm2, %v1044_v50 }
  0x96   : > { %5775 = vmatmul.msk.bf16.gmra.mxu1 %vm442_vm2, %v373_v59  ;;  %5806 = vmatmul.msk.bf16.gmra.mxu3 %vm442_vm2, %v1045_v61 }
  0x98   : > { %v568_v63 = vpop.f32.mrf.mxu2 }
  0x99   : > { %v724_v0 = vpop.f32.mrf.mxu3  ;;  %v515_v1 = vpop.f32.mrf.mxu0 }
  0x9a   : > { %v6329_v2 = vadd.f32 %v724_v0, %v568_v63 }
  0x9b   : > { %v671_v3 = vpop.f32.mrf.mxu1 }
  0x9c   : > { %v6331_v4 = vadd.f32 %v671_v3, %v515_v1  ;;  %v1048_v1 = vpack.c.bf16 %v1017_v56, %v1016_v55 }
  0xa0   : > { %v570_v12 = vpop.f32.mrf.mxu2 }
  0xa1   : > { %v726_v15 = vpop.f32.mrf.mxu3  ;;  %v518_v16 = vpop.f32.mrf.mxu0 }
  0xa2   : > { %v6342_v19 = vadd.f32 %v726_v15, %v570_v12  ;;  %v1259_v12 = vld [vmem:[%s6207_s10 + $0x23] sm:$0xff]  ;;  %v1509_v15 = vld [vmem:[%s6207_s10 + $0x2c] sm:$0xff] }
  0xa3   : > { %v674_v20 = vpop.f32.mrf.mxu1 }
  0xa4   : > { %v6344_v22 = vadd.f32 %v674_v20, %v518_v16  ;;  %5758 = vmatmul.msk.bf16.gmra.mxu0 %vm442_vm2, %v430_v13  ;;  %v1260_v13 = vld [vmem:[%s6207_s10 + $0x2b] sm:$0xff]  ;;  %v1018_v16 = vld [vmem:[%s6207_s10 + $0x62] sm:$0xff] }
  0xa5   : > { %5788 = vmatmul.msk.bf16.gmra.mxu2 %vm442_vm2, %v1045_v61  ;;  %v1542_v61 = vpack.c.bf16 %v1507_v54, %v1506_v53  ;;  %v1294_v20 = vpack.c.bf16 %v1260_v13, %v1259_v12 }
  0xa6   : > { %5776 = vmatmul.msk.bf16.gmra.mxu1 %vm442_vm2, %v374_v17  ;;  %5807 = vmatmul.msk.bf16.gmra.mxu3 %vm442_vm2, %v1046_v21  ;;  %v1019_v17 = vld [vmem:[%s6207_s10 + $0x6a] sm:$0xff] }
  0xa8   : > { %v573_v24 = vpop.f32.mrf.mxu2 }
  0xa9   : > { %v729_v25 = vpop.f32.mrf.mxu3  ;;  %v520_v26 = vpop.f32.mrf.mxu0 }
  0xaa   : > { %v6351_v27 = vadd.f32 %v729_v25, %v573_v24  ;;  %v6397_v24 = vpack.c.bf16 %v1509_v15, %v1508_v14 }
  0xab   : > { %v676_v28 = vpop.f32.mrf.mxu1 }
  0xac   : > { %v6353_v29 = vadd.f32 %v676_v28, %v520_v26  ;;  %v1049_v28 = vpack.c.bf16 %v1019_v17, %v1018_v16 }
  0xb0   : > { %v575_v36 = vpop.f32.mrf.mxu2 }
  0xb1   : > { %v731_v38 = vpop.f32.mrf.mxu3  ;;  %v523_v39 = vpop.f32.mrf.mxu0 }
  0xb2   : > { %v6361_v41 = vadd.f32 %v731_v38, %v575_v36  ;;  %v1262_v38 = vld [vmem:[%s6207_s10 + $0x3b] sm:$0xff] }
  0xb3   : > { %v679_v42 = vpop.f32.mrf.mxu1 }
  0xb4   : > { %v6363_v44 = vadd.f32 %v679_v42, %v523_v39  ;;  %5759 = vmatmul.msk.bf16.gmra.mxu0 %vm442_vm2, %v431_v37  ;;  %v1261_v37 = vld [vmem:[%s6207_s10 + $0x33] sm:$0xff] }
  0xb5   : > { %5789 = vmatmul.msk.bf16.gmra.mxu2 %vm442_vm2, %v1046_v21  ;;  %v1510_v39 = vld [vmem:[%s6207_s10 + $0x34] sm:$0xff] }
  0xb6   : > { %5777 = vmatmul.msk.bf16.gmra.mxu1 %vm442_vm2, %v375_v40  ;;  %5808 = vmatmul.msk.bf16.gmra.mxu3 %vm442_vm2, %v1047_v43  ;;  %v1511_v40 = vld [vmem:[%s6207_s10 + $0x3c] sm:$0xff]  ;;  %v1020_v42 = vld [vmem:[%s6207_s10 + $0x72] sm:$0xff] }
  0xb7   : > { %v6418_v51 = vpack.c.bf16 %v1511_v40, %v1510_v39  ;;  %v1265_v40 = vld [vmem:[%s6207_s10 + $0x53] sm:$0xff] }
  0xb8   : > { %v578_v45 = vpop.f32.mrf.mxu2 }
  0xb9   : > { %v734_v46 = vpop.f32.mrf.mxu3  ;;  %v525_v47 = vpop.f32.mrf.mxu0 }
  0xba   : > { %v6369_v48 = vadd.f32 %v734_v46, %v578_v45  ;;  %v1295_v46 = vpack.c.bf16 %v1262_v38, %v1261_v37  ;;  %v5880_v37 = vld [vmem:[%s8976_s1 + $0x1c] sm:$0x7] }
  0xbb   : > { %v681_v49 = vpop.f32.mrf.mxu1  ;;  %v2060_v39 = vpack.c.bf16 %v5880_v37, %v5880_v37  ;;  %v1517_v37 = vld [vmem:[%s6207_s10 + $0x6c] sm:$0xff] }
  0xbc   : > { %v6371_v50 = vadd.f32 %v681_v49, %v525_v47 }
  0xc0   : > { %v580_v57 = vpop.f32.mrf.mxu2 }
  0xc1   : > { %v736_v59 = vpop.f32.mrf.mxu3  ;;  %v528_v60 = vpop.f32.mrf.mxu0 }
  0xc2   : > { %v6379_v63 = vadd.f32 %v736_v59, %v580_v57 }
  0xc3   : > { %v684_v0 = vpop.f32.mrf.mxu1 }
  0xc4   : > { %v6381_v3 = vadd.f32 %v684_v0, %v528_v60  ;;  %5824 = vmatmul.msk.bf16.vlgmr.msrb.gmra.mxu0 %vm442_vm2, %v1293_v58  ;;  %v1263_v0 = vld [vmem:[%s6207_s10 + $0x43] sm:$0xff] }
  0xc5   : > { %5790 = vmatmul.msk.bf16.gmra.mxu2 %vm442_vm2, %v1047_v43  ;;  %v1021_v43 = vld [vmem:[%s6207_s10 + $0x7a] sm:$0xff] }
  0xc6   : > { %5843 = vmatmul.msk.bf16.vlgmr.msrb.gmra.mxu1 %vm442_vm2, %v1542_v61  ;;  %5809 = vmatmul.msk.bf16.gmra.mxu3 %vm442_vm2, %v1048_v1  ;;  %v1050_v54 = vpack.c.bf16 %v1021_v43, %v1020_v42  ;;  %v1266_v42 = vld [vmem:[%s6207_s10 + $0x5b] sm:$0xff] }
  0xc7   : > { %v1514_v43 = vld [vmem:[%s6207_s10 + $0x54] sm:$0xff] }
  0xc8   : > { %v583_v6 = vpop.f32.mrf.mxu2 }
  0xc9   : > { %v739_v7 = vpop.f32.mrf.mxu3  ;;  %v530_v8 = vpop.f32.mrf.mxu0 }
  0xca   : > { %v6387_v9 = vadd.f32 %v739_v7, %v583_v6  ;;  %v1512_v6 = vld [vmem:[%s6207_s10 + $0x44] sm:$0xff]  ;;  %v1513_v7 = vld [vmem:[%s6207_s10 + $0x4c] sm:$0xff] }
  0xcb   : > { %v686_v10 = vpop.f32.mrf.mxu1  ;;  %v6439_v16 = vpack.c.bf16 %v1513_v7, %v1512_v6 }
  0xcc   : > { %v6389_v11 = vadd.f32 %v686_v10, %v530_v8  ;;  %v1022_v8 = vld [vmem:[%s6207_s10 + $0x82] sm:$0xff]  ;;  %v1023_v10 = vld [vmem:[%s6207_s10 + $0x8a] sm:$0xff] }
  0xd0   : > { %v585_v18 = vpop.f32.mrf.mxu2 }
  0xd1   : > { %v741_v21 = vpop.f32.mrf.mxu3  ;;  %v533_v23 = vpop.f32.mrf.mxu0 }
  0xd2   : > { %v6399_v25 = vadd.f32 %v741_v21, %v585_v18 }
  0xd3   : > { %v689_v26 = vpop.f32.mrf.mxu1 }
  0xd4   : > { %v6401_v30 = vadd.f32 %v689_v26, %v533_v23  ;;  %5825 = vmatmul.msk.bf16.gmra.mxu0 %vm442_vm2, %v1294_v20  ;;  %v1051_v20 = vpack.c.bf16 %v1023_v10, %v1022_v8  ;;  %v5899_v8 = vld [vmem:[%s8976_s1 + $0x20] sm:$0x7] }
  0xd5   : > { %5791 = vmatmul.msk.bf16.gmra.mxu2 %vm442_vm2, %v1048_v1  ;;  %v1264_v1 = vld [vmem:[%s6207_s10 + $0x4b] sm:$0xff]  ;;  %v2309_v10 = vpack.c.bf16 %v5899_v8, %v5899_v8 }
  0xd6   : > { %5844 = vmatmul.msk.bf16.gmra.mxu1 %vm442_vm2, %v6397_v24  ;;  %5810 = vmatmul.msk.bf16.gmra.mxu3 %vm442_vm2, %v1049_v28  ;;  %v1296_v13 = vpack.c.bf16 %v1264_v1, %v1263_v0 }
  0xd8   : > { %v588_v31 = vpop.f32.mrf.mxu2 }
  0xd9   : > { %v744_v32 = vpop.f32.mrf.mxu3  ;;  %v535_v33 = vpop.f32.mrf.mxu0 }
  0xda   : > { %v6408_v34 = vadd.f32 %v744_v32, %v588_v31 }
  0xdb   : > { %v691_v35 = vpop.f32.mrf.mxu1 }
  0xdc   : > { %v6410_v36 = vadd.f32 %v691_v35, %v535_v33  ;;  %v5861_v35 = vld [vmem:[%s8976_s1 + $0x18] sm:$0x7] }
  0xdd   : > { %v1811_v38 = vpack.c.bf16 %v5861_v35, %v5861_v35  ;;  %v1516_v35 = vld [vmem:[%s6207_s10 + $0x64] sm:$0xff] }
  0xe0   : > { %v590_v45 = vpop.f32.mrf.mxu2 }
  0xe1   : > { %v746_v47 = vpop.f32.mrf.mxu3  ;;  %v538_v49 = vpop.f32.mrf.mxu0 }
  0xe2   : > { %v6420_v52 = vadd.f32 %v746_v47, %v590_v45  ;;  %v1515_v45 = vld [vmem:[%s6207_s10 + $0x5c] sm:$0xff]  ;;  %v2116_v47 = vand.u32 %v2060_v39, %v6195_v5  ;;  %v1027_v39 = vld [vmem:[%s6207_s10 + $0xaa] sm:$0xff] }
  0xe3   : > { %v694_v53 = vpop.f32.mrf.mxu1 }
  0xe4   : > { %v6422_v55 = vadd.f32 %v694_v53, %v538_v49  ;;  %5826 = vmatmul.msk.bf16.gmra.mxu0 %vm442_vm2, %v1295_v46  ;;  %v1867_v46 = vand.u32 %v1811_v38, %v6195_v5  ;;  %v1024_v49 = vld [vmem:[%s6207_s10 + $0x92] sm:$0xff]  ;;  %v1025_v53 = vld [vmem:[%s6207_s10 + $0x9a] sm:$0xff]  ;;  %2125 = vmatpush.bf16.msra.mxu3 %v2116_v47  ;;  %v1026_v38 = vld [vmem:[%s6207_s10 + $0xa2] sm:$0xff] }
  0xe5   : > { %5792 = vmatmul.msk.bf16.gmra.mxu2 %vm442_vm2, %v1049_v28  ;;  %v1052_v6 = vpack.c.bf16 %v1025_v53, %v1024_v49  ;;  %v1053_v47 = vpack.c.bf16 %v1027_v39, %v1026_v38 }
  0xe6   : > { %5845 = vmatmul.msk.bf16.gmra.mxu1 %vm442_vm2, %v6418_v51  ;;  %5811 = vmatmul.msk.bf16.gmra.mxu3 %vm442_vm2, %v1050_v54 }
  0xe7   : > { %1876 = vmatpush.bf16.msra.mxu2 %v1867_v46 }
  0xe8   : > { %v593_v56 = vpop.f32.mrf.mxu2 }
  0xe9   : > { %v749_v57 = vpop.f32.mrf.mxu3  ;;  %v540_v58 = vpop.f32.mrf.mxu0 }
  0xea   : > { %v6429_v59 = vadd.f32 %v749_v57, %v593_v56  ;;  %v1297_v56 = vpack.c.bf16 %v1266_v42, %v1265_v40 }
  0xeb   : > { %v696_v60 = vpop.f32.mrf.mxu1 }
  0xec   : > { %v6431_v61 = vadd.f32 %v696_v60, %v540_v58  ;;  %v6468_v60 = vpack.c.bf16 %v1515_v45, %v1514_v43 }
  0xf0   : > { %v595_v12 = vpop.f32.mrf.mxu2 }
  0xf1   : > { %v751_v14 = vpop.f32.mrf.mxu3  ;;  %v543_v15 = vpop.f32.mrf.mxu0 }
  0xf2   : > { %v6441_v17 = vadd.f32 %v751_v14, %v595_v12  ;;  %v2365_v12 = vand.u32 %v2309_v10, %v6195_v5  ;;  %v1269_v10 = vld [vmem:[%s6207_s10 + $0x73] sm:$0xff] }
  0xf3   : > { %v699_v18 = vpop.f32.mrf.mxu1 }
  0xf4   : > { %v6443_v21 = vadd.f32 %v699_v18, %v543_v15  ;;  %5827 = vmatmul.msk.bf16.gmra.mxu0 %vm442_vm2, %v1296_v13 }
  0xf5   : > { %5793 = vmatmul.msk.bf16.gmra.mxu2 %vm442_vm2, %v1050_v54  ;;  %2374 = vmatpush.bf16.msra.mxu0 %v2365_v12  ;;  %v1270_v12 = vld [vmem:[%s6207_s10 + $0x7b] sm:$0xff] }
  0xf6   : > { %5846 = vmatmul.msk.bf16.gmra.mxu1 %vm442_vm2, %v6439_v16  ;;  %5812 = vmatmul.msk.bf16.gmra.mxu3 %vm442_vm2, %v1051_v20 }
  0xf8   : > { %v598_v23 = vpop.f32.mrf.mxu2 }
  0xf9   : > { %v754_v26 = vpop.f32.mrf.mxu3  ;;  %v545_v28 = vpop.f32.mrf.mxu0 }
  0xfa   : > { %v6450_v31 = vadd.f32 %v754_v26, %v598_v23 }
  0xfb   : > { %v701_v32 = vpop.f32.mrf.mxu1 }
  0xfc   : > { %v6452_v33 = vadd.f32 %v701_v32, %v545_v28  ;;  %v1268_v32 = vld [vmem:[%s6207_s10 + $0x6b] sm:$0xff] }
 0x100   : > { %v600_v54 = vpop.f32.mrf.mxu2 }
 0x101   : > { %v756_v57 = vpop.f32.mrf.mxu3  ;;  %v548_v58 = vpop.f32.mrf.mxu0 }
 0x102   : > { %v6470_v0 = vadd.f32 %v756_v57, %v600_v54 }
 0x103   : > { %v704_v1 = vpop.f32.mrf.mxu1 }
 0x104   : > { %v6472_v7 = vadd.f32 %v704_v1, %v548_v58  ;;  %5828 = vmatmul.msk.bf16.gmra.mxu0 %vm442_vm2, %v1297_v56 }
 0x105   : > { %5794 = vmatmul.msk.bf16.gmra.mxu2 %vm442_vm2, %v1051_v20  ;;  %v1267_v20 = vld [vmem:[%s6207_s10 + $0x63] sm:$0xff] }
 0x106   : > { %5847 = vmatmul.msk.bf16.gmra.mxu1 %vm442_vm2, %v6468_v60  ;;  %5813 = vmatmul.msk.bf16.gmra.mxu3 %vm442_vm2, %v1052_v6  ;;  %v1298_v42 = vpack.c.bf16 %v1268_v32, %v1267_v20 }
 0x108   : > { %v882_v13 = vpop.f32.mrf.mxu2 }
 0x109   : > { %v972_v14 = vadd.f32 %v882_v13, %v6323_v62  ;;  %v1131_v15 = vpop.f32.mrf.mxu3  ;;  %v550_v18 = vpop.f32.mrf.mxu0  ;;  %v6495_v62 = vpack.c.bf16 %v1517_v37, %v1516_v35  ;;  %v1518_v13 = vld [vmem:[%s6207_s10 + $0x74] sm:$0xff] }
 0x10b   : > { %v706_v23 = vpop.f32.mrf.mxu1  ;;  %v6484_v26 = vadd.f32 %v1131_v15, %v972_v14  ;;  %v1519_v14 = vld [vmem:[%s6207_s10 + $0x7c] sm:$0xff] }
 0x10c   : > { %v6486_v28 = vadd.f32 %v706_v23, %v550_v18  ;;  %v1029_v15 = vld [vmem:[%s6207_s10 + $0xba] sm:$0xff]  ;;  %v1299_v23 = vpack.c.bf16 %v1270_v12, %v1269_v10  ;;  %v1031_v10 = vld [vmem:[%s6207_s10 + $0xca] sm:$0xff] }
 0x110   : > { %v884_v40 = vpop.f32.mrf.mxu2 }
 0x111   : > { %v973_v5 = vadd.f32 %v884_v40, %v6331_v4  ;;  %v1133_v43 = vpop.f32.mrf.mxu3  ;;  %v553_v45 = vpop.f32.mrf.mxu0 }
 0x113   : > { %v709_v46 = vpop.f32.mrf.mxu1  ;;  %v6497_v49 = vadd.f32 %v1133_v43, %v973_v5 }
 0x114   : > { %v6499_v53 = vadd.f32 %v709_v46, %v553_v45  ;;  %5829 = vmatmul.msk.bf16.gmra.mxu0 %vm442_vm2, %v1298_v42 }
 0x115   : > { %5795 = vmatmul.msk.bf16.gmra.mxu2 %vm442_vm2, %v1052_v6  ;;  %v1028_v6 = vld [vmem:[%s6207_s10 + $0xb2] sm:$0xff] }
 0x116   : > { %5848 = vmatmul.msk.bf16.gmra.mxu1 %vm442_vm2, %v6495_v62  ;;  %5814 = vmatmul.msk.bf16.gmra.mxu3 %vm442_vm2, %v1053_v47  ;;  %v1054_v38 = vpack.c.bf16 %v1029_v15, %v1028_v6 }
 0x118   : > { %v887_v4 = vpop.f32.mrf.mxu2 }
 0x119   : > { %v974_v54 = vadd.f32 %v887_v4, %v6344_v22  ;;  %v1136_v56 = vpop.f32.mrf.mxu3  ;;  %v555_v57 = vpop.f32.mrf.mxu0  ;;  %v6518_v22 = vpack.c.bf16 %v1519_v14, %v1518_v13 }
 0x11b   : > { %v711_v58 = vpop.f32.mrf.mxu1  ;;  %v6507_v1 = vadd.f32 %v1136_v56, %v974_v54  ;;  %v1271_v54 = vld [vmem:[%s6207_s10 + $0x83] sm:$0xff]  ;;  %v1272_v56 = vld [vmem:[%s6207_s10 + $0x8b] sm:$0xff] }
 0x11c   : > { %v6509_v8 = vadd.f32 %v711_v58, %v555_v57  ;;  %v1520_v57 = vld [vmem:[%s6207_s10 + $0x84] sm:$0xff]  ;;  %v1521_v58 = vld [vmem:[%s6207_s10 + $0x8c] sm:$0xff]  ;;  %v1300_v13 = vpack.c.bf16 %v1272_v56, %v1271_v54  ;;  %v1274_v54 = vld [vmem:[%s6207_s10 + $0x9b] sm:$0xff] }
 0x11d   : > { %v1522_v56 = vld [vmem:[%s6207_s10 + $0x94] sm:$0xff] }
 0x120   : > { %v889_v18 = vpop.f32.mrf.mxu2 }
 0x121   : > { %v975_v20 = vadd.f32 %v889_v18, %v6353_v29  ;;  %v1138_v32 = vpop.f32.mrf.mxu3  ;;  %v558_v35 = vpop.f32.mrf.mxu0 }
 0x123   : > { %v714_v37 = vpop.f32.mrf.mxu1  ;;  %v6520_v39 = vadd.f32 %v1138_v32, %v975_v20 }
 0x124   : > { %v6522_v40 = vadd.f32 %v714_v37, %v558_v35  ;;  %5830 = vmatmul.msk.bf16.gmra.mxu0 %vm442_vm2, %v1299_v23 }
 0x125   : > { %5796 = vmatmul.msk.bf16.gmra.mxu2 %vm442_vm2, %v1053_v47  ;;  %v1030_v47 = vld [vmem:[%s6207_s10 + $0xc2] sm:$0xff] }
 0x126   : > { %5849 = vmatmul.msk.bf16.gmra.mxu1 %vm442_vm2, %v6518_v22  ;;  %5815 = vmatmul.msk.bf16.gmra.mxu3 %vm442_vm2, %v1054_v38  ;;  %v1055_v23 = vpack.c.bf16 %v1031_v10, %v1030_v47 }
 0x128   : > { %v892_v29 = vpop.f32.mrf.mxu2 }
 0x129   : > { %v976_v42 = vadd.f32 %v892_v29, %v6363_v44  ;;  %v1141_v5 = vpop.f32.mrf.mxu3  ;;  %v560_v43 = vpop.f32.mrf.mxu0  ;;  %v6541_v44 = vpack.c.bf16 %v1521_v58, %v1520_v57  ;;  %v1523_v57 = vld [vmem:[%s6207_s10 + $0x9c] sm:$0xff] }
 0x12a   : > { %v1033_v58 = vld [vmem:[%s6207_s10 + $0xda] sm:$0xff] }
 0x12b   : > { %v716_v45 = vpop.f32.mrf.mxu1  ;;  %v6530_v46 = vadd.f32 %v1141_v5, %v976_v42 }
 0x12c   : > { %v6532_v4 = vadd.f32 %v716_v45, %v560_v43  ;;  %v1273_v45 = vld [vmem:[%s6207_s10 + $0x93] sm:$0xff] }
 0x12d   : > { %v1301_v10 = vpack.c.bf16 %v1274_v54, %v1273_v45 }
 0x130   : > { %v894_v12 = vpop.f32.mrf.mxu2 }
 0x131   : > { %v977_v14 = vadd.f32 %v894_v12, %v6371_v50  ;;  %v1143_v6 = vpop.f32.mrf.mxu3  ;;  %v563_v15 = vpop.f32.mrf.mxu0 }
 0x133   : > { %v719_v18 = vpop.f32.mrf.mxu1  ;;  %v6543_v20 = vadd.f32 %v1143_v6, %v977_v14 }
 0x134   : > { %v6545_v32 = vadd.f32 %v719_v18, %v563_v15  ;;  %5831 = vmatmul.msk.bf16.gmra.mxu0 %vm442_vm2, %v1300_v13 }
 0x135   : > { %5797 = vmatmul.msk.bf16.gmra.mxu2 %vm442_vm2, %v1054_v38  ;;  %v1032_v38 = vld [vmem:[%s6207_s10 + $0xd2] sm:$0xff] }
 0x136   : > { %5850 = vmatmul.msk.bf16.gmra.mxu1 %vm442_vm2, %v6541_v44  ;;  %5816 = vmatmul.msk.bf16.gmra.mxu3 %vm442_vm2, %v1055_v23  ;;  %v1056_v18 = vpack.c.bf16 %v1033_v58, %v1032_v38  ;;  %v1524_v38 = vld [vmem:[%s6207_s10 + $0xa4] sm:$0xff]  ;;  %v1525_v58 = vld [vmem:[%s6207_s10 + $0xac] sm:$0xff] }
 0x138   : > { %v897_v50 = vpop.f32.mrf.mxu2 }
 0x139   : > { %v978_v35 = vadd.f32 %v897_v50, %v6381_v3  ;;  %v1146_v37 = vpop.f32.mrf.mxu3  ;;  %v565_v29 = vpop.f32.mrf.mxu0  ;;  %v6564_v3 = vpack.c.bf16 %v1523_v57, %v1522_v56  ;;  %v1275_v57 = vld [vmem:[%s6207_s10 + $0xa3] sm:$0xff] }
 0x13b   : > { %v721_v42 = vpop.f32.mrf.mxu1  ;;  %v6553_v5 = vadd.f32 %v1146_v37, %v978_v35 }
 0x13c   : > { %v6555_v43 = vadd.f32 %v721_v42, %v565_v29 }
 0x140   : > { %v899_v47 = vpop.f32.mrf.mxu2 }
 0x141   : > { %v979_v12 = vadd.f32 %v899_v47, %v6389_v11  ;;  %v1148_v13 = vpop.f32.mrf.mxu3  ;;  %v1380_v14 = vpop.f32.mrf.mxu0  ;;  %v1034_v47 = vld [vmem:[%s6207_s10 + $0xe2] sm:$0xff] }
 0x142   : > { %v1470_v6 = vadd.f32 %v1380_v14, %v6484_v26 }
 0x143   : > { %v1629_v15 = vpop.f32.mrf.mxu1  ;;  %v6567_v50 = vadd.f32 %v1148_v13, %v979_v12 }
 0x144   : > { %v6569_v35 = vadd.f32 %v1629_v15, %v1470_v6  ;;  %5832 = vmatmul.msk.bf16.gmra.mxu0 %vm442_vm2, %v1301_v10  ;;  %v1035_v10 = vld [vmem:[%s6207_s10 + $0xea] sm:$0xff]  ;;  %v6589_v15 = vpack.c.bf16 %v1525_v58, %v1524_v38 }
 0x145   : > { %5798 = vmatmul.msk.bf16.gmra.mxu2 %vm442_vm2, %v1055_v23  ;;  %v1276_v23 = vld [vmem:[%s6207_s10 + $0xab] sm:$0xff] }
 0x146   : > { %5851 = vmatmul.msk.bf16.gmra.mxu1 %vm442_vm2, %v6564_v3  ;;  %5817 = vmatmul.msk.bf16.gmra.mxu3 %vm442_vm2, %v1056_v18  ;;  %v1302_v13 = vpack.c.bf16 %v1276_v23, %v1275_v57 }
 0x148   : > { %v902_v11 = vpop.f32.mrf.mxu2 }
 0x149   : > { %v980_v26 = vadd.f32 %v902_v11, %v6401_v30  ;;  %v1151_v37 = vpop.f32.mrf.mxu3  ;;  %v1382_v29 = vpop.f32.mrf.mxu0 }
 0x14a   : > { %v1471_v42 = vadd.f32 %v1382_v29, %v6497_v49 }
 0x14b   : > { %v1631_v45 = vpop.f32.mrf.mxu1  ;;  %v6578_v54 = vadd.f32 %v1151_v37, %v980_v26  ;;  %v1057_v26 = vpack.c.bf16 %v1035_v10, %v1034_v47  ;;  %v1277_v47 = vld [vmem:[%s6207_s10 + $0xb3] sm:$0xff] }
 0x14c   : > { %v6580_v56 = vadd.f32 %v1631_v45, %v1471_v42  ;;  %v1526_v10 = vld [vmem:[%s6207_s10 + $0xb4] sm:$0xff] }
 0x150   : > { %v904_v12 = vpop.f32.mrf.mxu2 }
 0x151   : > { %v981_v14 = vadd.f32 %v904_v12, %v6410_v36  ;;  %v1153_v30 = vpop.f32.mrf.mxu3  ;;  %v1385_v6 = vpop.f32.mrf.mxu0  ;;  %v1527_v12 = vld [vmem:[%s6207_s10 + $0xbc] sm:$0xff] }
 0x152   : > { %v1472_v49 = vadd.f32 %v1385_v6, %v6507_v1 }
 0x153   : > { %v1634_v11 = vpop.f32.mrf.mxu1  ;;  %v6592_v37 = vadd.f32 %v1153_v30, %v981_v14  ;;  %v1037_v14 = vld [vmem:[%s6207_s10 + $0xfa] sm:$0xff] }
 0x154   : > { %v6594_v29 = vadd.f32 %v1634_v11, %v1472_v49  ;;  %5833 = vmatmul.msk.bf16.gmra.mxu0 %vm442_vm2, %v1302_v13  ;;  %v1036_v13 = vld [vmem:[%s6207_s10 + $0xf2] sm:$0xff] }
 0x155   : > { %5799 = vmatmul.msk.bf16.gmra.mxu2 %vm442_vm2, %v1056_v18  ;;  %v1278_v18 = vld [vmem:[%s6207_s10 + $0xbb] sm:$0xff] }
 0x156   : > { %5852 = vmatmul.msk.bf16.gmra.mxu1 %vm442_vm2, %v6589_v15  ;;  %5818 = vmatmul.msk.bf16.gmra.mxu3 %vm442_vm2, %v1057_v26  ;;  %v1303_v6 = vpack.c.bf16 %v1278_v18, %v1277_v47 }
 0x158   : > { %v907_v36 = vpop.f32.mrf.mxu2 }
 0x159   : > { %v982_v1 = vadd.f32 %v907_v36, %v6422_v55  ;;  %v1156_v42 = vpop.f32.mrf.mxu3  ;;  %v1387_v45 = vpop.f32.mrf.mxu0  ;;  %v6614_v36 = vpack.c.bf16 %v1527_v12, %v1526_v10 }
 0x15a   : > { %v1473_v57 = vadd.f32 %v1387_v45, %v6520_v39 }
 0x15b   : > { %v1636_v23 = vpop.f32.mrf.mxu1  ;;  %v6603_v38 = vadd.f32 %v1156_v42, %v982_v1  ;;  %v1058_v42 = vpack.c.bf16 %v1037_v14, %v1036_v13  ;;  %v1279_v14 = vld [vmem:[%s6207_s10 + $0xc3] sm:$0xff] }
 0x15c   : > { %v6605_v58 = vadd.f32 %v1636_v23, %v1473_v57 }
 0x160   : > { %v909_v30 = vpop.f32.mrf.mxu2 }
 0x161   : > { %v983_v49 = vadd.f32 %v909_v30, %v6431_v61  ;;  %v1158_v55 = vpop.f32.mrf.mxu3  ;;  %v1390_v11 = vpop.f32.mrf.mxu0  ;;  %v1528_v30 = vld [vmem:[%s6207_s10 + $0xc4] sm:$0xff] }
 0x162   : > { %v1474_v39 = vadd.f32 %v1390_v11, %v6530_v46 }
 0x163   : > { %v1639_v1 = vpop.f32.mrf.mxu1  ;;  %v6617_v45 = vadd.f32 %v1158_v55, %v983_v49  ;;  %v1038_v49 = vld [vmem:[%s6207_s10 + $0x102] sm:$0xff]  ;;  %v1039_v55 = vld [vmem:[%s6207_s10 + $0x10a] sm:$0xff] }
 0x164   : > { %v6619_v57 = vadd.f32 %v1639_v1, %v1474_v39  ;;  %5834 = vmatmul.msk.bf16.gmra.mxu0 %vm442_vm2, %v1303_v6  ;;  %v1529_v6 = vld [vmem:[%s6207_s10 + $0xcc] sm:$0xff] }
 0x165   : > { %5800 = vmatmul.msk.bf16.gmra.mxu2 %vm442_vm2, %v1057_v26  ;;  %v1280_v26 = vld [vmem:[%s6207_s10 + $0xcb] sm:$0xff] }
 0x166   : > { %9011 = vst [vmem:[#allocation3_spill] sm:$0xff] %v6619_v57  ;;  %5853 = vmatmul.msk.bf16.gmra.mxu1 %vm442_vm2, %v6614_v36  ;;  %5819 = vmatmul.msk.bf16.gmra.mxu3 %vm442_vm2, %v1058_v42  ;;  %v1304_v39 = vpack.c.bf16 %v1280_v26, %v1279_v14  ;;  %v6639_v57 = vpack.c.bf16 %v1529_v6, %v1528_v30 }
 0x168   : > { %v912_v61 = vpop.f32.mrf.mxu2 }
 0x169   : > { %v984_v46 = vadd.f32 %v912_v61, %v6443_v21  ;;  %v1161_v23 = vpop.f32.mrf.mxu3  ;;  %v1392_v47 = vpop.f32.mrf.mxu0 }
 0x16a   : > { %v1475_v18 = vadd.f32 %v1392_v47, %v6543_v20 }
 0x16b   : > { %v1641_v10 = vpop.f32.mrf.mxu1  ;;  %v6628_v12 = vadd.f32 %v1161_v23, %v984_v46  ;;  %v1059_v23 = vpack.c.bf16 %v1039_v55, %v1038_v49  ;;  %v293_v49 = vld [vmem:[%s8980_s5] sm:$0xff]  ;;  %v1281_v55 = vld [vmem:[%s6207_s10 + $0xd3] sm:$0xff] }
 0x16c   : > { %v6630_v13 = vadd.f32 %v1641_v10, %v1475_v18 }
 0x170   : > { %v914_v11 = vpop.f32.mrf.mxu2 }
 0x171   : > { %v985_v1 = vadd.f32 %v914_v11, %v6452_v33  ;;  %v1163_v21 = vpop.f32.mrf.mxu3  ;;  %v1395_v61 = vpop.f32.mrf.mxu0  ;;  %v1282_v11 = vld [vmem:[%s6207_s10 + $0xdb] sm:$0xff] }
 0x172   : > { %v1476_v20 = vadd.f32 %v1395_v61, %v6553_v5 }
 0x173   : > { %v1644_v46 = vpop.f32.mrf.mxu1  ;;  %v6642_v47 = vadd.f32 %v1163_v21, %v985_v1  ;;  %v1531_v1 = vld [vmem:[%s6207_s10 + $0xdc] sm:$0xff]  ;;  %v1040_v21 = vld [vmem:[%s6207_s10 + $0x112] sm:$0xff] }
 0x174   : > { %v6644_v18 = vadd.f32 %v1644_v46, %v1476_v20  ;;  %5835 = vmatmul.msk.bf16.gmra.mxu0 %vm442_vm2, %v1304_v39  ;;  %v6139_v39 = vmov 0   ;;  %v1305_v20 = vpack.c.bf16 %v1282_v11, %v1281_v55 }
 0x175   : > { %5801 = vmatmul.msk.bf16.gmra.mxu2 %vm442_vm2, %v1058_v42  ;;  %6123 = vset.pattern.permute.xlu0 %v6139_v39 }
 0x176   : > { %9012 = vst [vmem:[#allocation4_spill] sm:$0xff] %v6644_v18  ;;  %5854 = vmatmul.msk.bf16.gmra.mxu1 %vm442_vm2, %v6639_v57  ;;  %5820 = vmatmul.msk.bf16.gmra.mxu3 %vm442_vm2, %v1059_v23 }
 0x177   : > { %6124 = vset.pattern.permute.xlu1 %v6139_v39  ;;  %2580 = vperm.xlu0 %6123, %v293_v49  }
 0x178   : > { %v917_v33 = vpop.f32.mrf.mxu2  ;;  %6125 = vset.pattern.permute.xlu2 %v6139_v39 }
 0x179   : > { %v986_v5 = vadd.f32 %v917_v33, %v6472_v7  ;;  %v1166_v10 = vpop.f32.mrf.mxu3  ;;  %v1397_v14 = vpop.f32.mrf.mxu0  ;;  %v1530_v7 = vld [vmem:[%s6207_s10 + $0xd4] sm:$0xff] }
 0x17a   : > { %v1477_v26 = vadd.f32 %v1397_v14, %v6567_v50  ;;  %v1041_v50 = vld [vmem:[%s6207_s10 + $0x11a] sm:$0xff] }
 0x17b   : > { %v1646_v30 = vpop.f32.mrf.mxu1  ;;  %v6653_v6 = vadd.f32 %v1166_v10, %v986_v5  ;;  %v6667_v10 = vpack.c.bf16 %v1531_v1, %v1530_v7  ;;  %v5918_v1 = vld [vmem:[%s8978_s3 + $0x8] sm:$0xff] }
 0x17c   : > { %v6655_v42 = vadd.f32 %v1646_v30, %v1477_v26  ;;  %v1060_v30 = vpack.c.bf16 %v1041_v50, %v1040_v21  ;;  %v2987_v50 = vpack.c.bf16 %v5918_v1, %v5918_v1 }
 0x17e   : > { %9013 = vst [vmem:[#allocation5_spill] sm:$0xff] %v6655_v42 }
 0x180   : > { %v919_v61 = vpop.f32.mrf.mxu2 }
 0x181   : > { %v987_v46 = vadd.f32 %v919_v61, %v6486_v28  ;;  %v1168_v33 = vpop.f32.mrf.mxu3  ;;  %v1400_v5 = vpop.f32.mrf.mxu0  ;;  %v294_v28 = vld [vmem:[%s8980_s5 + $0x8] sm:$0xff] }
 0x182   : > { %v1478_v14 = vadd.f32 %v1400_v5, %v6578_v54  ;;  %2585 = vperm.xlu0 %6123, %v294_v28   ;;  %v1283_v61 = vld [vmem:[%s6207_s10 + $0xe3] sm:$0xff]  ;;  %v3044_v5 = vsel %vm3042_vm3, %v2987_v50, 0 }
 0x183   : > { %v1649_v26 = vpop.f32.mrf.mxu1  ;;  %v6670_v42 = vadd.f32 %v1168_v33, %v987_v46  ;;  %v1532_v46 = vld [vmem:[%s6207_s10 + $0xe4] sm:$0xff]  ;;  %v1533_v33 = vld [vmem:[%s6207_s10 + $0xec] sm:$0xff]  ;;  %3053 = vmatpush.bf16.msra.mxu1 %v3044_v5  ;;  %v300_v5 = vld [vmem:[%s8980_s5 + $0x38] sm:$0xff] }
 0x184   : > { %v6672_v18 = vadd.f32 %v1649_v26, %v1478_v14  ;;  %5836 = vmatmul.msk.bf16.gmra.mxu0 %vm442_vm2, %v1305_v20  ;;  %v1284_v20 = vld [vmem:[%s6207_s10 + $0xeb] sm:$0xff]  ;;  %v1042_v14 = vld [vmem:[%s6207_s10 + $0x122] sm:$0xff] }
 0x185   : > { %5802 = vmatmul.msk.bf16.gmra.mxu2 %vm442_vm2, %v1059_v23  ;;  %v1043_v26 = vld [vmem:[%s6207_s10 + $0x12a] sm:$0xff] }
 0x186   : > { %9014 = vst [vmem:[#allocation6_spill] sm:$0xff] %v6672_v18  ;;  %5855 = vmatmul.msk.bf16.gmra.mxu1 %vm442_vm2, %v6667_v10  ;;  %5821 = vmatmul.msk.bf16.gmra.mxu3 %vm442_vm2, %v1060_v30 }
 0x188   : > { %v922_v54 = vpop.f32.mrf.mxu2 }
 0x189   : > { %v988_v49 = vadd.f32 %v922_v54, %v6499_v53  ;;  %v1171_v55 = vpop.f32.mrf.mxu3  ;;  %v1402_v11 = vpop.f32.mrf.mxu0  ;;  %v295_v53 = vld [vmem:[%s8980_s5 + $0x10] sm:$0xff]  ;;  %v1306_v54 = vpack.c.bf16 %v1284_v20, %v1283_v61 }
 0x18a   : > { %v1479_v23 = vadd.f32 %v1402_v11, %v6592_v37  ;;  %v299_v37 = vld [vmem:[%s8980_s5 + $0x30] sm:$0xff]  ;;  %2590 = vperm.xlu1 %6124, %v295_v53  }
 0x18b   : > { %v1651_v39 = vpop.f32.mrf.mxu1  ;;  %v6684_v7 = vadd.f32 %v1171_v55, %v988_v49  ;;  %2610 = vperm.xlu0 %6123, %v299_v37  }
 0x18c   : > { %v6689_v21 = vadd.f32 %v1651_v39, %v1479_v23  ;;  %v1555_v23 = vpack.c.bf16 %v1533_v33, %v1532_v46 }
 0x18e   : > { %9015 = vst [vmem:[#allocation7_spill] sm:$0xff] %v6689_v21  ;;  %v1061_v21 = vpack.c.bf16 %v1043_v26, %v1042_v14  ;;  %v305_v14 = vld [vmem:[%s8980_s5 + $0x60] sm:$0xff]  ;;  %v1285_v26 = vld [vmem:[%s6207_s10 + $0xf3] sm:$0xff] }
 0x190   : > { %v924_v28 = vpop.f32.mrf.mxu2 }
 0x191   : > { %v989_v49 = vadd.f32 %v924_v28, %v6509_v8  ;;  %v1173_v55 = vpop.f32.mrf.mxu3  ;;  %v1405_v11 = vpop.f32.mrf.mxu0  ;;  %v296_v8 = vld [vmem:[%s8980_s5 + $0x18] sm:$0xff] }
 0x192   : > { %v1480_v39 = vadd.f32 %v1405_v11, %v6603_v38  ;;  %v302_v38 = vld [vmem:[%s8980_s5 + $0x48] sm:$0xff]  ;;  %2595 = vperm.xlu1 %6124, %v296_v8   ;;  %v1286_v28 = vld [vmem:[%s6207_s10 + $0xfb] sm:$0xff] }
 0x193   : > { %v1654_v1 = vpop.f32.mrf.mxu1  ;;  %v6706_v53 = vadd.f32 %v1173_v55, %v989_v49  ;;  %2625 = vperm.xlu0 %6123, %v302_v38   ;;  %v2004_v49 = vld [vmem:[%s6207_s10 + $0x25] sm:$0xff]  ;;  %v2005_v55 = vld [vmem:[%s6207_s10 + $0x2d] sm:$0xff]  ;;  %v1307_v11 = vpack.c.bf16 %v1286_v28, %v1285_v26 }
 0x194   : > { %v6708_v18 = vadd.f32 %v1654_v1, %v1480_v39  ;;  %5837 = vmatmul.msk.bf16.gmra.mxu0 %vm442_vm2, %v1306_v54  ;;  %v1535_v54 = vld [vmem:[%s6207_s10 + $0xfc] sm:$0xff] }
 0x195   : > { %5803 = vmatmul.msk.bf16.gmra.mxu2 %vm442_vm2, %v1060_v30 }
 0x196   : > { %5856 = vmatmul.msk.bf16.gmra.mxu1 %vm442_vm2, %v1555_v23  ;;  %5822 = vmatmul.msk.bf16.gmra.mxu3 %vm442_vm2, %v1061_v21 }
 0x198   : > { %v927_v30 = vpop.f32.mrf.mxu2 }
 0x199   : > { %v990_v50 = vadd.f32 %v927_v30, %v6522_v40  ;;  %v1176_v37 = vpop.f32.mrf.mxu3  ;;  %v1407_v21 = vpop.f32.mrf.mxu0  ;;  %v1534_v40 = vld [vmem:[%s6207_s10 + $0xf4] sm:$0xff] }
 0x19a   : > { %v1481_v61 = vadd.f32 %v1407_v21, %v6617_v45  ;;  %2615 = vperm.xlu1 %6124, %v300_v5   ;;  %v1556_v8 = vpack.c.bf16 %v1535_v54, %v1534_v40  ;;  %v306_v40 = vld [vmem:[%s8980_s5 + $0x68] sm:$0xff]  ;;  %v311_v54 = vld [vmem:[%s8980_s5 + $0x90] sm:$0xff] }
 0x19b   : > { %v1656_v20 = vpop.f32.mrf.mxu1  ;;  %v6722_v46 = vadd.f32 %v1176_v37, %v990_v50  ;;  %2640 = vperm.xlu0 %6123, %v305_v14   ;;  %v2040_v50 = vpack.c.bf16 %v2005_v55, %v2004_v49  ;;  %v1287_v49 = vld [vmem:[%s6207_s10 + $0x103] sm:$0xff]  ;;  %v1288_v55 = vld [vmem:[%s6207_s10 + $0x10b] sm:$0xff] }
 0x19c   : > { %v6724_v33 = vadd.f32 %v1656_v20, %v1481_v61 }
 0x1a0   : > { %v929_v45 = vpop.f32.mrf.mxu2 }
 0x1a1   : > { %v991_v23 = vadd.f32 %v929_v45, %v6532_v4  ;;  %v1178_v39 = vpop.f32.mrf.mxu3  ;;  %v1410_v1 = vpop.f32.mrf.mxu0  ;;  %v303_v4 = vld [vmem:[%s8980_s5 + $0x50] sm:$0xff] }
 0x1a2   : > { %v1482_v38 = vadd.f32 %v1410_v1, %v6628_v12  ;;  %v308_v12 = vld [vmem:[%s8980_s5 + $0x78] sm:$0xff]  ;;  %2630 = vperm.xlu1 %6124, %v303_v4   ;;  %v1537_v45 = vld [vmem:[%s6207_s10 + $0x10c] sm:$0xff] }
 0x1a3   : > { %v1659_v30 = vpop.f32.mrf.mxu1  ;;  %v6740_v37 = vadd.f32 %v1178_v39, %v991_v23  ;;  %2655 = vperm.xlu0 %6123, %v308_v12   ;;  %v2007_v23 = vld [vmem:[%s6207_s10 + $0x3d] sm:$0xff]  ;;  %v1308_v39 = vpack.c.bf16 %v1288_v55, %v1287_v49 }
 0x1a4   : > { %v6742_v21 = vadd.f32 %v1659_v30, %v1482_v38  ;;  %5838 = vmatmul.msk.bf16.gmra.mxu0 %vm442_vm2, %v1307_v11  ;;  %v2006_v11 = vld [vmem:[%s6207_s10 + $0x35] sm:$0xff] }
 0x1a5   : > { %5862 = vmatmul.msk.bf16.vlgmr.msra.gmra.mxu2 %vm442_vm2, %v6397_v24  ;;  %v2041_v12 = vpack.c.bf16 %v2007_v23, %v2006_v11  ;;  %v312_v11 = vld [vmem:[%s8980_s5 + $0x98] sm:$0xff] }
 0x1a6   : > { %5857 = vmatmul.msk.bf16.gmra.mxu1 %vm442_vm2, %v1556_v8  ;;  %5881 = vmatmul.msk.bf16.vlgmr.msra.gmra.mxu3 %vm442_vm2, %v2040_v50  ;;  %v1289_v23 = vld [vmem:[%s6207_s10 + $0x113] sm:$0xff] }
 0x1a8   : > { %v932_v24 = vpop.f32.mrf.mxu2 }
 0x1a9   : > { %v992_v61 = vadd.f32 %v932_v24, %v6545_v32  ;;  %v1181_v20 = vpop.f32.mrf.mxu3  ;;  %v1412_v5 = vpop.f32.mrf.mxu0  ;;  %v1536_v32 = vld [vmem:[%s6207_s10 + $0x104] sm:$0xff] }
 0x1aa   : > { %v6757_v14 = vadd.f32 %v1412_v5, %v6642_v47  ;;  %2645 = vperm.xlu1 %6124, %v306_v40   ;;  %v1557_v30 = vpack.c.bf16 %v1537_v45, %v1536_v32  ;;  %v298_v45 = vld [vmem:[%s8980_s5 + $0x28] sm:$0xff] }
 0x1ab   : > { %v6759_v26 = vpop.f32.mrf.mxu1  ;;  %v6761_v28 = vadd.f32 %v1181_v20, %v992_v61  ;;  %2670 = vperm.xlu0 %6123, %v311_v54   ;;  %v314_v20 = vld [vmem:[%s8980_s5 + $0xa8] sm:$0xff] }
 0x1b0   : > { %v934_v47 = vpop.f32.mrf.mxu2 }
 0x1b1   : > { %v993_v1 = vadd.f32 %v934_v47, %v6555_v43  ;;  %v1183_v8 = vpop.f32.mrf.mxu3  ;;  %v1415_v38 = vpop.f32.mrf.mxu0  ;;  %v297_v43 = vld [vmem:[%s8980_s5 + $0x20] sm:$0xff] }
 0x1b2   : > { %v1484_v50 = vadd.f32 %v1415_v38, %v6653_v6  ;;  %v309_v6 = vld [vmem:[%s8980_s5 + $0x80] sm:$0xff]  ;;  %2600 = vperm.xlu2 %6125, %v297_v43  }
 0x1b3   : > { %v1664_v4 = vpop.f32.mrf.mxu1  ;;  %v6777_v24 = vadd.f32 %v1183_v8, %v993_v1  ;;  %2660 = vperm.xlu1 %6124, %v309_v6   ;;  %2685 = vperm.xlu0 %6123, %v314_v20   ;;  %v1290_v47 = vld [vmem:[%s6207_s10 + $0x11b] sm:$0xff]  ;;  %v2008_v1 = vld [vmem:[%s6207_s10 + $0x45] sm:$0xff]  ;;  %v2009_v8 = vld [vmem:[%s6207_s10 + $0x4d] sm:$0xff] }
 0x1b4   : > { %v6779_v61 = vadd.f32 %v1664_v4, %v1484_v50  ;;  %5839 = vmatmul.msk.bf16.gmra.mxu0 %vm442_vm2, %v1308_v39  ;;  %v1539_v39 = vld [vmem:[%s6207_s10 + $0x11c] sm:$0xff] }
 0x1b5   : > { %5863 = vmatmul.msk.bf16.gmra.mxu2 %vm442_vm2, %v6418_v51 }
 0x1b6   : > { %5858 = vmatmul.msk.bf16.gmra.mxu1 %vm442_vm2, %v1557_v30  ;;  %5882 = vmatmul.msk.bf16.gmra.mxu3 %vm442_vm2, %v2041_v12  ;;  %v1309_v30 = vpack.c.bf16 %v1290_v47, %v1289_v23 }
 0x1b8   : > { %v937_v51 = vpop.f32.mrf.mxu2 }
 0x1b9   : > { %v994_v5 = vadd.f32 %v937_v51, %v6329_v2  ;;  %v1186_v40 = vpop.f32.mrf.mxu3  ;;  %v1417_v54 = vpop.f32.mrf.mxu0  ;;  %v317_v2 = vld [vmem:[%s8980_s5 + $0xc0] sm:$0xff]  ;;  %v2042_v51 = vpack.c.bf16 %v2009_v8, %v2008_v1  ;;  %v318_v1 = vld [vmem:[%s8980_s5 + $0xc8] sm:$0xff] }
 0x1ba   : > { %v6797_v49 = vadd.f32 %v1417_v54, %v6670_v42  ;;  %v1538_v42 = vld [vmem:[%s6207_s10 + $0x114] sm:$0xff]  ;;  %2605 = vperm.xlu2 %6125, %v298_v45   ;;  %v1291_v8 = vld [vmem:[%s6207_s10 + $0x123] sm:$0xff] }
 0x1bb   : > { %v6799_v55 = vpop.f32.mrf.mxu1  ;;  %v6801_v32 = vadd.f32 %v1186_v40, %v994_v5  ;;  %2675 = vperm.xlu1 %6124, %v312_v11   ;;  %2700 = vperm.xlu0 %6123, %v317_v2   ;;  %v1558_v43 = vpack.c.bf16 %v1539_v39, %v1538_v42  ;;  %v320_v54 = vld [vmem:[%s8980_s5 + $0xd8] sm:$0xff] }
 0x1bc   : > { %v304_v39 = vld [vmem:[%s8980_s5 + $0x58] sm:$0xff] }
 0x1c0   : > { %v939_v38 = vpop.f32.mrf.mxu2 }
 0x1c1   : > { %v995_v50 = vadd.f32 %v939_v38, %v6342_v19  ;;  %v1188_v4 = vpop.f32.mrf.mxu3  ;;  %v1420_v12 = vpop.f32.mrf.mxu0  ;;  %v301_v19 = vld [vmem:[%s8980_s5 + $0x40] sm:$0xff]  ;;  %v1292_v38 = vld [vmem:[%s6207_s10 + $0x12b] sm:$0xff] }
 0x1c2   : > { %v1486_v6 = vadd.f32 %v1420_v12, %v6684_v7  ;;  %v315_v7 = vld [vmem:[%s8980_s5 + $0xb0] sm:$0xff]  ;;  %2620 = vperm.xlu2 %6125, %v301_v19  }
 0x1c3   : > { %v1669_v20 = vpop.f32.mrf.mxu1  ;;  %v6820_v5 = vadd.f32 %v1188_v4, %v995_v50  ;;  %2690 = vperm.xlu1 %6124, %v315_v7   ;;  %2715 = vperm.xlu0 %6123, %v320_v54   ;;  %v2010_v50 = vld [vmem:[%s6207_s10 + $0x55] sm:$0xff]  ;;  %v2011_v4 = vld [vmem:[%s6207_s10 + $0x5d] sm:$0xff] }
 0x1c4   : > { %v6822_v40 = vadd.f32 %v1669_v20, %v1486_v6  ;;  %5840 = vmatmul.msk.bf16.gmra.mxu0 %vm442_vm2, %v1309_v30  ;;  %v1541_v30 = vld [vmem:[%s6207_s10 + $0x12c] sm:$0xff] }
 0x1c5   : > { %5864 = vmatmul.msk.bf16.gmra.mxu2 %vm442_vm2, %v6439_v16 }
 0x1c6   : > { %5859 = vmatmul.msk.bf16.gmra.mxu1 %vm442_vm2, %v1558_v43  ;;  %5883 = vmatmul.msk.bf16.gmra.mxu3 %vm442_vm2, %v2042_v51  ;;  %v1310_v43 = vpack.c.bf16 %v1292_v38, %v1291_v8 }
 0x1c8   : > { %v942_v16 = vpop.f32.mrf.mxu2 }
 0x1c9   : > { %v996_v45 = vadd.f32 %v942_v16, %v6351_v27  ;;  %v1191_v11 = vpop.f32.mrf.mxu3  ;;  %v1422_v23 = vpop.f32.mrf.mxu0  ;;  %v323_v27 = vld [vmem:[%s8980_s5 + $0xf0] sm:$0xff]  ;;  %v2043_v16 = vpack.c.bf16 %v2011_v4, %v2010_v50  ;;  %v324_v50 = vld [vmem:[%s8980_s5 + $0xf8] sm:$0xff]  ;;  %v2253_v4 = vld [vmem:[%s6207_s10 + $0x26] sm:$0xff] }
 0x1ca   : > { %v6840_v47 = vadd.f32 %v1422_v23, %v6706_v53  ;;  %v1540_v53 = vld [vmem:[%s6207_s10 + $0x124] sm:$0xff]  ;;  %2635 = vperm.xlu2 %6125, %v304_v39  }
 0x1cb   : > { %v6842_v2 = vpop.f32.mrf.mxu1  ;;  %v6844_v42 = vadd.f32 %v1191_v11, %v996_v45  ;;  %2705 = vperm.xlu1 %6124, %v318_v1   ;;  %2730 = vperm.xlu0 %6123, %v323_v27   ;;  %v1559_v19 = vpack.c.bf16 %v1541_v30, %v1540_v53  ;;  %v326_v23 = vld [vmem:[%s8980_s5 + $0x108] sm:$0xff] }
 0x1cc   : > { %v310_v30 = vld [vmem:[%s8980_s5 + $0x88] sm:$0xff] }
 0x1d0   : > { %v944_v12 = vpop.f32.mrf.mxu2 }
 0x1d1   : > { %v997_v6 = vadd.f32 %v944_v12, %v6361_v41  ;;  %v1193_v20 = vpop.f32.mrf.mxu3  ;;  %v1425_v51 = vpop.f32.mrf.mxu0  ;;  %v307_v41 = vld [vmem:[%s8980_s5 + $0x70] sm:$0xff] }
 0x1d2   : > { %v1488_v7 = vadd.f32 %v1425_v51, %v6722_v46  ;;  %v321_v46 = vld [vmem:[%s8980_s5 + $0xe0] sm:$0xff]  ;;  %2650 = vperm.xlu2 %6125, %v307_v41   ;;  %v2254_v12 = vld [vmem:[%s6207_s10 + $0x2e] sm:$0xff] }
 0x1d3   : > { %v1674_v54 = vpop.f32.mrf.mxu1  ;;  %v6863_v45 = vadd.f32 %v1193_v20, %v997_v6  ;;  %2720 = vperm.xlu1 %6124, %v321_v46   ;;  %2745 = vperm.xlu0 %6123, %v326_v23   ;;  %v2289_v6 = vpack.c.bf16 %v2254_v12, %v2253_v4  ;;  %v2255_v4 = vld [vmem:[%s6207_s10 + $0x36] sm:$0xff]  ;;  %v2256_v12 = vld [vmem:[%s6207_s10 + $0x3e] sm:$0xff] }
 0x1d4   : > { %v6865_v11 = vadd.f32 %v1674_v54, %v1488_v7  ;;  %5841 = vmatmul.msk.bf16.gmra.mxu0 %vm442_vm2, %v1310_v43  ;;  %v2013_v43 = vld [vmem:[%s6207_s10 + $0x6d] sm:$0xff] }
 0x1d5   : > { %5865 = vmatmul.msk.bf16.gmra.mxu2 %vm442_vm2, %v6468_v60 }
 0x1d6   : > { %5860 = vmatmul.msk.bf16.gmra.mxu1 %vm442_vm2, %v1559_v19  ;;  %5884 = vmatmul.msk.bf16.gmra.mxu3 %vm442_vm2, %v2043_v16 }
 0x1d8   : > { %v947_v60 = vpop.f32.mrf.mxu2 }
 0x1d9   : > { %v998_v39 = vadd.f32 %v947_v60, %v6369_v48  ;;  %v1196_v1 = vpop.f32.mrf.mxu3  ;;  %v1427_v8 = vpop.f32.mrf.mxu0  ;;  %v2012_v48 = vld [vmem:[%s6207_s10 + $0x65] sm:$0xff] }
 0x1da   : > { %v6883_v38 = vadd.f32 %v1427_v8, %v6740_v37  ;;  %2665 = vperm.xlu2 %6125, %v310_v30   ;;  %v2044_v16 = vpack.c.bf16 %v2013_v43, %v2012_v48  ;;  %v2014_v48 = vld [vmem:[%s6207_s10 + $0x75] sm:$0xff]  ;;  %v2015_v43 = vld [vmem:[%s6207_s10 + $0x7d] sm:$0xff] }
 0x1db   : > { %v6885_v27 = vpop.f32.mrf.mxu1  ;;  %v6887_v53 = vadd.f32 %v1196_v1, %v998_v39  ;;  %2735 = vperm.xlu1 %6124, %v324_v50   ;;  %v316_v50 = vld [vmem:[%s8980_s5 + $0xb8] sm:$0xff] }
 0x1e0   : > { %v949_v37 = vpop.f32.mrf.mxu2 }
 0x1e1   : > { %v999_v20 = vadd.f32 %v949_v37, %v6379_v63  ;;  %v1198_v51 = vpop.f32.mrf.mxu3  ;;  %v1430_v19 = vpop.f32.mrf.mxu0  ;;  %v313_v63 = vld [vmem:[%s8980_s5 + $0xa0] sm:$0xff] }
 0x1e2   : > { %v1490_v7 = vadd.f32 %v1430_v19, %v6761_v28  ;;  %v327_v28 = vld [vmem:[%s8980_s5 + $0x110] sm:$0xff]  ;;  %2680 = vperm.xlu2 %6125, %v313_v63  }
 0x1e3   : > { %v1679_v54 = vpop.f32.mrf.mxu1  ;;  %v6901_v41 = vadd.f32 %v1198_v51, %v999_v20  ;;  %2750 = vperm.xlu1 %6124, %v327_v28  }
 0x1e4   : > { %v6903_v46 = vadd.f32 %v1679_v54, %v1490_v7  ;;  %5900 = vmatmul.msk.bf16.vlgmr.msra.gmra.mxu0 %vm442_vm2, %v2289_v6  ;;  %v2045_v7 = vpack.c.bf16 %v2015_v43, %v2014_v48  ;;  %v2017_v48 = vld [vmem:[%s6207_s10 + $0x8d] sm:$0xff] }
 0x1e5   : > { %5866 = vmatmul.msk.bf16.gmra.mxu2 %vm442_vm2, %v6495_v62 }
 0x1e6   : > { %5885 = vmatmul.msk.bf16.gmra.mxu3 %vm442_vm2, %v2044_v16 }
 0x1e8   : > { %v952_v23 = vpop.f32.mrf.mxu2 }
 0x1e9   : > { %v1000_v60 = vadd.f32 %v952_v23, %v6387_v9  ;;  %v1201_v39 = vpop.f32.mrf.mxu3  ;;  %v1432_v1 = vpop.f32.mrf.mxu0  ;;  %v2290_v9 = vpack.c.bf16 %v2256_v12, %v2255_v4  ;;  %v2258_v4 = vld [vmem:[%s6207_s10 + $0x4e] sm:$0xff]  ;;  %v2016_v12 = vld [vmem:[%s6207_s10 + $0x85] sm:$0xff] }
 0x1ea   : > { %v6917_v62 = vadd.f32 %v1432_v1, %v6777_v24  ;;  %2695 = vperm.xlu2 %6125, %v316_v50   ;;  %v2257_v50 = vld [vmem:[%s6207_s10 + $0x46] sm:$0xff] }
 0x1eb   : > { %v6919_v8 = vpop.f32.mrf.mxu1  ;;  %v6921_v30 = vadd.f32 %v1201_v39, %v1000_v60 }
 0x1f0   : > { %v954_v37 = vpop.f32.mrf.mxu2 }
 0x1f1   : > { %v1001_v6 = vadd.f32 %v954_v37, %v6399_v25  ;;  %v1203_v20 = vpop.f32.mrf.mxu3  ;;  %v1435_v24 = vpop.f32.mrf.mxu0  ;;  %v319_v25 = vld [vmem:[%s8980_s5 + $0xd0] sm:$0xff] }
 0x1f2   : > { %v1492_v51 = vadd.f32 %v1435_v24, %v6801_v32  ;;  %2710 = vperm.xlu2 %6125, %v319_v25   ;;  %v2046_v24 = vpack.c.bf16 %v2017_v48, %v2016_v12  ;;  %v2019_v12 = vld [vmem:[%s6207_s10 + $0x9d] sm:$0xff] }
 0x1f3   : > { %v1684_v19 = vpop.f32.mrf.mxu1  ;;  %v6932_v54 = vadd.f32 %v1203_v20, %v1001_v6 }
 0x1f4   : > { %v6934_v16 = vadd.f32 %v1684_v19, %v1492_v51  ;;  %5901 = vmatmul.msk.bf16.gmra.mxu0 %vm442_vm2, %v2290_v9 }
 0x1f5   : > { %5867 = vmatmul.msk.bf16.gmra.mxu2 %vm442_vm2, %v6518_v22  ;;  %v322_v22 = vld [vmem:[%s8980_s5 + $0xe8] sm:$0xff] }
 0x1f6   : > { %5886 = vmatmul.msk.bf16.gmra.mxu3 %vm442_vm2, %v2045_v7 }
 0x1f8   : > { %v957_v32 = vpop.f32.mrf.mxu2 }
 0x1f9   : > { %v1002_v63 = vadd.f32 %v957_v32, %v6408_v34  ;;  %v1206_v28 = vpop.f32.mrf.mxu3  ;;  %v1437_v23 = vpop.f32.mrf.mxu0  ;;  %v2291_v34 = vpack.c.bf16 %v2258_v4, %v2257_v50  ;;  %v2260_v50 = vld [vmem:[%s6207_s10 + $0x5e] sm:$0xff]  ;;  %v2018_v4 = vld [vmem:[%s6207_s10 + $0x95] sm:$0xff] }
 0x1fa   : > { %v6945_v60 = vadd.f32 %v1437_v23, %v6820_v5  ;;  %2725 = vperm.xlu2 %6125, %v322_v22   ;;  %v2259_v22 = vld [vmem:[%s6207_s10 + $0x56] sm:$0xff] }
 0x1fb   : > { %v6947_v39 = vpop.f32.mrf.mxu1  ;;  %v6949_v1 = vadd.f32 %v1206_v28, %v1002_v63 }
 0x200   : > { %v959_v43 = vpop.f32.mrf.mxu2 }
 0x201   : > { %v1003_v37 = vadd.f32 %v959_v43, %v6420_v52  ;;  %v1208_v9 = vpop.f32.mrf.mxu3  ;;  %v1440_v5 = vpop.f32.mrf.mxu0  ;;  %v325_v52 = vld [vmem:[%s8980_s5 + $0x100] sm:$0xff] }
 0x202   : > { %v1494_v6 = vadd.f32 %v1440_v5, %v6844_v42  ;;  %2740 = vperm.xlu2 %6125, %v325_v52   ;;  %v2047_v5 = vpack.c.bf16 %v2019_v12, %v2018_v4 }
 0x203   : > { %v1689_v20 = vpop.f32.mrf.mxu1  ;;  %v6960_v51 = vadd.f32 %v1208_v9, %v1003_v37 }
 0x204   : > { %v6962_v19 = vadd.f32 %v1689_v20, %v1494_v6  ;;  %5902 = vmatmul.msk.bf16.gmra.mxu0 %vm442_vm2, %v2291_v34 }
 0x205   : > { %5868 = vmatmul.msk.bf16.gmra.mxu2 %vm442_vm2, %v6541_v44  ;;  %v328_v44 = vld [vmem:[%s8980_s5 + $0x118] sm:$0xff] }
 0x206   : > { %5887 = vmatmul.msk.bf16.gmra.mxu3 %vm442_vm2, %v2046_v24 }
 0x208   : > { %v962_v42 = vpop.f32.mrf.mxu2 }
 0x209   : > { %v1004_v7 = vadd.f32 %v962_v42, %v6429_v59  ;;  %v1211_v25 = vpop.f32.mrf.mxu3  ;;  %v1442_v32 = vpop.f32.mrf.mxu0  ;;  %v2292_v59 = vpack.c.bf16 %v2260_v50, %v2259_v22  ;;  %v2020_v22 = vld [vmem:[%s6207_s10 + $0xa5] sm:$0xff]  ;;  %v2021_v50 = vld [vmem:[%s6207_s10 + $0xad] sm:$0xff] }
 0x20a   : > { %v6973_v63 = vadd.f32 %v1442_v32, %v6863_v45  ;;  %2755 = vperm.xlu2 %6125, %v328_v44   ;;  %v2261_v32 = vld [vmem:[%s6207_s10 + $0x66] sm:$0xff]  ;;  %v2262_v44 = vld [vmem:[%s6207_s10 + $0x6e] sm:$0xff] }
 0x20b   : > { %v6975_v28 = vpop.f32.mrf.mxu1  ;;  %v6977_v23 = vadd.f32 %v1211_v25, %v1004_v7 }
 0x210   : > { %v964_v48 = vpop.f32.mrf.mxu2 }
 0x211   : > { %v1005_v43 = vadd.f32 %v964_v48, %v6441_v17  ;;  %v1213_v34 = vpop.f32.mrf.mxu3  ;;  %v1445_v45 = vpop.f32.mrf.mxu0 }
 0x212   : > { %v1496_v37 = vadd.f32 %v1445_v45, %v6887_v53 }
 0x213   : > { %v1694_v9 = vpop.f32.mrf.mxu1  ;;  %v6988_v6 = vadd.f32 %v1213_v34, %v1005_v43  ;;  %v2048_v43 = vpack.c.bf16 %v2021_v50, %v2020_v22 }
 0x214   : > { %v6990_v20 = vadd.f32 %v1694_v9, %v1496_v37  ;;  %5903 = vmatmul.msk.bf16.gmra.mxu0 %vm442_vm2, %v2292_v59 }
 0x215   : > { %5869 = vmatmul.msk.bf16.gmra.mxu2 %vm442_vm2, %v6564_v3  ;;  %v2293_v3 = vpack.c.bf16 %v2262_v44, %v2261_v32 }
 0x216   : > { %5888 = vmatmul.msk.bf16.gmra.mxu3 %vm442_vm2, %v2047_v5 }
 0x218   : > { %v967_v17 = vpop.f32.mrf.mxu2 }
 0x219   : > { %v1006_v24 = vadd.f32 %v967_v17, %v6450_v31  ;;  %v1216_v53 = vpop.f32.mrf.mxu3  ;;  %v1447_v52 = vpop.f32.mrf.mxu0  ;;  %v2263_v17 = vld [vmem:[%s6207_s10 + $0x76] sm:$0xff] }
 0x21a   : > { %v6998_v42 = vadd.f32 %v1447_v52, %v6901_v41  ;;  %v2023_v52 = vld [vmem:[%s6207_s10 + $0xbd] sm:$0xff] }
 0x21b   : > { %v7000_v7 = vpop.f32.mrf.mxu1  ;;  %v7002_v25 = vadd.f32 %v1216_v53, %v1006_v24  ;;  %v2264_v24 = vld [vmem:[%s6207_s10 + $0x7e] sm:$0xff]  ;;  %v2022_v53 = vld [vmem:[%s6207_s10 + $0xb5] sm:$0xff] }
 0x21c   : > { %v2294_v44 = vpack.c.bf16 %v2264_v24, %v2263_v17  ;;  %v2025_v17 = vld [vmem:[%s6207_s10 + $0xcd] sm:$0xff] }
 0x220   : > { %v969_v4 = vpop.f32.mrf.mxu2 }
 0x221   : > { %v1007_v12 = vadd.f32 %v969_v4, %v6470_v0  ;;  %v1218_v48 = vpop.f32.mrf.mxu3  ;;  %v1450_v31 = vpop.f32.mrf.mxu0 }
 0x222   : > { %v1498_v41 = vadd.f32 %v1450_v31, %v6921_v30 }
 0x223   : > { %v1699_v59 = vpop.f32.mrf.mxu1  ;;  %v7010_v34 = vadd.f32 %v1218_v48, %v1007_v12 }
 0x224   : > { %v7012_v45 = vadd.f32 %v1699_v59, %v1498_v41  ;;  %5904 = vmatmul.msk.bf16.gmra.mxu0 %vm442_vm2, %v2293_v3  ;;  %v2049_v3 = vpack.c.bf16 %v2023_v52, %v2022_v53  ;;  %v8983_v59 = vmov 0.0  }
 0x225   : > { %5870 = vmatmul.msk.bf16.gmra.mxu2 %vm442_vm2, %v6589_v15  ;;  %2797 = vst.msk [vmem:[#allocation2 + $0x10] sm:$0xff] %vm2794_vm4, %v8983_v59 }
 0x226   : > { %5889 = vmatmul.msk.bf16.gmra.mxu3 %vm442_vm2, %v2048_v43  ;;  %v2265_v43 = vld [vmem:[%s6207_s10 + $0x86] sm:$0xff]  ;;  %2798 = vst.msk [vmem:[#allocation2 + $0x18] sm:$0xff] %vm2794_vm4, %v8983_v59 }
 0x227   : > { %2795 = vst.msk [vmem:[#allocation2] sm:$0xff] %vm2794_vm4, %v8983_v59 }
 0x228   : > { %v7018_v0 = vpop.f32.mrf.mxu2  ;;  %2796 = vst.msk [vmem:[#allocation2 + $0x8] sm:$0xff] %vm2794_vm4, %v8983_v59 }
 0x229   : > { %v7020_v37 = vpop.f32.mrf.mxu3  ;;  %v1452_v9 = vpop.f32.mrf.mxu0  ;;  %2799 = vst.msk [vmem:[#allocation2 + $0x20] sm:$0xff] %vm2794_vm4, %v8983_v59 }
 0x22a   : > { %v7023_v30 = vadd.f32 %v1452_v9, %v6932_v54  ;;  %v2266_v9 = vld [vmem:[%s6207_s10 + $0x8e] sm:$0xff]  ;;  %2800 = vst.msk [vmem:[#allocation2 + $0x28] sm:$0xff] %vm2794_vm4, %v8983_v59 }
 0x22b   : > { %v7025_v5 = vpop.f32.mrf.mxu1  ;;  %v2295_v24 = vpack.c.bf16 %v2266_v9, %v2265_v43  ;;  %2801 = vst.msk [vmem:[#allocation2 + $0x30] sm:$0xff] %vm2794_vm4, %v8983_v59 }
 0x22c   : > { %9016 = vst [vmem:[#allocation8_spill] sm:$0xff] %v7025_v5 }
 0x22d   : > { %2802 = vst.msk [vmem:[#allocation2 + $0x38] sm:$0xff] %vm2794_vm4, %v8983_v59 }
 0x22e   : > { %2803 = vst.msk [vmem:[#allocation2 + $0x40] sm:$0xff] %vm2794_vm4, %v8983_v59 }
 0x22f   : > { %2804 = vst.msk [vmem:[#allocation2 + $0x48] sm:$0xff] %vm2794_vm4, %v8983_v59 }
 0x230   : > { %v7031_v32 = vpop.f32.mrf.mxu2  ;;  %2805 = vst.msk [vmem:[#allocation2 + $0x50] sm:$0xff] %vm2794_vm4, %v8983_v59 }
 0x231   : > { %v7033_v15 = vpop.f32.mrf.mxu3  ;;  %v1455_v22 = vpop.f32.mrf.mxu0  ;;  %2806 = vst.msk [vmem:[#allocation2 + $0x58] sm:$0xff] %vm2794_vm4, %v8983_v59 }
 0x232   : > { %v1500_v50 = vadd.f32 %v1455_v22, %v6949_v1  ;;  %2807 = vst.msk [vmem:[#allocation2 + $0x60] sm:$0xff] %vm2794_vm4, %v8983_v59 }
 0x233   : > { %v1704_v4 = vpop.f32.mrf.mxu1  ;;  %2808 = vst.msk [vmem:[#allocation2 + $0x68] sm:$0xff] %vm2794_vm4, %v8983_v59 }
 0x234   : > { %v7036_v54 = vadd.f32 %v1704_v4, %v1500_v50  ;;  %5905 = vmatmul.msk.bf16.gmra.mxu0 %vm442_vm2, %v2294_v44  ;;  %2809 = vst.msk [vmem:[#allocation2 + $0x70] sm:$0xff] %vm2794_vm4, %v8983_v59 }
 0x235   : > { %5871 = vmatmul.msk.bf16.gmra.mxu2 %vm442_vm2, %v6614_v36  ;;  %v2024_v36 = vld [vmem:[%s6207_s10 + $0xc5] sm:$0xff]  ;;  %2810 = vst.msk [vmem:[#allocation2 + $0x78] sm:$0xff] %vm2794_vm4, %v8983_v59 }
 0x236   : > { %9017 = vst [vmem:[#allocation9_spill] sm:$0xff] %v7036_v54  ;;  %5890 = vmatmul.msk.bf16.gmra.mxu3 %vm442_vm2, %v2049_v3  ;;  %v2050_v50 = vpack.c.bf16 %v2025_v17, %v2024_v36  ;;  %v2932_v3 = vld [vmem:[#allocation2 + $0x9] sm:$0xff] }
 0x237   : > { %2811 = vst.msk [vmem:[#allocation2 + $0x80] sm:$0xff] %vm2794_vm4, %v8983_v59 }
 0x238   : > { %v7042_v12 = vpop.f32.mrf.mxu2  ;;  %2812 = vst.msk [vmem:[#allocation2 + $0x88] sm:$0xff] %vm2794_vm4, %v8983_v59 }
 0x239   : > { %v7044_v48 = vpop.f32.mrf.mxu3  ;;  %v1457_v31 = vpop.f32.mrf.mxu0  ;;  %2813 = vst.msk [vmem:[#allocation2 + $0x90] sm:$0xff] %vm2794_vm4, %v8983_v59 }
 0x23a   : > { %v7047_v1 = vadd.f32 %v1457_v31, %v6960_v51  ;;  %2814 = vst.msk [vmem:[#allocation2 + $0x98] sm:$0xff] %vm2794_vm4, %v8983_v59 }
 0x23b   : > { %v7049_v41 = vpop.f32.mrf.mxu1  ;;  %2815 = vst.msk [vmem:[#allocation2 + $0xa0] sm:$0xff] %vm2794_vm4, %v8983_v59 }
 0x23c   : > { %9018 = vst [vmem:[#allocation10_spill] sm:$0xff] %v7047_v1 }
 0x23d   : > { %9019 = vst [vmem:[#allocation11_spill] sm:$0xff] %v7049_v41 }
 0x23e   : > { %2816 = vst.msk [vmem:[#allocation2 + $0xa8] sm:$0xff] %vm2794_vm4, %v8983_v59 }
 0x23f   : > { %2817 = vst.msk [vmem:[#allocation2 + $0xb0] sm:$0xff] %vm2794_vm4, %v8983_v59 }
 0x240   : > { %v7063_v51 = vpop.f32.mrf.mxu2  ;;  %2818 = vst.msk [vmem:[#allocation2 + $0xb8] sm:$0xff] %vm2794_vm4, %v8983_v59 }
 0x241   : > { %v7067_v53 = vpop.f32.mrf.mxu3  ;;  %v1460_v52 = vpop.f32.mrf.mxu0  ;;  %2819 = vst.msk [vmem:[#allocation2 + $0xc0] sm:$0xff] %vm2794_vm4, %v8983_v59  ;;  %v1971_v54 = vadd.f32 %v7063_v51, %v6605_v58 }
 0x242   : > { %v1502_v44 = vadd.f32 %v1460_v52, %v6977_v23  ;;  %v2931_v23 = vld [vmem:[#allocation2 + $0x1] sm:$0xff]  ;;  %2820 = vst.msk [vmem:[#allocation2 + $0xc8] sm:$0xff] %vm2794_vm4, %v8983_v59 }
 0x243   : > { %v1709_v22 = vpop.f32.mrf.mxu1  ;;  %v2967_v31 = vpack.c.bf16 %v2932_v3, %v2931_v23  ;;  %v2268_v52 = vld [vmem:[%s6207_s10 + $0x9e] sm:$0xff]  ;;  %2821 = vst.msk [vmem:[#allocation2 + $0xd0] sm:$0xff] %vm2794_vm4, %v8983_v59 }
 0x244   : > { %v7076_v4 = vadd.f32 %v1709_v22, %v1502_v44  ;;  %5906 = vmatmul.msk.bf16.gmra.mxu0 %vm442_vm2, %v2295_v24  ;;  %v2267_v24 = vld [vmem:[%s6207_s10 + $0x96] sm:$0xff]  ;;  %2822 = vst.msk [vmem:[#allocation2 + $0xd8] sm:$0xff] %vm2794_vm4, %v8983_v59 }
 0x245   : > { %5872 = vmatmul.msk.bf16.gmra.mxu2 %vm442_vm2, %v6639_v57  ;;  %5919 = vmatmul.msk.bf16.vlgmr.msra.gmra.mxu1 %vm2794_vm4, %v2967_v31  ;;  %v2027_v44 = vld [vmem:[%s6207_s10 + $0xdd] sm:$0xff]  ;;  %2823 = vst.msk [vmem:[#allocation2 + $0xe0] sm:$0xff] %vm2794_vm4, %v8983_v59 }
 0x246   : > { %9020 = vst [vmem:[#allocation12_spill] sm:$0xff] %v7076_v4  ;;  %5891 = vmatmul.msk.bf16.gmra.mxu3 %vm442_vm2, %v2050_v50  ;;  %v2296_v50 = vpack.c.bf16 %v2268_v52, %v2267_v24 }
 0x247   : > { %2824 = vst.msk [vmem:[#allocation2 + $0xe8] sm:$0xff] %vm2794_vm4, %v8983_v59 }
 0x248   : > { %v7090_v43 = vpop.f32.mrf.mxu2  ;;  %2825 = vst.msk [vmem:[#allocation2 + $0xf0] sm:$0xff] %vm2794_vm4, %v8983_v59 }
 0x249   : > { %v7094_v57 = vpop.f32.mrf.mxu3  ;;  %v1462_v9 = vpop.f32.mrf.mxu0  ;;  %2826 = vst.msk [vmem:[#allocation2 + $0xf8] sm:$0xff] %vm2794_vm4, %v8983_v59 }
 0x24a   : > { %v7100_v36 = vadd.f32 %v1462_v9, %v6988_v6  ;;  %v2026_v6 = vld [vmem:[%s6207_s10 + $0xd5] sm:$0xff]  ;;  %2827 = vst.msk [vmem:[#allocation2 + $0x100] sm:$0xff] %vm2794_vm4, %v8983_v59 }
 0x24b   : > { %v7102_v17 = vpop.f32.mrf.mxu1  ;;  %2828 = vst.msk [vmem:[#allocation2 + $0x108] sm:$0xff] %vm2794_vm4, %v8983_v59 }
 0x24c   : > { %9021 = vst [vmem:[#allocation13_spill] sm:$0xff] %v7100_v36 }
 0x24d   : > { %9022 = vst [vmem:[#allocation14_spill] sm:$0xff] %v7102_v17  ;;  %v2051_v17 = vpack.c.bf16 %v2027_v44, %v2026_v6  ;;  %v1968_v6 = vadd.f32 %v7018_v0, %v6569_v35  ;;  %v2269_v44 = vld [vmem:[%s6207_s10 + $0xa6] sm:$0xff] }
 0x24e   : > { %2829 = vst.msk [vmem:[#allocation2 + $0x110] sm:$0xff] %vm2794_vm4, %v8983_v59 }
 0x24f   : > { %2830 = vst.msk [vmem:[#allocation2 + $0x118] sm:$0xff] %vm2794_vm4, %v8983_v59  ;;  %v2217_v35 = vadd.f32 %v7020_v37, %v1968_v6  ;;  %v1969_v6 = vadd.f32 %v7031_v32, %v6580_v56 }
 0x250   : > { %v7120_v22 = vpop.f32.mrf.mxu2  ;;  %2831 = vst.msk [vmem:[#allocation2 + $0x120] sm:$0xff] %vm2794_vm4, %v8983_v59 }
 0x251   : > { %v7124_v23 = vpop.f32.mrf.mxu3  ;;  %v1465_v3 = vpop.f32.mrf.mxu0  ;;  %2832 = vst.msk [vmem:[#allocation2 + $0x128] sm:$0xff] %vm2794_vm4, %v8983_v59  ;;  %v2218_v56 = vadd.f32 %v7033_v15, %v1969_v6  ;;  %v1781_v15 = vld [vmem:[%s6207_s10 + $0xf4] sm:$0xff]  ;;  %v1782_v6 = vld [vmem:[%s6207_s10 + $0xfc] sm:$0xff] }
 0x252   : > { %v1504_v31 = vadd.f32 %v1465_v3, %v7002_v25  ;;  %v1780_v3 = vld [vmem:[%s6207_s10 + $0xec] sm:$0xff]  ;;  %2833 = vst.msk [vmem:[#allocation2 + $0x130] sm:$0xff] %vm2794_vm4, %v8983_v59 }
 0x253   : > { %v1714_v9 = vpop.f32.mrf.mxu1  ;;  %2834 = vst.msk [vmem:[#allocation2 + $0x138] sm:$0xff] %vm2794_vm4, %v8983_v59 }
 0x254   : > { %v7133_v24 = vadd.f32 %v1714_v9, %v1504_v31  ;;  %5907 = vmatmul.msk.bf16.gmra.mxu0 %vm442_vm2, %v2296_v50  ;;  %v2270_v50 = vld [vmem:[%s6207_s10 + $0xae] sm:$0xff]  ;;  %v2028_v31 = vld [vmem:[%s6207_s10 + $0xe5] sm:$0xff]  ;;  %2835 = vst.msk [vmem:[#allocation2 + $0x140] sm:$0xff] %vm2794_vm4, %v8983_v59  ;;  %v2031_v59 = vld [vmem:[%s6207_s10 + $0xfd] sm:$0xff] }
 0x255   : > { %5873 = vmatmul.msk.bf16.gmra.mxu2 %vm442_vm2, %v6667_v10  ;;  %v2029_v9 = vld [vmem:[%s6207_s10 + $0xed] sm:$0xff] }
 0x256   : > { %9023 = vst [vmem:[#allocation15_spill] sm:$0xff] %v7133_v24  ;;  %5892 = vmatmul.msk.bf16.gmra.mxu3 %vm442_vm2, %v2051_v17  ;;  %v2052_v37 = vpack.c.bf16 %v2029_v9, %v2028_v31  ;;  %v2271_v9 = vld [vmem:[%s6207_s10 + $0xb6] sm:$0xff] }
 0x258   : > { %v7147_v25 = vpop.f32.mrf.mxu2 }
 0x259   : > { %v7151_v10 = vpop.f32.mrf.mxu3  ;;  %v1467_v52 = vpop.f32.mrf.mxu0 }
 0x25a   : > { %v7156_v17 = vadd.f32 %v1467_v52, %v7010_v34  ;;  %v1779_v34 = vld [vmem:[%s6207_s10 + $0xe4] sm:$0xff]  ;;  %v7184_v52 = vld [vmem:[%s8977_s2] ss:$0 sm:$0xff] }
 0x25b   : > { %v1803_v4 = vpack.c.bf16 %v1780_v3, %v1779_v34 }
 0x25c   : > { %9024 = vst [vmem:[#allocation16_spill] sm:$0xff] %v7156_v17  ;;  %v2297_v17 = vpack.c.bf16 %v2270_v50, %v2269_v44 }
 0x260   : > { %v7179_v0 = vpop.f32.mrf.mxu2 }
 0x261   : > { %v7188_v24 = vpop.f32.mrf.mxu3  ;;  %v2376_v36 = vpop.f32.mrf.mxu0 }
 0x262   : > { %v2466_v41 = vadd.f32 %v2376_v36, %v2217_v35  ;;  %v7202_v36 = vpop.permute.xlu0 %2580  ;;  %v2272_v35 = vld [vmem:[%s6207_s10 + $0xbe] sm:$0xff] }
 0x263   : > { %9025 = vst [vmem:[#allocation17_spill] sm:$0xff] %v7202_v36 }
 0x264   : > { %v2506_v44 = vadd.f32 %v7184_v52, %v2466_v41  ;;  %5908 = vmatmul.msk.bf16.gmra.mxu0 %vm442_vm2, %v2297_v17 }
 0x265   : > { %5874 = vmatmul.msk.bf16.gmra.mxu2 %vm442_vm2, %v1803_v4  ;;  %v1970_v4 = vadd.f32 %v7042_v12, %v6594_v29  ;;  %v1804_v12 = vpack.c.bf16 %v1782_v6, %v1781_v15  ;;  %v9028_v15 = vld [vmem:[#allocation3_spill] sm:$0xff]  ;;  %v2273_v6 = vld [vmem:[%s6207_s10 + $0xc6] sm:$0xff] }
 0x266   : > { %v2542_v50 = vmax.f32 %v2506_v44, 0.0  ;;  %5893 = vmatmul.msk.bf16.gmra.mxu3 %vm442_vm2, %v2052_v37 }
 0x268   : > { %v2758_v32 = vmul.f32 %v7202_v36, %v2542_v50  ;;  %v7208_v41 = vpop.f32.mrf.mxu2  ;;  %v2030_v50 = vld [vmem:[%s6207_s10 + $0xf5] sm:$0xff]  ;;  %v2219_v36 = vadd.f32 %v7044_v48, %v1970_v4  ;;  %v7235_v48 = vpop.permute.xlu1 %2590 }
 0x269   : > { %v7210_v34 = vpop.f32.mrf.mxu3  ;;  %v2378_v17 = vpop.f32.mrf.mxu0  ;;  %9027 = vst [vmem:[#allocation19_spill] sm:$0xff] %v7235_v48 }
 0x26a   : > { %2839 = vst.msk [vmem:[#allocation2 + $0x13] sm:$0xff] %vm2794_vm4, %v2758_v32  ;;  %v2467_v3 = vadd.f32 %v2378_v17, %v2218_v56  ;;  %v7220_v44 = vpop.permute.xlu0 %2585  ;;  %v2298_v56 = vpack.c.bf16 %v2272_v35, %v2271_v9 }
 0x26b   : > { %9026 = vst [vmem:[#allocation18_spill] sm:$0xff] %v7220_v44 }
 0x26c   : > { %v2507_v31 = vadd.f32 %v7184_v52, %v2467_v3 }
 0x26e   : > { %v2543_v37 = vmax.f32 %v2507_v31, 0.0  ;;  %v2053_v31 = vpack.c.bf16 %v2031_v59, %v2030_v50  ;;  %v2274_v50 = vld [vmem:[%s6207_s10 + $0xce] sm:$0xff] }
 0x270   : > { %v2759_v1 = vmul.f32 %v7220_v44, %v2543_v37  ;;  %v7226_v32 = vpop.f32.mrf.mxu2 }
 0x271   : > { %v7228_v17 = vpop.f32.mrf.mxu3  ;;  %v2381_v29 = vpop.f32.mrf.mxu0  ;;  %v2933_v9 = vld [vmem:[#allocation2 + $0x11] sm:$0xff] }
 0x272   : > { %2840 = vst.msk [vmem:[#allocation2 + $0x1b] sm:$0xff] %vm2794_vm4, %v2759_v1  ;;  %v2468_v3 = vadd.f32 %v2381_v29, %v2219_v36  ;;  %v2220_v1 = vadd.f32 %v7067_v53, %v1971_v54  ;;  %v1972_v54 = vadd.f32 %v7090_v43, %v9028_v15  ;;  %v1783_v29 = vld [vmem:[%s6207_s10 + $0x104] sm:$0xff]  ;;  %v2299_v43 = vpack.c.bf16 %v2274_v50, %v2273_v6 }
 0x274   : > { %v2508_v5 = vadd.f32 %v7184_v52, %v2468_v3  ;;  %5909 = vmatmul.msk.bf16.gmra.mxu0 %vm442_vm2, %v2298_v56  ;;  %v7254_v3 = vpop.permute.xlu1 %2595 }
 0x275   : > { %5875 = vmatmul.msk.bf16.gmra.mxu2 %vm442_vm2, %v1804_v12  ;;  %v1784_v12 = vld [vmem:[%s6207_s10 + $0x10c] sm:$0xff]  ;;  %9029 = vst [vmem:[#allocation3_spill] sm:$0xff] %v7254_v3 }
 0x276   : > { %v2544_v4 = vmax.f32 %v2508_v5, 0.0  ;;  %5894 = vmatmul.msk.bf16.gmra.mxu3 %vm442_vm2, %v2053_v31  ;;  %v2032_v31 = vld [vmem:[%s6207_s10 + $0x105] sm:$0xff] }
 0x278   : > { %v2760_v59 = vmul.f32 %v7235_v48, %v2544_v4  ;;  %v7241_v58 = vpop.f32.mrf.mxu2  ;;  %v2033_v4 = vld [vmem:[%s6207_s10 + $0x10d] sm:$0xff] }
 0x279   : > { %v7243_v51 = vpop.f32.mrf.mxu3  ;;  %v2383_v36 = vpop.f32.mrf.mxu0  ;;  %v2934_v35 = vld [vmem:[#allocation2 + $0x19] sm:$0xff]  ;;  %v2054_v15 = vpack.c.bf16 %v2033_v4, %v2032_v31 }
 0x27a   : > { %2841 = vst.msk [vmem:[#allocation2 + $0x23] sm:$0xff] %vm2794_vm4, %v2760_v59  ;;  %v2469_v5 = vadd.f32 %v2383_v36, %v2220_v1  ;;  %v2968_v37 = vpack.c.bf16 %v2934_v35, %v2933_v9  ;;  %v2221_v59 = vadd.f32 %v7094_v57, %v1972_v54  ;;  %v7269_v57 = vpop.permute.xlu2 %2600  ;;  %v9031_v4 = vld [vmem:[#allocation4_spill] sm:$0xff] }
 0x27b   : > { %9030 = vst [vmem:[#allocation20_spill] sm:$0xff] %v7269_v57 }
 0x27c   : > { %v2509_v53 = vadd.f32 %v7184_v52, %v2469_v5  ;;  %5920 = vmatmul.msk.bf16.gmra.mxu1 %vm2794_vm4, %v2968_v37  ;;  %v1805_v5 = vpack.c.bf16 %v1784_v12, %v1783_v29 }
 0x27e   : > { %v2545_v56 = vmax.f32 %v2509_v53, 0.0  ;;  %v1973_v53 = vadd.f32 %v7120_v22, %v6630_v13 }
 0x280   : > { %v2761_v1 = vmul.f32 %v7254_v3, %v2545_v56  ;;  %v7260_v36 = vpop.f32.mrf.mxu2  ;;  %v2222_v6 = vadd.f32 %v7124_v23, %v1973_v53  ;;  %v1974_v23 = vadd.f32 %v7147_v25, %v9031_v4  ;;  %v2034_v53 = vld [vmem:[%s6207_s10 + $0x115] sm:$0xff] }
 0x281   : > { %v7262_v9 = vpop.f32.mrf.mxu3  ;;  %v2386_v35 = vpop.f32.mrf.mxu0  ;;  %v2935_v29 = vld [vmem:[#allocation2 + $0x21] sm:$0xff] }
 0x282   : > { %2842 = vst.msk [vmem:[#allocation2 + $0x2b] sm:$0xff] %vm2794_vm4, %v2761_v1  ;;  %v2470_v37 = vadd.f32 %v2386_v35, %v2221_v59  ;;  %v2275_v1 = vld [vmem:[%s6207_s10 + $0xd6] sm:$0xff] }
 0x284   : > { %v2510_v48 = vadd.f32 %v7184_v52, %v2470_v37  ;;  %5910 = vmatmul.msk.bf16.gmra.mxu0 %vm442_vm2, %v2299_v43  ;;  %v2276_v43 = vld [vmem:[%s6207_s10 + $0xde] sm:$0xff] }
 0x285   : > { %5876 = vmatmul.msk.bf16.gmra.mxu2 %vm442_vm2, %v1805_v5  ;;  %v1785_v5 = vld [vmem:[%s6207_s10 + $0x114] sm:$0xff]  ;;  %v1786_v37 = vld [vmem:[%s6207_s10 + $0x11c] sm:$0xff]  ;;  %v2300_v25 = vpack.c.bf16 %v2276_v43, %v2275_v1 }
 0x286   : > { %v2546_v54 = vmax.f32 %v2510_v48, 0.0  ;;  %5895 = vmatmul.msk.bf16.gmra.mxu3 %vm442_vm2, %v2054_v15  ;;  %v7288_v15 = vpop.permute.xlu2 %2605 }
 0x287   : > { %9032 = vst [vmem:[#allocation4_spill] sm:$0xff] %v7288_v15 }
 0x288   : > { %v2762_v50 = vmul.f32 %v7269_v57, %v2546_v54  ;;  %v7275_v13 = vpop.f32.mrf.mxu2  ;;  %v2035_v54 = vld [vmem:[%s6207_s10 + $0x11d] sm:$0xff] }
 0x289   : > { %v7277_v22 = vpop.f32.mrf.mxu3  ;;  %v2388_v56 = vpop.f32.mrf.mxu0  ;;  %v2936_v12 = vld [vmem:[#allocation2 + $0x29] sm:$0xff]  ;;  %v2055_v4 = vpack.c.bf16 %v2035_v54, %v2034_v53 }
 0x28a   : > { %2843 = vst.msk [vmem:[#allocation2 + $0x33] sm:$0xff] %vm2794_vm4, %v2762_v50  ;;  %v2471_v48 = vadd.f32 %v2388_v56, %v2222_v6  ;;  %v2969_v31 = vpack.c.bf16 %v2936_v12, %v2935_v29  ;;  %v2223_v50 = vadd.f32 %v7151_v10, %v1974_v23  ;;  %v7305_v23 = vpop.permute.xlu0 %2610 }
 0x28c   : > { %v2511_v59 = vadd.f32 %v7184_v52, %v2471_v48  ;;  %5921 = vmatmul.msk.bf16.gmra.mxu1 %vm2794_vm4, %v2969_v31  ;;  %v1806_v48 = vpack.c.bf16 %v1786_v37, %v1785_v5 }
 0x28e   : > { %v2547_v35 = vmax.f32 %v2511_v59, 0.0  ;;  %v9033_v59 = vld [vmem:[#allocation5_spill] sm:$0xff] }
 0x28f   : > { %v1975_v57 = vadd.f32 %v7179_v0, %v9033_v59  ;;  %9034 = vst [vmem:[#allocation5_spill] sm:$0xff] %v7305_v23  ;;  %v7323_v59 = vpop.permute.xlu1 %2615 }
 0x290   : > { %v2763_v6 = vmul.f32 %v7288_v15, %v2547_v35  ;;  %v7294_v56 = vpop.f32.mrf.mxu2 }
 0x291   : > { %v7296_v29 = vpop.f32.mrf.mxu3  ;;  %v2391_v12 = vpop.f32.mrf.mxu0  ;;  %v2224_v1 = vadd.f32 %v7188_v24, %v1975_v57  ;;  %v2937_v37 = vld [vmem:[#allocation2 + $0x31] sm:$0xff] }
 0x292   : > { %2844 = vst.msk [vmem:[#allocation2 + $0x3b] sm:$0xff] %vm2794_vm4, %v2763_v6  ;;  %v2472_v31 = vadd.f32 %v2391_v12, %v2223_v50  ;;  %v9035_v50 = vld [vmem:[#allocation6_spill] sm:$0xff]  ;;  %v2277_v6 = vld [vmem:[%s6207_s10 + $0xe6] sm:$0xff] }
 0x293   : > { %v1976_v24 = vadd.f32 %v7208_v41, %v9035_v50  ;;  %9036 = vst [vmem:[#allocation6_spill] sm:$0xff] %v7323_v59  ;;  %v5955_v41 = vld [vmem:[%s8978_s3 + $0x10] sm:$0xff] }
 0x294   : > { %v2512_v3 = vadd.f32 %v7184_v52, %v2472_v31  ;;  %5911 = vmatmul.msk.bf16.gmra.mxu0 %vm442_vm2, %v2300_v25  ;;  %v2278_v25 = vld [vmem:[%s6207_s10 + $0xee] sm:$0xff] }
 0x295   : > { %5877 = vmatmul.msk.bf16.gmra.mxu2 %vm442_vm2, %v1806_v48  ;;  %v1787_v48 = vld [vmem:[%s6207_s10 + $0x124] sm:$0xff]  ;;  %v1788_v31 = vld [vmem:[%s6207_s10 + $0x12c] sm:$0xff] }
 0x296   : > { %v2548_v10 = vmax.f32 %v2512_v3, 0.0  ;;  %5896 = vmatmul.msk.bf16.gmra.mxu3 %vm442_vm2, %v2055_v4  ;;  %v2036_v4 = vld [vmem:[%s6207_s10 + $0x125] sm:$0xff] }
 0x298   : > { %v2764_v43 = vmul.f32 %v7305_v23, %v2548_v10  ;;  %v7309_v0 = vpop.f32.mrf.mxu2  ;;  %v2225_v10 = vadd.f32 %v7210_v34, %v1976_v24  ;;  %v1807_v34 = vpack.c.bf16 %v1788_v31, %v1787_v48  ;;  %v7347_v48 = vpop.permute.xlu2 %2620 }
 0x299   : > { %v7311_v35 = vpop.f32.mrf.mxu3  ;;  %v2393_v5 = vpop.f32.mrf.mxu0  ;;  %v2938_v3 = vld [vmem:[#allocation2 + $0x39] sm:$0xff] }
 0x29a   : > { %2845 = vst.msk [vmem:[#allocation2 + $0x43] sm:$0xff] %vm2794_vm4, %v2764_v43  ;;  %v2473_v53 = vadd.f32 %v2393_v5, %v2224_v1  ;;  %v2970_v54 = vpack.c.bf16 %v2938_v3, %v2937_v37  ;;  %v2037_v43 = vld [vmem:[%s6207_s10 + $0x12d] sm:$0xff]  ;;  %v2929_v1 = vld [vmem:[%s8978_s3] sm:$0xff]  ;;  %v2301_v3 = vpack.c.bf16 %v2278_v25, %v2277_v6 }
 0x29b   : > { %v2056_v23 = vpack.c.bf16 %v2037_v43, %v2036_v4 }
 0x29c   : > { %v2513_v57 = vadd.f32 %v7184_v52, %v2473_v53  ;;  %5922 = vmatmul.msk.bf16.gmra.mxu1 %vm2794_vm4, %v2970_v54  ;;  %v2930_v53 = vpack.c.bf16 %v2929_v1, %v2929_v1  ;;  %v3357_v54 = vpack.c.bf16 %v5955_v41, %v5955_v41 }
 0x29e   : > { %v2549_v12 = vmax.f32 %v2513_v57, 0.0  ;;  %v3200_v15 = vsel %vm3042_vm3, %v2930_v53, 0  ;;  %v3413_v44 = vsel %vm3042_vm3, %v3357_v54, 0  ;;  %v2280_v53 = vld [vmem:[%s6207_s10 + $0xfe] sm:$0xff] }
 0x29f   : > { %3209 = vmatpush.bf16.msrb.mxu2 %v3200_v15  ;;  %3422 = vmatpush.bf16.msrb.mxu3 %v3413_v44 }
 0x2a0   : > { %v2765_v5 = vmul.f32 %v7323_v59, %v2549_v12  ;;  %v7334_v37 = vpop.f32.mrf.mxu2  ;;  %v9037_v12 = vld [vmem:[#allocation7_spill] sm:$0xff] }
 0x2a1   : > { %v7336_v50 = vpop.f32.mrf.mxu3  ;;  %v2396_v57 = vpop.f32.mrf.mxu0  ;;  %v1977_v59 = vadd.f32 %v7226_v32, %v9037_v12 }
 0x2a2   : > { %2846 = vst.msk [vmem:[#allocation2 + $0x4b] sm:$0xff] %vm2794_vm4, %v2765_v5  ;;  %v2474_v24 = vadd.f32 %v2396_v57, %v2225_v10  ;;  %v2939_v10 = vld [vmem:[#allocation2 + $0x41] sm:$0xff]  ;;  %v1789_v57 = vld [vmem:[%s6207_s10 + $0x134] sm:$0xff]  ;;  %v7368_v12 = vpop.permute.xlu0 %2625 }
 0x2a3   : > { %v2226_v31 = vadd.f32 %v7228_v17, %v1977_v59  ;;  %v5974_v17 = vld [vmem:[%s8978_s3 + $0x18] sm:$0xff]  ;;  %v1978_v59 = vadd.f32 %v7241_v58, %v6708_v18 }
 0x2a4   : > { %v2514_v6 = vadd.f32 %v7184_v52, %v2474_v24  ;;  %5912 = vmatmul.msk.bf16.gmra.mxu0 %vm442_vm2, %v2301_v3  ;;  %v3606_v5 = vpack.c.bf16 %v5974_v17, %v5974_v17  ;;  %v2279_v3 = vld [vmem:[%s6207_s10 + $0xf6] sm:$0xff]  ;;  %v5993_v17 = vld [vmem:[%s8978_s3 + $0x20] sm:$0xff] }
 0x2a5   : > { %5878 = vmatmul.msk.bf16.gmra.mxu2 %vm442_vm2, %v1807_v34  ;;  %v1790_v34 = vld [vmem:[%s6207_s10 + $0x13c] sm:$0xff] }
 0x2a6   : > { %v2550_v25 = vmax.f32 %v2514_v6, 0.0  ;;  %5897 = vmatmul.msk.bf16.gmra.mxu3 %vm442_vm2, %v2056_v23  ;;  %v3662_v24 = vsel %vm3042_vm3, %v3606_v5, 0  ;;  %v2038_v6 = vld [vmem:[%s6207_s10 + $0x135] sm:$0xff] }
 0x2a7   : > { %3671 = vmatpush.bf16.msrb.mxu0 %v3662_v24 }
 0x2a8   : > { %v2766_v44 = vmul.f32 %v7347_v48, %v2550_v25  ;;  %v7351_v15 = vpop.f32.mrf.mxu2  ;;  %v2039_v25 = vld [vmem:[%s6207_s10 + $0x13d] sm:$0xff] }
 0x2a9   : > { %v7353_v32 = vpop.f32.mrf.mxu3  ;;  %v2398_v4 = vpop.f32.mrf.mxu0  ;;  %v2940_v43 = vld [vmem:[#allocation2 + $0x49] sm:$0xff] }
 0x2aa   : > { %2847 = vst.msk [vmem:[#allocation2 + $0x53] sm:$0xff] %vm2794_vm4, %v2766_v44  ;;  %v2475_v23 = vadd.f32 %v2398_v4, %v2226_v31  ;;  %v2971_v1 = vpack.c.bf16 %v2940_v43, %v2939_v10  ;;  %v2227_v31 = vadd.f32 %v7243_v51, %v1978_v59  ;;  %v2302_v44 = vpack.c.bf16 %v2280_v53, %v2279_v3  ;;  %v7389_v53 = vpop.permute.xlu1 %2630 }
 0x2ab   : > { %v1808_v43 = vpack.c.bf16 %v1790_v34, %v1789_v57  ;;  %v1979_v51 = vadd.f32 %v7260_v36, %v6724_v33 }
 0x2ac   : > { %v2515_v41 = vadd.f32 %v7184_v52, %v2475_v23  ;;  %5923 = vmatmul.msk.bf16.gmra.mxu1 %vm2794_vm4, %v2971_v1  ;;  %v2057_v1 = vpack.c.bf16 %v2039_v25, %v2038_v6 }
 0x2ae   : > { %v2551_v54 = vmax.f32 %v2515_v41, 0.0  ;;  %v3855_v41 = vpack.c.bf16 %v5993_v17, %v5993_v17  ;;  %v7404_v17 = vpop.permute.xlu2 %2635 }
 0x2b0   : > { %v2767_v18 = vmul.f32 %v7368_v12, %v2551_v54  ;;  %v7374_v58 = vpop.f32.mrf.mxu2  ;;  %v3911_v5 = vsel %vm3042_vm3, %v3855_v41, 0  ;;  %v2228_v54 = vadd.f32 %v7262_v9, %v1979_v51  ;;  %v2281_v9 = vld [vmem:[%s6207_s10 + $0x106] sm:$0xff] }
 0x2b1   : > { %v7376_v4 = vpop.f32.mrf.mxu3  ;;  %v2401_v10 = vpop.f32.mrf.mxu0  ;;  %3920 = vmatpush.bf16.msrb.mxu1 %v3911_v5  ;;  %v2941_v24 = vld [vmem:[#allocation2 + $0x51] sm:$0xff]  ;;  %v3301_v41 = vld [vmem:[#allocation2 + $0x2] sm:$0xff] }
 0x2b2   : > { %2848 = vst.msk [vmem:[#allocation2 + $0x5b] sm:$0xff] %vm2794_vm4, %v2767_v18  ;;  %v2476_v23 = vadd.f32 %v2401_v10, %v2227_v31  ;;  %v1980_v18 = vadd.f32 %v7275_v13, %v6742_v21  ;;  %v2282_v10 = vld [vmem:[%s6207_s10 + $0x10e] sm:$0xff] }
 0x2b3   : > { %v3302_v51 = vld [vmem:[#allocation2 + $0xa] sm:$0xff]  ;;  %v2303_v21 = vpack.c.bf16 %v2282_v10, %v2281_v9 }
 0x2b4   : > { %v2516_v59 = vadd.f32 %v7184_v52, %v2476_v23  ;;  %5913 = vmatmul.msk.bf16.gmra.mxu0 %vm442_vm2, %v2302_v44  ;;  %v2875_v23 = vld [vmem:[#allocation2] sm:$0xff] }
 0x2b5   : > { %5879 = vmatmul.msk.bf16.gmra.mxu2 %vm442_vm2, %v1808_v43 }
 0x2b6   : > { %v2552_v3 = vmax.f32 %v2516_v59, 0.0  ;;  %5898 = vmatmul.msk.bf16.gmra.mxu3 %vm442_vm2, %v2057_v1  ;;  %v2876_v1 = vld [vmem:[#allocation2 + $0x8] sm:$0xff]  ;;  %v2229_v59 = vadd.f32 %v7277_v22, %v1980_v18  ;;  %v7420_v18 = vpop.permute.xlu0 %2640 }
 0x2b8   : > { %v2768_v33 = vmul.f32 %v7389_v53, %v2552_v3  ;;  %v7393_v36 = vpop.f32.mrf.mxu2 }
 0x2b9   : > { %v7395_v57 = vpop.f32.mrf.mxu3  ;;  %v2403_v34 = vpop.f32.mrf.mxu0  ;;  %v2942_v6 = vld [vmem:[#allocation2 + $0x59] sm:$0xff] }
 0x2ba   : > { %2849 = vst.msk [vmem:[#allocation2 + $0x63] sm:$0xff] %vm2794_vm4, %v2768_v33  ;;  %v2477_v25 = vadd.f32 %v2403_v34, %v2228_v54  ;;  %v2972_v31 = vpack.c.bf16 %v2942_v6, %v2941_v24  ;;  %v2911_v33 = vpack.c.bf16 %v2876_v1, %v2875_v23  ;;  %v1732_v34 = vadd.f32 %v6759_v26, %v6757_v14 }
 0x2bb   : > { %v3337_v6 = vpack.c.bf16 %v3302_v51, %v3301_v41  ;;  %v1982_v41 = vadd.f32 %v7309_v0, %v6779_v61  ;;  %v3304_v0 = vld [vmem:[#allocation2 + $0x1a] sm:$0xff] }
 0x2bc   : > { %v2517_v44 = vadd.f32 %v7184_v52, %v2477_v25  ;;  %5924 = vmatmul.msk.bf16.gmra.mxu1 %vm2794_vm4, %v2972_v31  ;;  %v1981_v25 = vadd.f32 %v7294_v56, %v1732_v34 }
 0x2be   : > { %v2553_v43 = vmax.f32 %v2517_v44, 0.0  ;;  %v2230_v14 = vadd.f32 %v7296_v29, %v1981_v25  ;;  %v2283_v29 = vld [vmem:[%s6207_s10 + $0x116] sm:$0xff] }
 0x2c0   : > { %v2769_v5 = vmul.f32 %v7404_v17, %v2553_v43  ;;  %v7408_v3 = vpop.f32.mrf.mxu2 }
 0x2c1   : > { %v7410_v13 = vpop.f32.mrf.mxu3  ;;  %v2406_v54 = vpop.f32.mrf.mxu0  ;;  %v2943_v10 = vld [vmem:[#allocation2 + $0x61] sm:$0xff] }
 0x2c2   : > { %2850 = vst.msk [vmem:[#allocation2 + $0x6b] sm:$0xff] %vm2794_vm4, %v2769_v5  ;;  %v2478_v24 = vadd.f32 %v2406_v54, %v2229_v59  ;;  %v2284_v59 = vld [vmem:[%s6207_s10 + $0x11e] sm:$0xff]  ;;  %v2231_v54 = vadd.f32 %v7311_v35, %v1982_v41 }
 0x2c4   : > { %v2518_v22 = vadd.f32 %v7184_v52, %v2478_v24  ;;  %5914 = vmatmul.msk.bf16.gmra.mxu0 %vm442_vm2, %v2303_v21  ;;  %v7435_v21 = vpop.permute.xlu1 %2645  ;;  %v2304_v24 = vpack.c.bf16 %v2284_v59, %v2283_v29 }
 0x2c5   : > { %5937 = vmatmul.msk.bf16.vlgmr.msrb.gmra.mxu2 %vm2794_vm4, %v2911_v33 }
 0x2c6   : > { %v2554_v31 = vmax.f32 %v2518_v22, 0.0  ;;  %5956 = vmatmul.msk.bf16.vlgmr.msrb.gmra.mxu3 %vm2794_vm4, %v3337_v6  ;;  %v2878_v6 = vld [vmem:[#allocation2 + $0x18] sm:$0xff]  ;;  %v1734_v22 = vadd.f32 %v6799_v55, %v6797_v49  ;;  %v7454_v49 = vpop.permute.xlu2 %2650 }
 0x2c8   : > { %v2770_v26 = vmul.f32 %v7420_v18, %v2554_v31  ;;  %v7424_v44 = vpop.f32.mrf.mxu2  ;;  %v1983_v35 = vadd.f32 %v7334_v37, %v1734_v22  ;;  %v7471_v22 = vpop.f32.mrf.mxu1 }
 0x2c9   : > { %v7426_v56 = vpop.f32.mrf.mxu3  ;;  %v2408_v9 = vpop.f32.mrf.mxu0  ;;  %v2944_v43 = vld [vmem:[#allocation2 + $0x69] sm:$0xff] }
 0x2ca   : > { %2851 = vst.msk [vmem:[#allocation2 + $0x73] sm:$0xff] %vm2794_vm4, %v2770_v26  ;;  %v2479_v23 = vadd.f32 %v2408_v9, %v2230_v14  ;;  %v2973_v1 = vpack.c.bf16 %v2944_v43, %v2943_v10  ;;  %v2877_v14 = vld [vmem:[#allocation2 + $0x10] sm:$0xff]  ;;  %v2232_v55 = vadd.f32 %v7336_v50, %v1983_v35  ;;  %v2285_v50 = vld [vmem:[%s6207_s10 + $0x126] sm:$0xff] }
 0x2cb   : > { %v2912_v26 = vpack.c.bf16 %v2878_v6, %v2877_v14  ;;  %v3303_v9 = vld [vmem:[#allocation2 + $0x12] sm:$0xff]  ;;  %v2880_v35 = vld [vmem:[#allocation2 + $0x28] sm:$0xff] }
 0x2cc   : > { %v2519_v51 = vadd.f32 %v7184_v52, %v2479_v23  ;;  %5925 = vmatmul.msk.bf16.gmra.mxu1 %vm2794_vm4, %v2973_v1  ;;  %v7449_v43 = vpack.c.bf16 %v3304_v0, %v3303_v9  ;;  %v2286_v6 = vld [vmem:[%s6207_s10 + $0x12e] sm:$0xff]  ;;  %v7469_v0 = vpop.permute.xlu0 %2655 }
 0x2cd   : > { %v2305_v9 = vpack.c.bf16 %v2286_v6, %v2285_v50 }
 0x2ce   : > { %v2555_v5 = vmax.f32 %v2519_v51, 0.0 }
 0x2d0   : > { %v2771_v33 = vmul.f32 %v7435_v21, %v2555_v5  ;;  %v7439_v34 = vpop.f32.mrf.mxu2 }
 0x2d1   : > { %v7441_v25 = vpop.f32.mrf.mxu3  ;;  %v2411_v61 = vpop.f32.mrf.mxu0  ;;  %v2945_v29 = vld [vmem:[#allocation2 + $0x71] sm:$0xff] }
 0x2d2   : > { %2852 = vst.msk [vmem:[#allocation2 + $0x7b] sm:$0xff] %vm2794_vm4, %v2771_v33  ;;  %v2480_v31 = vadd.f32 %v2411_v61, %v2231_v54  ;;  %v1984_v33 = vadd.f32 %v7351_v15, %v6822_v40 }
 0x2d4   : > { %v2520_v10 = vadd.f32 %v7184_v52, %v2480_v31  ;;  %5915 = vmatmul.msk.bf16.gmra.mxu0 %vm442_vm2, %v2304_v24  ;;  %v2233_v31 = vadd.f32 %v7353_v32, %v1984_v33  ;;  %v7494_v33 = vpop.f32.mrf.mxu1 }
 0x2d5   : > { %5938 = vmatmul.msk.bf16.gmra.mxu2 %vm2794_vm4, %v2912_v26 }
 0x2d6   : > { %v2556_v23 = vmax.f32 %v2520_v10, 0.0  ;;  %5957 = vmatmul.msk.bf16.gmra.mxu3 %vm2794_vm4, %v7449_v43  ;;  %v3306_v10 = vld [vmem:[#allocation2 + $0x2a] sm:$0xff] }
 0x2d8   : > { %v2772_v37 = vmul.f32 %v7454_v49, %v2556_v23  ;;  %v7458_v1 = vpop.f32.mrf.mxu2  ;;  %v1736_v23 = vadd.f32 %v6842_v2, %v6840_v47  ;;  %v7490_v47 = vpop.permute.xlu1 %2660 }
 0x2d9   : > { %v7460_v41 = vpop.f32.mrf.mxu3  ;;  %v2413_v51 = vpop.f32.mrf.mxu0  ;;  %v2946_v59 = vld [vmem:[#allocation2 + $0x79] sm:$0xff] }
 0x2da   : > { %2853 = vst.msk [vmem:[#allocation2 + $0x83] sm:$0xff] %vm2794_vm4, %v2772_v37  ;;  %v2481_v5 = vadd.f32 %v2413_v51, %v2232_v55  ;;  %v2974_v54 = vpack.c.bf16 %v2946_v59, %v2945_v29  ;;  %v2879_v37 = vld [vmem:[#allocation2 + $0x20] sm:$0xff]  ;;  %v1985_v32 = vadd.f32 %v7374_v58, %v1736_v23 }
 0x2db   : > { %v2913_v51 = vpack.c.bf16 %v2880_v35, %v2879_v37  ;;  %v3305_v29 = vld [vmem:[#allocation2 + $0x22] sm:$0xff]  ;;  %v1986_v35 = vadd.f32 %v7393_v36, %v6865_v11  ;;  %v3308_v36 = vld [vmem:[#allocation2 + $0x3a] sm:$0xff] }
 0x2dc   : > { %v2521_v24 = vadd.f32 %v7184_v52, %v2481_v5  ;;  %5926 = vmatmul.msk.bf16.gmra.mxu1 %vm2794_vm4, %v2974_v54  ;;  %v7485_v5 = vpack.c.bf16 %v3306_v10, %v3305_v29  ;;  %v2234_v2 = vadd.f32 %v7376_v4, %v1985_v32  ;;  %v2288_v10 = vld [vmem:[%s6207_s10 + $0x13e] sm:$0xff] }
 0x2dd   : > { %v2235_v37 = vadd.f32 %v7395_v57, %v1986_v35 }
 0x2de   : > { %v2557_v61 = vmax.f32 %v2521_v24, 0.0 }
 0x2e0   : > { %v2773_v14 = vmul.f32 %v7469_v0, %v2557_v61  ;;  %v7475_v26 = vpop.f32.mrf.mxu2 }
 0x2e1   : > { %v7477_v40 = vpop.f32.mrf.mxu3  ;;  %v2416_v15 = vpop.f32.mrf.mxu0  ;;  %v2947_v61 = vld [vmem:[#allocation2 + $0x81] sm:$0xff] }
 0x2e2   : > { %2854 = vst.msk [vmem:[#allocation2 + $0x8b] sm:$0xff] %vm2794_vm4, %v2773_v14  ;;  %v2482_v55 = vadd.f32 %v2416_v15, %v2233_v31  ;;  %v2287_v15 = vld [vmem:[%s6207_s10 + $0x136] sm:$0xff] }
 0x2e3   : > { %v2306_v32 = vpack.c.bf16 %v2288_v10, %v2287_v15 }
 0x2e4   : > { %v2522_v59 = vadd.f32 %v7184_v52, %v2482_v55  ;;  %5916 = vmatmul.msk.bf16.gmra.mxu0 %vm442_vm2, %v2305_v9  ;;  %v7507_v55 = vpop.permute.xlu2 %2665 }
 0x2e5   : > { %5939 = vmatmul.msk.bf16.gmra.mxu2 %vm2794_vm4, %v2913_v51 }
 0x2e6   : > { %v2558_v54 = vmax.f32 %v2522_v59, 0.0  ;;  %5958 = vmatmul.msk.bf16.gmra.mxu3 %vm2794_vm4, %v7485_v5  ;;  %v2882_v59 = vld [vmem:[#allocation2 + $0x38] sm:$0xff] }
 0x2e8   : > { %v2774_v58 = vmul.f32 %v7490_v47, %v2558_v54  ;;  %v7496_v24 = vpop.f32.mrf.mxu2 }
 0x2e9   : > { %v7498_v50 = vpop.f32.mrf.mxu3  ;;  %v2418_v6 = vpop.f32.mrf.mxu0  ;;  %v2948_v31 = vld [vmem:[#allocation2 + $0x89] sm:$0xff] }
 0x2ea   : > { %2855 = vst.msk [vmem:[#allocation2 + $0x93] sm:$0xff] %vm2794_vm4, %v2774_v58  ;;  %v2483_v14 = vadd.f32 %v2418_v6, %v2234_v2  ;;  %v2975_v9 = vpack.c.bf16 %v2948_v31, %v2947_v61  ;;  %v1738_v2 = vadd.f32 %v6885_v27, %v6883_v38  ;;  %v7518_v58 = vpop.f32.mrf.mxu1  ;;  %v2881_v61 = vld [vmem:[#allocation2 + $0x30] sm:$0xff]  ;;  %v7528_v38 = vpop.permute.xlu0 %2670 }
 0x2eb   : > { %v2914_v57 = vpack.c.bf16 %v2882_v59, %v2881_v61  ;;  %v3307_v31 = vld [vmem:[#allocation2 + $0x32] sm:$0xff]  ;;  %9038 = vst [vmem:[#allocation7_spill] sm:$0xff] %v7528_v38 }
 0x2ec   : > { %v2523_v4 = vadd.f32 %v7184_v52, %v2483_v14  ;;  %5927 = vmatmul.msk.bf16.gmra.mxu1 %vm2794_vm4, %v2975_v9  ;;  %v1987_v14 = vadd.f32 %v7408_v3, %v1738_v2  ;;  %v7523_v35 = vpack.c.bf16 %v3308_v36, %v3307_v31  ;;  %v1988_v36 = vadd.f32 %v7424_v44, %v6903_v46 }
 0x2ed   : > { %v1740_v46 = vadd.f32 %v6919_v8, %v6917_v62  ;;  %v7565_v8 = vpop.permute.xlu2 %2680 }
 0x2ee   : > { %v2559_v23 = vmax.f32 %v2523_v4, 0.0  ;;  %v2236_v27 = vadd.f32 %v7410_v13, %v1987_v14  ;;  %v2237_v61 = vadd.f32 %v7426_v56, %v1988_v36  ;;  %v2884_v14 = vld [vmem:[#allocation2 + $0x48] sm:$0xff]  ;;  %9040 = vst [vmem:[#allocation22_spill] sm:$0xff] %v7565_v8 }
 0x2ef   : > { %v3309_v56 = vld [vmem:[#allocation2 + $0x42] sm:$0xff] }
 0x2f0   : > { %v2775_v51 = vmul.f32 %v7507_v55, %v2559_v23  ;;  %v7511_v29 = vpop.f32.mrf.mxu2 }
 0x2f1   : > { %v7513_v54 = vpop.f32.mrf.mxu3  ;;  %v2421_v11 = vpop.f32.mrf.mxu0 }
 0x2f2   : > { %2856 = vst.msk [vmem:[#allocation2 + $0x9b] sm:$0xff] %vm2794_vm4, %v2775_v51  ;;  %v2484_v6 = vadd.f32 %v2421_v11, %v2235_v37  ;;  %v2949_v37 = vld [vmem:[#allocation2 + $0x91] sm:$0xff] }
 0x2f4   : > { %v2524_v9 = vadd.f32 %v7184_v52, %v2484_v6  ;;  %5917 = vmatmul.msk.bf16.gmra.mxu0 %vm442_vm2, %v2306_v32  ;;  %v7543_v6 = vpop.permute.xlu1 %2675 }
 0x2f5   : > { %5940 = vmatmul.msk.bf16.gmra.mxu2 %vm2794_vm4, %v2914_v57  ;;  %9039 = vst [vmem:[#allocation21_spill] sm:$0xff] %v7543_v6 }
 0x2f6   : > { %v2560_v4 = vmax.f32 %v2524_v9, 0.0  ;;  %5959 = vmatmul.msk.bf16.gmra.mxu3 %vm2794_vm4, %v7523_v35 }
 0x2f8   : > { %v2776_v15 = vmul.f32 %v7528_v38, %v2560_v4  ;;  %v7532_v10 = vpop.f32.mrf.mxu2 }
 0x2f9   : > { %v7534_v3 = vpop.f32.mrf.mxu3  ;;  %v2423_v23 = vpop.f32.mrf.mxu0  ;;  %v2950_v51 = vld [vmem:[#allocation2 + $0x99] sm:$0xff] }
 0x2fa   : > { %2857 = vst.msk [vmem:[#allocation2 + $0xa3] sm:$0xff] %vm2794_vm4, %v2776_v15  ;;  %v2485_v32 = vadd.f32 %v2423_v23, %v2236_v27  ;;  %v7537_v59 = vpop.f32.mrf.mxu1  ;;  %v2976_v11 = vpack.c.bf16 %v2950_v51, %v2949_v37  ;;  %v3310_v27 = vld [vmem:[#allocation2 + $0x4a] sm:$0xff]  ;;  %v2883_v23 = vld [vmem:[#allocation2 + $0x40] sm:$0xff]  ;;  %v1989_v51 = vadd.f32 %v7439_v34, %v1740_v46  ;;  %v1990_v46 = vadd.f32 %v7458_v1, %v6934_v16 }
 0x2fb   : > { %v2915_v37 = vpack.c.bf16 %v2884_v14, %v2883_v23  ;;  %v7580_v23 = vpop.permute.xlu0 %2685  ;;  %v1742_v16 = vadd.f32 %v6947_v39, %v6945_v60 }
 0x2fc   : > { %v2525_v13 = vadd.f32 %v7184_v52, %v2485_v32  ;;  %5928 = vmatmul.msk.bf16.gmra.mxu1 %vm2794_vm4, %v2976_v11  ;;  %v7558_v11 = vpack.c.bf16 %v3310_v27, %v3309_v56  ;;  %v2238_v36 = vadd.f32 %v7441_v25, %v1989_v51  ;;  %9041 = vst [vmem:[#allocation23_spill] sm:$0xff] %v7580_v23  ;;  %v7602_v39 = vpop.permute.xlu1 %2690 }
 0x2fd   : > { %9042 = vst [vmem:[#allocation24_spill] sm:$0xff] %v7602_v39 }
 0x2fe   : > { %v2561_v2 = vmax.f32 %v2525_v13, 0.0 }
 0x300   : > { %v2777_v57 = vmul.f32 %v7543_v6, %v2561_v2  ;;  %v7547_v31 = vpop.f32.mrf.mxu2  ;;  %v4304_v6 = vld [vmem:[#allocation2 + $0x5c] sm:$0xff] }
 0x301   : > { %v7549_v9 = vpop.f32.mrf.mxu3  ;;  %v2426_v4 = vpop.f32.mrf.mxu0 }
 0x302   : > { %2858 = vst.msk [vmem:[#allocation2 + $0xab] sm:$0xff] %vm2794_vm4, %v2777_v57  ;;  %v2486_v44 = vadd.f32 %v2426_v4, %v2237_v61  ;;  %v7554_v15 = vpop.f32.mrf.mxu1  ;;  %v2951_v57 = vld [vmem:[#allocation2 + $0xa1] sm:$0xff] }
 0x304   : > { %v2526_v32 = vadd.f32 %v7184_v52, %v2486_v44  ;;  %5975 = vmatmul.msk.bf16.vlgmr.msrb.gmra.mxu0 %vm2794_vm4, %v7449_v43 }
 0x305   : > { %5941 = vmatmul.msk.bf16.gmra.mxu2 %vm2794_vm4, %v2915_v37  ;;  %v2239_v37 = vadd.f32 %v7460_v41, %v1990_v46  ;;  %v3311_v41 = vld [vmem:[#allocation2 + $0x52] sm:$0xff] }
 0x306   : > { %v2562_v62 = vmax.f32 %v2526_v32, 0.0  ;;  %5960 = vmatmul.msk.bf16.gmra.mxu3 %vm2794_vm4, %v7558_v11  ;;  %v2886_v32 = vld [vmem:[#allocation2 + $0x58] sm:$0xff] }
 0x308   : > { %v2778_v13 = vmul.f32 %v7565_v8, %v2562_v62  ;;  %v7569_v34 = vpop.f32.mrf.mxu2 }
 0x309   : > { %v7571_v2 = vpop.f32.mrf.mxu3  ;;  %v2428_v61 = vpop.f32.mrf.mxu0  ;;  %v2952_v14 = vld [vmem:[#allocation2 + $0xa9] sm:$0xff] }
 0x30a   : > { %2859 = vst.msk [vmem:[#allocation2 + $0xb3] sm:$0xff] %vm2794_vm4, %v2778_v13  ;;  %v2487_v43 = vadd.f32 %v2428_v61, %v2238_v36  ;;  %v7574_v4 = vpop.f32.mrf.mxu1  ;;  %v2977_v27 = vpack.c.bf16 %v2952_v14, %v2951_v57  ;;  %v3312_v13 = vld [vmem:[#allocation2 + $0x5a] sm:$0xff]  ;;  %v2885_v57 = vld [vmem:[#allocation2 + $0x50] sm:$0xff] }
 0x30b   : > { %v2916_v14 = vpack.c.bf16 %v2886_v32, %v2885_v57  ;;  %v7595_v46 = vpack.c.bf16 %v3312_v13, %v3311_v41 }
 0x30c   : > { %v2527_v25 = vadd.f32 %v7184_v52, %v2487_v43  ;;  %5929 = vmatmul.msk.bf16.gmra.mxu1 %vm2794_vm4, %v2977_v27  ;;  %v1991_v43 = vadd.f32 %v7475_v26, %v1742_v16 }
 0x30e   : > { %v2563_v44 = vmax.f32 %v2527_v25, 0.0  ;;  %v2240_v25 = vadd.f32 %v7477_v40, %v1991_v43 }
 0x310   : > { %v2779_v56 = vmul.f32 %v7580_v23, %v2563_v44  ;;  %v7584_v51 = vpop.f32.mrf.mxu2 }
 0x311   : > { %v7586_v62 = vpop.f32.mrf.mxu3  ;;  %v2431_v36 = vpop.f32.mrf.mxu0  ;;  %v2953_v32 = vld [vmem:[#allocation2 + $0xb1] sm:$0xff] }
 0x312   : > { %2860 = vst.msk [vmem:[#allocation2 + $0xbb] sm:$0xff] %vm2794_vm4, %v2779_v56  ;;  %v2488_v1 = vadd.f32 %v2431_v36, %v2239_v37  ;;  %v7591_v61 = vpop.f32.mrf.mxu1 }
 0x314   : > { %v2528_v27 = vadd.f32 %v7184_v52, %v2488_v1  ;;  %5976 = vmatmul.msk.bf16.gmra.mxu0 %vm2794_vm4, %v7485_v5  ;;  %v1992_v1 = vadd.f32 %v7496_v24, %v6962_v19  ;;  %v1744_v19 = vadd.f32 %v6975_v28, %v6973_v63  ;;  %v7639_v28 = vpop.permute.xlu0 %2700 }
 0x315   : > { %5942 = vmatmul.msk.bf16.gmra.mxu2 %vm2794_vm4, %v2916_v14  ;;  %v7617_v14 = vpop.permute.xlu2 %2695  ;;  %9044 = vst [vmem:[#allocation26_spill] sm:$0xff] %v7639_v28 }
 0x316   : > { %v2564_v60 = vmax.f32 %v2528_v27, 0.0  ;;  %5961 = vmatmul.msk.bf16.gmra.mxu3 %vm2794_vm4, %v7595_v46  ;;  %9043 = vst [vmem:[#allocation25_spill] sm:$0xff] %v7617_v14  ;;  %v2241_v41 = vadd.f32 %v7498_v50, %v1992_v1  ;;  %v3313_v50 = vld [vmem:[#allocation2 + $0x62] sm:$0xff] }
 0x318   : > { %v2780_v44 = vmul.f32 %v7602_v39, %v2564_v60  ;;  %v7606_v26 = vpop.f32.mrf.mxu2  ;;  %v2888_v60 = vld [vmem:[#allocation2 + $0x68] sm:$0xff]  ;;  %v4048_v39 = vld [vmem:[#allocation2 + $0x14] sm:$0xff] }
 0x319   : > { %v7608_v37 = vpop.f32.mrf.mxu3  ;;  %v2433_v56 = vpop.f32.mrf.mxu0  ;;  %v2954_v36 = vld [vmem:[#allocation2 + $0xb9] sm:$0xff] }
 0x31a   : > { %2861 = vst.msk [vmem:[#allocation2 + $0xc3] sm:$0xff] %vm2794_vm4, %v2780_v44  ;;  %v2489_v5 = vadd.f32 %v2433_v56, %v2240_v25  ;;  %v7611_v13 = vpop.f32.mrf.mxu1  ;;  %v2978_v16 = vpack.c.bf16 %v2954_v36, %v2953_v32  ;;  %v3314_v56 = vld [vmem:[#allocation2 + $0x6a] sm:$0xff]  ;;  %v2887_v36 = vld [vmem:[#allocation2 + $0x60] sm:$0xff] }
 0x31c   : > { %v2529_v40 = vadd.f32 %v7184_v52, %v2489_v5  ;;  %5930 = vmatmul.msk.bf16.gmra.mxu1 %vm2794_vm4, %v2978_v16  ;;  %v2917_v5 = vpack.c.bf16 %v2888_v60, %v2887_v36  ;;  %v1993_v16 = vadd.f32 %v7511_v29, %v1744_v19  ;;  %v1994_v36 = vadd.f32 %v7532_v10, %v6990_v20 }
 0x31d   : > { %v1746_v20 = vadd.f32 %v7000_v7, %v6998_v42  ;;  %v7681_v7 = vpop.permute.xlu2 %2710 }
 0x31e   : > { %v2565_v57 = vmax.f32 %v2529_v40, 0.0  ;;  %v7632_v40 = vpack.c.bf16 %v3314_v56, %v3313_v50  ;;  %v7654_v50 = vpop.permute.xlu1 %2705  ;;  %9046 = vst [vmem:[#allocation28_spill] sm:$0xff] %v7681_v7 }
 0x31f   : > { %9045 = vst [vmem:[#allocation27_spill] sm:$0xff] %v7654_v50 }
 0x320   : > { %v2781_v43 = vmul.f32 %v7617_v14, %v2565_v57  ;;  %v7621_v27 = vpop.f32.mrf.mxu2  ;;  %v2242_v57 = vadd.f32 %v7513_v54, %v1993_v16  ;;  %v2243_v16 = vadd.f32 %v7534_v3, %v1994_v36  ;;  %v3315_v3 = vld [vmem:[#allocation2 + $0x72] sm:$0xff]  ;;  %v7671_v36 = vld [vmem:[%s8977_s2] ss:$0 sm:$0xff] }
 0x321   : > { %v7623_v25 = vpop.f32.mrf.mxu3  ;;  %v2436_v44 = vpop.f32.mrf.mxu0 }
 0x322   : > { %2862 = vst.msk [vmem:[#allocation2 + $0xcb] sm:$0xff] %vm2794_vm4, %v2781_v43  ;;  %v2490_v24 = vadd.f32 %v2436_v44, %v2241_v41  ;;  %v7628_v32 = vpop.f32.mrf.mxu1  ;;  %v2955_v44 = vld [vmem:[#allocation2 + $0xc1] sm:$0xff] }
 0x324   : > { %v2530_v1 = vadd.f32 %v7184_v52, %v2490_v24  ;;  %5977 = vmatmul.msk.bf16.gmra.mxu0 %vm2794_vm4, %v7523_v35 }
 0x325   : > { %5943 = vmatmul.msk.bf16.gmra.mxu2 %vm2794_vm4, %v2917_v5 }
 0x326   : > { %v2566_v63 = vmax.f32 %v2530_v1, 0.0  ;;  %5962 = vmatmul.msk.bf16.gmra.mxu3 %vm2794_vm4, %v7632_v40 }
 0x328   : > { %v2782_v41 = vmul.f32 %v7639_v28, %v2566_v63  ;;  %v7643_v29 = vpop.f32.mrf.mxu2 }
 0x329   : > { %v7645_v43 = vpop.f32.mrf.mxu3  ;;  %v2438_v60 = vpop.f32.mrf.mxu0  ;;  %v2956_v56 = vld [vmem:[#allocation2 + $0xc9] sm:$0xff] }
 0x32a   : > { %2863 = vst.msk [vmem:[#allocation2 + $0xd3] sm:$0xff] %vm2794_vm4, %v2782_v41  ;;  %v2491_v35 = vadd.f32 %v2438_v60, %v2242_v57  ;;  %v7648_v19 = vpop.f32.mrf.mxu1  ;;  %v2979_v24 = vpack.c.bf16 %v2956_v56, %v2955_v44  ;;  %v2890_v57 = vld [vmem:[#allocation2 + $0x78] sm:$0xff]  ;;  %v2889_v56 = vld [vmem:[#allocation2 + $0x70] sm:$0xff] }
 0x32b   : > { %v3316_v44 = vld [vmem:[#allocation2 + $0x7a] sm:$0xff] }
 0x32c   : > { %v2531_v54 = vadd.f32 %v7184_v52, %v2491_v35  ;;  %5931 = vmatmul.msk.bf16.gmra.mxu1 %vm2794_vm4, %v2979_v24  ;;  %v2918_v35 = vpack.c.bf16 %v2890_v57, %v2889_v56  ;;  %v1995_v24 = vadd.f32 %v7547_v31, %v1746_v20 }
 0x32e   : > { %v2567_v5 = vmax.f32 %v2531_v54, 0.0  ;;  %v2244_v31 = vadd.f32 %v7549_v9, %v1995_v24  ;;  %v7696_v24 = vpop.permute.xlu0 %2715 }
 0x32f   : > { %9047 = vst [vmem:[#allocation29_spill] sm:$0xff] %v7696_v24 }
 0x330   : > { %v2783_v1 = vmul.f32 %v7654_v50, %v2567_v5  ;;  %v7658_v63 = vpop.f32.mrf.mxu2  ;;  %v7674_v5 = vpack.c.bf16 %v3316_v44, %v3315_v3 }
 0x331   : > { %v7660_v41 = vpop.f32.mrf.mxu3  ;;  %v2441_v60 = vpop.f32.mrf.mxu0  ;;  %v2957_v44 = vld [vmem:[#allocation2 + $0xd1] sm:$0xff] }
 0x332   : > { %2864 = vst.msk [vmem:[#allocation2 + $0xdb] sm:$0xff] %vm2794_vm4, %v2783_v1  ;;  %v2492_v52 = vadd.f32 %v2441_v60, %v2243_v16  ;;  %v7665_v10 = vpop.f32.mrf.mxu1 }
 0x334   : > { %v2532_v54 = vadd.f32 %v7671_v36, %v2492_v52  ;;  %5978 = vmatmul.msk.bf16.gmra.mxu0 %vm2794_vm4, %v7558_v11 }
 0x335   : > { %5944 = vmatmul.msk.bf16.gmra.mxu2 %vm2794_vm4, %v2918_v35  ;;  %v1996_v35 = vadd.f32 %v7569_v34, %v7012_v45  ;;  %v9048_v45 = vld [vmem:[#allocation8_spill] sm:$0xff] }
 0x336   : > { %v2568_v42 = vmax.f32 %v2532_v54, 0.0  ;;  %5963 = vmatmul.msk.bf16.gmra.mxu3 %vm2794_vm4, %v7674_v5  ;;  %v1748_v34 = vadd.f32 %v9048_v45, %v7023_v30 }
 0x337   : > { %v2245_v54 = vadd.f32 %v7571_v2, %v1996_v35  ;;  %v3317_v2 = vld [vmem:[#allocation2 + $0x82] sm:$0xff] }
 0x338   : > { %v2784_v16 = vmul.f32 %v7681_v7, %v2568_v42  ;;  %v7685_v1 = vpop.f32.mrf.mxu2  ;;  %v1997_v35 = vadd.f32 %v7584_v51, %v1748_v34 }
 0x339   : > { %v7687_v57 = vpop.f32.mrf.mxu3  ;;  %v2443_v60 = vpop.f32.mrf.mxu0  ;;  %v2958_v20 = vld [vmem:[#allocation2 + $0xd9] sm:$0xff] }
 0x33a   : > { %2865 = vst.msk [vmem:[#allocation2 + $0xe3] sm:$0xff] %vm2794_vm4, %v2784_v16  ;;  %v2493_v11 = vadd.f32 %v2443_v60, %v2244_v31  ;;  %v7690_v52 = vpop.f32.mrf.mxu1  ;;  %v2980_v56 = vpack.c.bf16 %v2958_v20, %v2957_v44  ;;  %v2892_v31 = vld [vmem:[#allocation2 + $0x88] sm:$0xff] }
 0x33b   : > { %v3318_v44 = vld [vmem:[#allocation2 + $0x8a] sm:$0xff] }
 0x33c   : > { %v2533_v9 = vadd.f32 %v7671_v36, %v2493_v11  ;;  %5932 = vmatmul.msk.bf16.gmra.mxu1 %vm2794_vm4, %v2980_v56  ;;  %v2891_v56 = vld [vmem:[#allocation2 + $0x80] sm:$0xff] }
 0x33e   : > { %v2569_v3 = vmax.f32 %v2533_v9, 0.0  ;;  %v2919_v9 = vpack.c.bf16 %v2892_v31, %v2891_v56 }
 0x340   : > { %v2785_v42 = vmul.f32 %v7696_v24, %v2569_v3  ;;  %v7700_v7 = vpop.f32.mrf.mxu2  ;;  %v7711_v24 = vpack.c.bf16 %v3318_v44, %v3317_v2 }
 0x341   : > { %v7702_v16 = vpop.f32.mrf.mxu3  ;;  %v2446_v60 = vpop.f32.mrf.mxu0  ;;  %v2959_v34 = vld [vmem:[#allocation2 + $0xe1] sm:$0xff] }
 0x342   : > { %2866 = vst.msk [vmem:[#allocation2 + $0xeb] sm:$0xff] %vm2794_vm4, %v2785_v42  ;;  %v2494_v20 = vadd.f32 %v2446_v60, %v2245_v54  ;;  %v7707_v11 = vpop.f32.mrf.mxu1  ;;  %v7718_v54 = vpop.permute.xlu1 %2720  ;;  %v2246_v42 = vadd.f32 %v7586_v62, %v1997_v35 }
 0x343   : > { %9049 = vst [vmem:[#allocation8_spill] sm:$0xff] %v7718_v54 }
 0x344   : > { %v2534_v3 = vadd.f32 %v7671_v36, %v2494_v20  ;;  %5979 = vmatmul.msk.bf16.gmra.mxu0 %vm2794_vm4, %v7595_v46 }
 0x345   : > { %5945 = vmatmul.msk.bf16.gmra.mxu2 %vm2794_vm4, %v2919_v9 }
 0x346   : > { %v2570_v30 = vmax.f32 %v2534_v3, 0.0  ;;  %5964 = vmatmul.msk.bf16.gmra.mxu3 %vm2794_vm4, %v7711_v24  ;;  %v9050_v3 = vld [vmem:[#allocation9_spill] sm:$0xff] }
 0x347   : > { %v1998_v62 = vadd.f32 %v7606_v26, %v9050_v3  ;;  %v9053_v26 = vld [vmem:[#allocation11_spill] sm:$0xff] }
 0x348   : > { %v2786_v31 = vmul.f32 %v7718_v54, %v2570_v30  ;;  %v3211_v51 = vpop.f32.mrf.mxu2  ;;  %v7732_v30 = vpop.permute.xlu2 %2725  ;;  %v9052_v54 = vld [vmem:[#allocation10_spill] sm:$0xff] }
 0x349   : > { %v3212_v60 = vadd.f32 %v3211_v51, %v7494_v33  ;;  %v3424_v44 = vpop.f32.mrf.mxu3  ;;  %v2448_v45 = vpop.f32.mrf.mxu0  ;;  %v2960_v20 = vld [vmem:[#allocation2 + $0xe9] sm:$0xff]  ;;  %9051 = vst [vmem:[#allocation9_spill] sm:$0xff] %v7732_v30  ;;  %v2247_v51 = vadd.f32 %v7608_v37, %v1998_v62  ;;  %v1750_v3 = vadd.f32 %v9053_v26, %v9052_v54  ;;  %v3319_v62 = vld [vmem:[#allocation2 + $0x92] sm:$0xff] }
 0x34a   : > { %2867 = vst.msk [vmem:[#allocation2 + $0xf3] sm:$0xff] %vm2794_vm4, %v2786_v31  ;;  %v2495_v46 = vadd.f32 %v2448_v45, %v2246_v42  ;;  %v7724_v56 = vpop.f32.mrf.mxu1  ;;  %v2981_v9 = vpack.c.bf16 %v2960_v20, %v2959_v34  ;;  %v2894_v45 = vld [vmem:[#allocation2 + $0x98] sm:$0xff] }
 0x34b   : > { %v7726_v2 = vadd.f32 %v3424_v44, %v3212_v60  ;;  %v3320_v20 = vld [vmem:[#allocation2 + $0x9a] sm:$0xff] }
 0x34c   : > { %v2535_v35 = vadd.f32 %v7671_v36, %v2495_v46  ;;  %5933 = vmatmul.msk.bf16.gmra.mxu1 %vm2794_vm4, %v2981_v9 }
 0x34e   : > { %v2571_v33 = vmax.f32 %v2535_v35, 0.0  ;;  %v2893_v35 = vld [vmem:[#allocation2 + $0x90] sm:$0xff] }
 0x34f   : > { %v2920_v37 = vpack.c.bf16 %v2894_v45, %v2893_v35 }
 0x350   : > { %v2787_v31 = vmul.f32 %v7732_v30, %v2571_v33  ;;  %v3213_v42 = vpop.f32.mrf.mxu2  ;;  %v1999_v33 = vadd.f32 %v7621_v27, %v1750_v3 }
 0x351   : > { %v3214_v34 = vadd.f32 %v3213_v42, %v7518_v58  ;;  %v3426_v60 = vpop.f32.mrf.mxu3  ;;  %v2451_v44 = vpop.f32.mrf.mxu0  ;;  %v7746_v42 = vpack.c.bf16 %v3320_v20, %v3319_v62  ;;  %v2961_v20 = vld [vmem:[#allocation2 + $0xf1] sm:$0xff] }
 0x352   : > { %2868 = vst.msk [vmem:[#allocation2 + $0xfb] sm:$0xff] %vm2794_vm4, %v2787_v31  ;;  %v2496_v46 = vadd.f32 %v2451_v44, %v2247_v51  ;;  %v7740_v9 = vpop.f32.mrf.mxu1  ;;  %v7753_v51 = vpop.permute.xlu0 %2730  ;;  %v2248_v31 = vadd.f32 %v7623_v25, %v1999_v33 }
 0x353   : > { %v7742_v50 = vadd.f32 %v3426_v60, %v3214_v34  ;;  %9054 = vst [vmem:[#allocation10_spill] sm:$0xff] %v7753_v51  ;;  %v7767_v33 = vpop.permute.xlu1 %2735 }
 0x354   : > { %v2536_v58 = vadd.f32 %v7671_v36, %v2496_v46  ;;  %5980 = vmatmul.msk.bf16.gmra.mxu0 %vm2794_vm4, %v7632_v40  ;;  %9056 = vst [vmem:[#allocation11_spill] sm:$0xff] %v7767_v33 }
 0x355   : > { %5946 = vmatmul.msk.bf16.gmra.mxu2 %vm2794_vm4, %v2920_v37  ;;  %v9055_v37 = vld [vmem:[#allocation12_spill] sm:$0xff] }
 0x356   : > { %v2572_v54 = vmax.f32 %v2536_v58, 0.0  ;;  %5965 = vmatmul.msk.bf16.gmra.mxu3 %vm2794_vm4, %v7746_v42  ;;  %v2000_v25 = vadd.f32 %v7643_v29, %v9055_v37  ;;  %v9058_v29 = vld [vmem:[#allocation14_spill] sm:$0xff]  ;;  %v2895_v37 = vld [vmem:[#allocation2 + $0xa0] sm:$0xff] }
 0x358   : > { %v2788_v45 = vmul.f32 %v7753_v51, %v2572_v54  ;;  %v3216_v27 = vpop.f32.mrf.mxu2  ;;  %v2249_v58 = vadd.f32 %v7645_v43, %v2000_v25  ;;  %v3321_v25 = vld [vmem:[#allocation2 + $0xa2] sm:$0xff] }
 0x359   : > { %v3217_v34 = vadd.f32 %v3216_v27, %v7537_v59  ;;  %v3429_v60 = vpop.f32.mrf.mxu3  ;;  %v2453_v44 = vpop.f32.mrf.mxu0  ;;  %v2962_v26 = vld [vmem:[#allocation2 + $0xf9] sm:$0xff] }
 0x35a   : > { %2869 = vst.msk [vmem:[#allocation2 + $0x103] sm:$0xff] %vm2794_vm4, %v2788_v45  ;;  %v2497_v40 = vadd.f32 %v2453_v44, %v2248_v31  ;;  %v7759_v3 = vpop.f32.mrf.mxu1  ;;  %v2982_v46 = vpack.c.bf16 %v2962_v26, %v2961_v20  ;;  %v2896_v45 = vld [vmem:[#allocation2 + $0xa8] sm:$0xff] }
 0x35b   : > { %v7761_v35 = vadd.f32 %v3429_v60, %v3217_v34  ;;  %v3322_v44 = vld [vmem:[#allocation2 + $0xaa] sm:$0xff]  ;;  %v2921_v43 = vpack.c.bf16 %v2896_v45, %v2895_v37 }
 0x35c   : > { %v2537_v62 = vadd.f32 %v7671_v36, %v2497_v40  ;;  %5934 = vmatmul.msk.bf16.gmra.mxu1 %vm2794_vm4, %v2982_v46  ;;  %v9057_v20 = vld [vmem:[#allocation13_spill] sm:$0xff] }
 0x35d   : > { %v1752_v26 = vadd.f32 %v9058_v29, %v9057_v20 }
 0x35e   : > { %v2573_v59 = vmax.f32 %v2537_v62, 0.0 }
 0x360   : > { %v2789_v54 = vmul.f32 %v7767_v33, %v2573_v59  ;;  %v3218_v31 = vpop.f32.mrf.mxu2  ;;  %v2001_v59 = vadd.f32 %v7658_v63, %v1752_v26 }
 0x361   : > { %v3219_v27 = vadd.f32 %v3218_v31, %v7554_v15  ;;  %v3431_v34 = vpop.f32.mrf.mxu3  ;;  %v2456_v60 = vpop.f32.mrf.mxu0  ;;  %v7781_v31 = vpack.c.bf16 %v3322_v44, %v3321_v25  ;;  %v2963_v20 = vld [vmem:[#allocation2 + $0x101] sm:$0xff] }
 0x362   : > { %2870 = vst.msk [vmem:[#allocation2 + $0x10b] sm:$0xff] %vm2794_vm4, %v2789_v54  ;;  %v2498_v40 = vadd.f32 %v2456_v60, %v2249_v58  ;;  %v7775_v46 = vpop.f32.mrf.mxu1  ;;  %v7788_v58 = vpop.permute.xlu2 %2740  ;;  %v2250_v45 = vadd.f32 %v7660_v41, %v2001_v59  ;;  %v3333_v51 = vld [vmem:[#allocation2 + $0x102] sm:$0xff] }
 0x363   : > { %v7777_v62 = vadd.f32 %v3431_v34, %v3219_v27  ;;  %9059 = vst [vmem:[#allocation12_spill] sm:$0xff] %v7788_v58  ;;  %v7802_v59 = vpop.permute.xlu0 %2745 }
 0x364   : > { %v2538_v15 = vadd.f32 %v7671_v36, %v2498_v40  ;;  %5981 = vmatmul.msk.bf16.gmra.mxu0 %vm2794_vm4, %v7674_v5  ;;  %9061 = vst [vmem:[#allocation13_spill] sm:$0xff] %v7802_v59 }
 0x365   : > { %5947 = vmatmul.msk.bf16.gmra.mxu2 %vm2794_vm4, %v2921_v43  ;;  %v9060_v43 = vld [vmem:[#allocation15_spill] sm:$0xff] }
 0x366   : > { %v2574_v54 = vmax.f32 %v2538_v15, 0.0  ;;  %5966 = vmatmul.msk.bf16.gmra.mxu3 %vm2794_vm4, %v7781_v31  ;;  %v2002_v41 = vadd.f32 %v7685_v1, %v9060_v43 }
 0x368   : > { %v2790_v27 = vmul.f32 %v7788_v58, %v2574_v54  ;;  %v3221_v63 = vpop.f32.mrf.mxu2  ;;  %v2251_v15 = vadd.f32 %v7687_v57, %v2002_v41  ;;  %v3323_v41 = vld [vmem:[#allocation2 + $0xb2] sm:$0xff] }
 0x369   : > { %v3222_v34 = vadd.f32 %v3221_v63, %v7574_v4  ;;  %v3434_v60 = vpop.f32.mrf.mxu3  ;;  %v2458_v44 = vpop.f32.mrf.mxu0  ;;  %v2964_v29 = vld [vmem:[#allocation2 + $0x109] sm:$0xff] }
 0x36a   : > { %2871 = vst.msk [vmem:[#allocation2 + $0x113] sm:$0xff] %vm2794_vm4, %v2790_v27  ;;  %v2499_v5 = vadd.f32 %v2458_v44, %v2250_v45  ;;  %v7794_v26 = vpop.f32.mrf.mxu1  ;;  %v2983_v40 = vpack.c.bf16 %v2964_v29, %v2963_v20  ;;  %v2898_v27 = vld [vmem:[#allocation2 + $0xb8] sm:$0xff]  ;;  %v9062_v20 = vld [vmem:[#allocation16_spill] sm:$0xff]  ;;  %v2905_v58 = vld [vmem:[#allocation2 + $0xf0] sm:$0xff] }
 0x36b   : > { %v7796_v37 = vadd.f32 %v3434_v60, %v3222_v34  ;;  %v3324_v44 = vld [vmem:[#allocation2 + $0xba] sm:$0xff]  ;;  %v1754_v1 = vadd.f32 %v7471_v22, %v9062_v20 }
 0x36c   : > { %v2539_v25 = vadd.f32 %v7671_v36, %v2499_v5  ;;  %5935 = vmatmul.msk.bf16.gmra.mxu1 %vm2794_vm4, %v2983_v40  ;;  %v2897_v40 = vld [vmem:[#allocation2 + $0xb0] sm:$0xff] }
 0x36d   : > { %v2922_v57 = vpack.c.bf16 %v2898_v27, %v2897_v40 }
 0x36e   : > { %v2575_v4 = vmax.f32 %v2539_v25, 0.0  ;;  %v2003_v25 = vadd.f32 %v7700_v7, %v1754_v1 }
 0x370   : > { %v2791_v54 = vmul.f32 %v7802_v59, %v2575_v4  ;;  %v3223_v45 = vpop.f32.mrf.mxu2  ;;  %v7816_v4 = vpack.c.bf16 %v3324_v44, %v3323_v41 }
 0x371   : > { %v3224_v63 = vadd.f32 %v3223_v45, %v7591_v61  ;;  %v3436_v34 = vpop.f32.mrf.mxu3  ;;  %v2461_v60 = vpop.f32.mrf.mxu0 }
 0x372   : > { %2872 = vst.msk [vmem:[#allocation2 + $0x11b] sm:$0xff] %vm2794_vm4, %v2791_v54  ;;  %v2500_v29 = vadd.f32 %v2461_v60, %v2251_v15  ;;  %v7810_v5 = vpop.f32.mrf.mxu1  ;;  %v7823_v15 = vpop.permute.xlu1 %2750  ;;  %v2252_v54 = vadd.f32 %v7702_v16, %v2003_v25  ;;  %v2965_v60 = vld [vmem:[#allocation2 + $0x111] sm:$0xff]  ;;  %v2900_v25 = vld [vmem:[#allocation2 + $0xc8] sm:$0xff] }
 0x373   : > { %v7812_v43 = vadd.f32 %v3436_v34, %v3224_v63  ;;  %9063 = vst [vmem:[#allocation14_spill] sm:$0xff] %v7823_v15 }
 0x374   : > { %v2540_v61 = vadd.f32 %v7671_v36, %v2500_v29  ;;  %5982 = vmatmul.msk.bf16.gmra.mxu0 %vm2794_vm4, %v7711_v24 }
 0x375   : > { %5948 = vmatmul.msk.bf16.gmra.mxu2 %vm2794_vm4, %v2922_v57  ;;  %v7835_v57 = vpop.permute.xlu2 %2755 }
 0x376   : > { %v2576_v22 = vmax.f32 %v2540_v61, 0.0  ;;  %5967 = vmatmul.msk.bf16.gmra.mxu3 %vm2794_vm4, %v7816_v4  ;;  %9064 = vst [vmem:[#allocation15_spill] sm:$0xff] %v7835_v57 }
 0x378   : > { %v2792_v45 = vmul.f32 %v7823_v15, %v2576_v22  ;;  %v3226_v7 = vpop.f32.mrf.mxu2  ;;  %v2903_v15 = vld [vmem:[#allocation2 + $0xe0] sm:$0xff] }
 0x379   : > { %v3227_v27 = vadd.f32 %v3226_v7, %v7611_v13  ;;  %v3439_v63 = vpop.f32.mrf.mxu3  ;;  %v2463_v34 = vpop.f32.mrf.mxu0  ;;  %v2966_v44 = vld [vmem:[#allocation2 + $0x119] sm:$0xff] }
 0x37a   : > { %2873 = vst.msk [vmem:[#allocation2 + $0x123] sm:$0xff] %vm2794_vm4, %v2792_v45  ;;  %v2501_v24 = vadd.f32 %v2463_v34, %v2252_v54  ;;  %v7829_v20 = vpop.f32.mrf.mxu1  ;;  %v2984_v1 = vpack.c.bf16 %v2966_v44, %v2965_v60  ;;  %v3326_v45 = vld [vmem:[#allocation2 + $0xca] sm:$0xff]  ;;  %v3325_v60 = vld [vmem:[#allocation2 + $0xc2] sm:$0xff] }
 0x37b   : > { %v7831_v29 = vadd.f32 %v3439_v63, %v3227_v27  ;;  %v2899_v27 = vld [vmem:[#allocation2 + $0xc0] sm:$0xff]  ;;  %v7847_v44 = vpack.c.bf16 %v3326_v45, %v3325_v60 }
 0x37c   : > { %v2541_v40 = vadd.f32 %v7671_v36, %v2501_v24  ;;  %5936 = vmatmul.msk.bf16.gmra.mxu1 %vm2794_vm4, %v2984_v1  ;;  %v2923_v34 = vpack.c.bf16 %v2900_v25, %v2899_v27 }
 0x37e   : > { %v2577_v16 = vmax.f32 %v2541_v40, 0.0 }
 0x380   : > { %v2793_v13 = vmul.f32 %v7835_v57, %v2577_v16  ;;  %v3228_v41 = vpop.f32.mrf.mxu2  ;;  %v3799_v16 = vld [vmem:[#allocation2 + $0x13] sm:$0xff] }
 0x381   : > { %v3229_v61 = vadd.f32 %v3228_v41, %v7628_v32  ;;  %v3441_v22 = vpop.f32.mrf.mxu3  ;;  %v3673_v54 = vpop.f32.mrf.mxu0  ;;  %v3800_v32 = vld [vmem:[#allocation2 + $0x1b] sm:$0xff] }
 0x382   : > { %2874 = vst.msk [vmem:[#allocation2 + $0x12b] sm:$0xff] %vm2794_vm4, %v2793_v13  ;;  %v7840_v7 = vpop.f32.mrf.mxu1  ;;  %v7843_v36 = vadd.f32 %v3673_v54, %v7726_v2  ;;  %v3835_v25 = vpack.c.bf16 %v3800_v32, %v3799_v16 }
 0x383   : > { %v7845_v63 = vadd.f32 %v3441_v22, %v3229_v61  ;;  %v2902_v22 = vld [vmem:[#allocation2 + $0xd8] sm:$0xff] }
 0x384   : > { %5983 = vmatmul.msk.bf16.gmra.mxu0 %vm2794_vm4, %v7746_v42 }
 0x385   : > { %5949 = vmatmul.msk.bf16.gmra.mxu2 %vm2794_vm4, %v2923_v34 }
 0x386   : > { %5968 = vmatmul.msk.bf16.gmra.mxu3 %vm2794_vm4, %v7847_v44 }
 0x388   : > { %v3231_v24 = vpop.f32.mrf.mxu2 }
 0x389   : > { %v3232_v2 = vadd.f32 %v3231_v24, %v7648_v19  ;;  %v3444_v1 = vpop.f32.mrf.mxu3  ;;  %v3675_v40 = vpop.f32.mrf.mxu0  ;;  %v3328_v19 = vld [vmem:[#allocation2 + $0xda] sm:$0xff]  ;;  %v2901_v24 = vld [vmem:[#allocation2 + $0xd0] sm:$0xff] }
 0x38a   : > { %v7855_v13 = vpop.f32.mrf.mxu1  ;;  %v7858_v41 = vadd.f32 %v3675_v40, %v7742_v50  ;;  %v2924_v32 = vpack.c.bf16 %v2902_v22, %v2901_v24 }
 0x38b   : > { %v7860_v61 = vadd.f32 %v3444_v1, %v3232_v2  ;;  %v3327_v2 = vld [vmem:[#allocation2 + $0xd2] sm:$0xff] }
 0x38c   : > { %5994 = vmatmul.msk.bf16.vlgmr.msrb.gmra.mxu1 %vm2794_vm4, %v3835_v25  ;;  %v7871_v1 = vpack.c.bf16 %v3328_v19, %v3327_v2  ;;  %v2904_v19 = vld [vmem:[#allocation2 + $0xe8] sm:$0xff] }
 0x390   : > { %v3233_v42 = vpop.f32.mrf.mxu2 }
 0x391   : > { %v3234_v54 = vadd.f32 %v3233_v42, %v7665_v10  ;;  %v3446_v45 = vpop.f32.mrf.mxu3  ;;  %v3678_v27 = vpop.f32.mrf.mxu0  ;;  %v3802_v10 = vld [vmem:[#allocation2 + $0x2b] sm:$0xff]  ;;  %v3801_v42 = vld [vmem:[#allocation2 + $0x23] sm:$0xff] }
 0x392   : > { %v7864_v34 = vpop.f32.mrf.mxu1  ;;  %v7867_v60 = vadd.f32 %v3678_v27, %v7761_v35 }
 0x393   : > { %v7869_v50 = vadd.f32 %v3446_v45, %v3234_v54  ;;  %v3836_v45 = vpack.c.bf16 %v3802_v10, %v3801_v42  ;;  %v2925_v10 = vpack.c.bf16 %v2904_v19, %v2903_v15 }
 0x394   : > { %5984 = vmatmul.msk.bf16.gmra.mxu0 %vm2794_vm4, %v7781_v31 }
 0x395   : > { %5950 = vmatmul.msk.bf16.gmra.mxu2 %vm2794_vm4, %v2924_v32 }
 0x396   : > { %5969 = vmatmul.msk.bf16.gmra.mxu3 %vm2794_vm4, %v7871_v1 }
 0x398   : > { %v3236_v40 = vpop.f32.mrf.mxu2 }
 0x399   : > { %v3237_v35 = vadd.f32 %v3236_v40, %v7690_v52  ;;  %v3449_v16 = vpop.f32.mrf.mxu3  ;;  %v3680_v25 = vpop.f32.mrf.mxu0  ;;  %v3330_v52 = vld [vmem:[#allocation2 + $0xea] sm:$0xff] }
 0x39a   : > { %v7879_v54 = vpop.f32.mrf.mxu1  ;;  %v7882_v22 = vadd.f32 %v3680_v25, %v7777_v62 }
 0x39b   : > { %v7884_v27 = vadd.f32 %v3449_v16, %v3237_v35  ;;  %v3329_v35 = vld [vmem:[#allocation2 + $0xe2] sm:$0xff] }
 0x39c   : > { %5995 = vmatmul.msk.bf16.gmra.mxu1 %vm2794_vm4, %v3836_v45  ;;  %v7895_v16 = vpack.c.bf16 %v3330_v52, %v3329_v35 }
 0x3a0   : > { %v3238_v31 = vpop.f32.mrf.mxu2 }
 0x3a1   : > { %v3239_v24 = vadd.f32 %v3238_v31, %v7707_v11  ;;  %v3451_v32 = vpop.f32.mrf.mxu3  ;;  %v3683_v2 = vpop.f32.mrf.mxu0  ;;  %v3804_v11 = vld [vmem:[#allocation2 + $0x3b] sm:$0xff]  ;;  %v3803_v31 = vld [vmem:[#allocation2 + $0x33] sm:$0xff] }
 0x3a2   : > { %v7888_v40 = vpop.f32.mrf.mxu1  ;;  %v7891_v57 = vadd.f32 %v3683_v2, %v7796_v37  ;;  %v3837_v19 = vpack.c.bf16 %v3804_v11, %v3803_v31  ;;  %v2906_v2 = vld [vmem:[#allocation2 + $0xf8] sm:$0xff] }
 0x3a3   : > { %v7893_v62 = vadd.f32 %v3451_v32, %v3239_v24  ;;  %v2926_v11 = vpack.c.bf16 %v2906_v2, %v2905_v58 }
 0x3a4   : > { %5985 = vmatmul.msk.bf16.gmra.mxu0 %vm2794_vm4, %v7816_v4 }
 0x3a5   : > { %5951 = vmatmul.msk.bf16.gmra.mxu2 %vm2794_vm4, %v2925_v10 }
 0x3a6   : > { %5970 = vmatmul.msk.bf16.gmra.mxu3 %vm2794_vm4, %v7895_v16 }
 0x3a8   : > { %v3241_v25 = vpop.f32.mrf.mxu2 }
 0x3a9   : > { %v3242_v37 = vadd.f32 %v3241_v25, %v7724_v56  ;;  %v3454_v42 = vpop.f32.mrf.mxu3  ;;  %v3685_v45 = vpop.f32.mrf.mxu0  ;;  %v3332_v56 = vld [vmem:[#allocation2 + $0xfa] sm:$0xff] }
 0x3aa   : > { %v7903_v24 = vpop.f32.mrf.mxu1  ;;  %v7906_v15 = vadd.f32 %v3685_v45, %v7812_v43 }
 0x3ab   : > { %v7908_v32 = vadd.f32 %v3454_v42, %v3242_v37  ;;  %v3331_v37 = vld [vmem:[#allocation2 + $0xf2] sm:$0xff] }
 0x3ac   : > { %5996 = vmatmul.msk.bf16.gmra.mxu1 %vm2794_vm4, %v3837_v19  ;;  %v7919_v42 = vpack.c.bf16 %v3332_v56, %v3331_v37  ;;  %v6031_v56 = vld [vmem:[%s8978_s3 + $0x30] sm:$0xff]  ;;  %v2908_v37 = vld [vmem:[#allocation2 + $0x108] sm:$0xff] }
 0x3b0   : > { %v3243_v4 = vpop.f32.mrf.mxu2 }
 0x3b1   : > { %v3244_v52 = vadd.f32 %v3243_v4, %v7740_v9  ;;  %v3456_v10 = vpop.f32.mrf.mxu3  ;;  %v3688_v35 = vpop.f32.mrf.mxu0  ;;  %v3806_v9 = vld [vmem:[#allocation2 + $0x4b] sm:$0xff]  ;;  %v3805_v4 = vld [vmem:[#allocation2 + $0x43] sm:$0xff] }
 0x3b2   : > { %v7912_v25 = vpop.f32.mrf.mxu1  ;;  %v7915_v59 = vadd.f32 %v3688_v35, %v7831_v29  ;;  %v3838_v2 = vpack.c.bf16 %v3806_v9, %v3805_v4 }
 0x3b3   : > { %v7917_v43 = vadd.f32 %v3456_v10, %v3244_v52 }
 0x3b4   : > { %5986 = vmatmul.msk.bf16.gmra.mxu0 %vm2794_vm4, %v7847_v44  ;;  %v6012_v44 = vld [vmem:[%s8978_s3 + $0x28] sm:$0xff] }
 0x3b5   : > { %5952 = vmatmul.msk.bf16.gmra.mxu2 %vm2794_vm4, %v2926_v11  ;;  %v4104_v35 = vpack.c.bf16 %v6012_v44, %v6012_v44 }
 0x3b6   : > { %5971 = vmatmul.msk.bf16.gmra.mxu3 %vm2794_vm4, %v7919_v42 }
 0x3b8   : > { %v3246_v45 = vpop.f32.mrf.mxu2 }
 0x3b9   : > { %v3247_v29 = vadd.f32 %v3246_v45, %v7759_v3  ;;  %v3459_v31 = vpop.f32.mrf.mxu3  ;;  %v3690_v19 = vpop.f32.mrf.mxu0  ;;  %v4160_v3 = vsel %vm3042_vm3, %v4104_v35, 0 }
 0x3ba   : > { %v7927_v52 = vpop.f32.mrf.mxu1  ;;  %v7930_v58 = vadd.f32 %v3690_v19, %v7845_v63  ;;  %4169 = vmatpush.bf16.msra.mxu2 %v4160_v3  ;;  %v4353_v63 = vpack.c.bf16 %v6031_v56, %v6031_v56 }
 0x3bb   : > { %v7932_v10 = vadd.f32 %v3459_v31, %v3247_v29  ;;  %v3334_v31 = vld [vmem:[#allocation2 + $0x10a] sm:$0xff] }
 0x3bc   : > { %5997 = vmatmul.msk.bf16.gmra.mxu1 %vm2794_vm4, %v3838_v2  ;;  %v2907_v2 = vld [vmem:[#allocation2 + $0x100] sm:$0xff]  ;;  %v4409_v44 = vsel %vm3042_vm3, %v4353_v63, 0  ;;  %v7951_v3 = vpack.c.bf16 %v3334_v31, %v3333_v51 }
 0x3bd   : > { %v2927_v33 = vpack.c.bf16 %v2908_v37, %v2907_v2  ;;  %4418 = vmatpush.bf16.msra.mxu3 %v4409_v44 }
 0x3c0   : > { %v3248_v11 = vpop.f32.mrf.mxu2 }
 0x3c1   : > { %v3249_v9 = vadd.f32 %v3248_v11, %v7775_v46  ;;  %v3461_v45 = vpop.f32.mrf.mxu3  ;;  %v3693_v29 = vpop.f32.mrf.mxu0  ;;  %v3808_v46 = vld [vmem:[#allocation2 + $0x5b] sm:$0xff] }
 0x3c2   : > { %v7943_v19 = vpop.f32.mrf.mxu1  ;;  %v7946_v4 = vadd.f32 %v3693_v29, %v7860_v61 }
 0x3c3   : > { %v7949_v35 = vadd.f32 %v3461_v45, %v3249_v9  ;;  %v3807_v9 = vld [vmem:[#allocation2 + $0x53] sm:$0xff] }
 0x3c4   : > { %5987 = vmatmul.msk.bf16.gmra.mxu0 %vm2794_vm4, %v7871_v1  ;;  %v3839_v45 = vpack.c.bf16 %v3808_v46, %v3807_v9  ;;  %v6069_v1 = vld [vmem:[%s8978_s3 + $0x40] sm:$0xff]  ;;  %v2910_v46 = vld [vmem:[#allocation2 + $0x118] sm:$0xff] }
 0x3c5   : > { %5953 = vmatmul.msk.bf16.gmra.mxu2 %vm2794_vm4, %v2927_v33  ;;  %v6050_v33 = vld [vmem:[%s8978_s3 + $0x38] sm:$0xff]  ;;  %v4851_v31 = vpack.c.bf16 %v6069_v1, %v6069_v1 }
 0x3c6   : > { %5972 = vmatmul.msk.bf16.gmra.mxu3 %vm2794_vm4, %v7951_v3 }
 0x3c8   : > { %v3251_v61 = vpop.f32.mrf.mxu2 }
 0x3c9   : > { %v3252_v56 = vadd.f32 %v3251_v61, %v7794_v26  ;;  %v3464_v11 = vpop.f32.mrf.mxu3  ;;  %v3695_v63 = vpop.f32.mrf.mxu0  ;;  %v4602_v26 = vpack.c.bf16 %v6050_v33, %v6050_v33 }
 0x3ca   : > { %v7959_v37 = vpop.f32.mrf.mxu1  ;;  %v7962_v51 = vadd.f32 %v3695_v63, %v7869_v50  ;;  %v4907_v50 = vsel %vm3042_vm3, %v4851_v31, 0  ;;  %v3336_v63 = vld [vmem:[#allocation2 + $0x11a] sm:$0xff] }
 0x3cb   : > { %v7964_v29 = vadd.f32 %v3464_v11, %v3252_v56  ;;  %v4658_v2 = vsel %vm3042_vm3, %v4602_v26, 0  ;;  %4916 = vmatpush.bf16.msra.mxu1 %v4907_v50  ;;  %v3335_v26 = vld [vmem:[#allocation2 + $0x112] sm:$0xff] }
 0x3cc   : > { %5998 = vmatmul.msk.bf16.gmra.mxu1 %vm2794_vm4, %v3839_v45  ;;  %4667 = vmatpush.bf16.msra.mxu0 %v4658_v2  ;;  %v2909_v45 = vld [vmem:[#allocation2 + $0x110] sm:$0xff]  ;;  %v7983_v31 = vpack.c.bf16 %v3336_v63, %v3335_v26 }
 0x3cd   : > { %v2928_v1 = vpack.c.bf16 %v2910_v46, %v2909_v45  ;;  %v4049_v45 = vld [vmem:[#allocation2 + $0x1c] sm:$0xff] }
 0x3d0   : > { %v3253_v44 = vpop.f32.mrf.mxu2 }
 0x3d1   : > { %v3254_v61 = vadd.f32 %v3253_v44, %v7810_v5  ;;  %v3466_v56 = vpop.f32.mrf.mxu3  ;;  %v3698_v11 = vpop.f32.mrf.mxu0  ;;  %v3810_v5 = vld [vmem:[#allocation2 + $0x6b] sm:$0xff] }
 0x3d2   : > { %v7976_v9 = vpop.f32.mrf.mxu1  ;;  %v7979_v30 = vadd.f32 %v3698_v11, %v7884_v27 }
 0x3d3   : > { %v7981_v33 = vadd.f32 %v3466_v56, %v3254_v61  ;;  %v3809_v61 = vld [vmem:[#allocation2 + $0x63] sm:$0xff] }
 0x3d4   : > { %5988 = vmatmul.msk.bf16.gmra.mxu0 %vm2794_vm4, %v7895_v16  ;;  %v3840_v11 = vpack.c.bf16 %v3810_v5, %v3809_v61  ;;  %v4084_v5 = vpack.c.bf16 %v4049_v45, %v4048_v39 }
 0x3d5   : > { %5954 = vmatmul.msk.bf16.gmra.mxu2 %vm2794_vm4, %v2928_v1 }
 0x3d6   : > { %5973 = vmatmul.msk.bf16.gmra.mxu3 %vm2794_vm4, %v7983_v31 }
 0x3d8   : > { %v3256_v2 = vpop.f32.mrf.mxu2 }
 0x3d9   : > { %v3257_v27 = vadd.f32 %v3256_v2, %v7829_v20  ;;  %v3469_v50 = vpop.f32.mrf.mxu3  ;;  %v3700_v44 = vpop.f32.mrf.mxu0  ;;  %v4298_v20 = vld [vmem:[#allocation2 + $0x2c] sm:$0xff] }
 0x3da   : > { %v7991_v56 = vpop.f32.mrf.mxu1  ;;  %v7994_v46 = vadd.f32 %v3700_v44, %v7893_v62 }
 0x3db   : > { %v7996_v63 = vadd.f32 %v3469_v50, %v3257_v27  ;;  %v4297_v27 = vld [vmem:[#allocation2 + $0x24] sm:$0xff] }
 0x3dc   : > { %5999 = vmatmul.msk.bf16.gmra.mxu1 %vm2794_vm4, %v3840_v11  ;;  %v4333_v50 = vpack.c.bf16 %v4298_v20, %v4297_v27  ;;  %v4300_v27 = vld [vmem:[#allocation2 + $0x3c] sm:$0xff] }
 0x3e0   : > { %v3258_v16 = vpop.f32.mrf.mxu2 }
 0x3e1   : > { %v3259_v1 = vadd.f32 %v3258_v16, %v7840_v7  ;;  %v3471_v26 = vpop.f32.mrf.mxu3  ;;  %v3703_v28 = vpop.f32.mrf.mxu0  ;;  %v3812_v7 = vld [vmem:[#allocation2 + $0x7b] sm:$0xff] }
 0x3e2   : > { %v8000_v2 = vpop.f32.mrf.mxu1  ;;  %v8003_v14 = vadd.f32 %v3703_v28, %v7908_v32  ;;  %v3811_v32 = vld [vmem:[#allocation2 + $0x73] sm:$0xff] }
 0x3e3   : > { %v8005_v62 = vadd.f32 %v3471_v26, %v3259_v1  ;;  %v3841_v45 = vpack.c.bf16 %v3812_v7, %v3811_v32 }
 0x3e4   : > { %5989 = vmatmul.msk.bf16.gmra.mxu0 %vm2794_vm4, %v7919_v42 }
 0x3e5   : > { %6013 = vmatmul.msk.bf16.vlgmr.msra.gmra.mxu2 %vm2794_vm4, %v4084_v5 }
 0x3e6   : > { %6032 = vmatmul.msk.bf16.vlgmr.msra.gmra.mxu3 %vm2794_vm4, %v4333_v50 }
 0x3e8   : > { %v3261_v44 = vpop.f32.mrf.mxu2 }
 0x3e9   : > { %v3262_v61 = vadd.f32 %v3261_v44, %v7855_v13  ;;  %v3474_v11 = vpop.f32.mrf.mxu3  ;;  %v3705_v28 = vpop.f32.mrf.mxu0 }
 0x3ea   : > { %v8012_v16 = vpop.f32.mrf.mxu1  ;;  %v8015_v39 = vadd.f32 %v3705_v28, %v7917_v43  ;;  %v4299_v43 = vld [vmem:[#allocation2 + $0x34] sm:$0xff] }
 0x3eb   : > { %v8017_v1 = vadd.f32 %v3474_v11, %v3262_v61  ;;  %v4334_v7 = vpack.c.bf16 %v4300_v27, %v4299_v43  ;;  %v4302_v43 = vld [vmem:[#allocation2 + $0x4c] sm:$0xff] }
 0x3ec   : > { %6000 = vmatmul.msk.bf16.gmra.mxu1 %vm2794_vm4, %v3841_v45  ;;  %v3813_v45 = vld [vmem:[#allocation2 + $0x83] sm:$0xff] }
 0x3f0   : > { %v3263_v42 = vpop.f32.mrf.mxu2 }
 0x3f1   : > { %v3264_v26 = vadd.f32 %v3263_v42, %v7864_v34  ;;  %v3476_v20 = vpop.f32.mrf.mxu3  ;;  %v3708_v5 = vpop.f32.mrf.mxu0  ;;  %v3814_v34 = vld [vmem:[#allocation2 + $0x8b] sm:$0xff] }
 0x3f2   : > { %v8021_v13 = vpop.f32.mrf.mxu1  ;;  %v8024_v44 = vadd.f32 %v3708_v5, %v7932_v10 }
 0x3f3   : > { %v8026_v23 = vadd.f32 %v3476_v20, %v3264_v26  ;;  %v3842_v26 = vpack.c.bf16 %v3814_v34, %v3813_v45 }
 0x3f4   : > { %5990 = vmatmul.msk.bf16.gmra.mxu0 %vm2794_vm4, %v7951_v3 }
 0x3f5   : > { %6014 = vmatmul.msk.bf16.gmra.mxu2 %vm2794_vm4, %v4333_v50 }
 0x3f6   : > { %6033 = vmatmul.msk.bf16.gmra.mxu3 %vm2794_vm4, %v4334_v7 }
 0x3f8   : > { %v3266_v61 = vpop.f32.mrf.mxu2 }
 0x3f9   : > { %v3267_v11 = vadd.f32 %v3266_v61, %v7879_v54  ;;  %v3479_v28 = vpop.f32.mrf.mxu3  ;;  %v3710_v32 = vpop.f32.mrf.mxu0 }
 0x3fa   : > { %v8033_v10 = vpop.f32.mrf.mxu1  ;;  %v8036_v42 = vadd.f32 %v3710_v32, %v7949_v35  ;;  %v4301_v35 = vld [vmem:[#allocation2 + $0x44] sm:$0xff] }
 0x3fb   : > { %v8038_v20 = vadd.f32 %v3479_v28, %v3267_v11  ;;  %v4335_v34 = vpack.c.bf16 %v4302_v43, %v4301_v35 }
 0x3fc   : > { %6001 = vmatmul.msk.bf16.gmra.mxu1 %vm2794_vm4, %v3842_v26  ;;  %v3815_v26 = vld [vmem:[#allocation2 + $0x93] sm:$0xff] }
 0x400   : > { %v3268_v3 = vpop.f32.mrf.mxu2 }
 0x401   : > { %v3269_v50 = vadd.f32 %v3268_v3, %v7888_v40  ;;  %v3481_v5 = vpop.f32.mrf.mxu3  ;;  %v3713_v27 = vpop.f32.mrf.mxu0  ;;  %v3816_v40 = vld [vmem:[#allocation2 + $0x9b] sm:$0xff] }
 0x402   : > { %v8042_v54 = vpop.f32.mrf.mxu1  ;;  %v8045_v61 = vadd.f32 %v3713_v27, %v7964_v29 }
 0x403   : > { %v8047_v8 = vadd.f32 %v3481_v5, %v3269_v50  ;;  %v3843_v50 = vpack.c.bf16 %v3816_v40, %v3815_v26 }
 0x404   : > { %5991 = vmatmul.msk.bf16.gmra.mxu0 %vm2794_vm4, %v7983_v31 }
 0x405   : > { %6015 = vmatmul.msk.bf16.gmra.mxu2 %vm2794_vm4, %v4334_v7  ;;  %v3585_v7 = vld [vmem:[#allocation2 + $0x12a] sm:$0xff] }
 0x406   : > { %6034 = vmatmul.msk.bf16.gmra.mxu3 %vm2794_vm4, %v4335_v34 }
 0x408   : > { %v3271_v11 = vpop.f32.mrf.mxu2 }
 0x409   : > { %v3272_v28 = vadd.f32 %v3271_v11, %v7903_v24  ;;  %v3484_v32 = vpop.f32.mrf.mxu3  ;;  %v3715_v45 = vpop.f32.mrf.mxu0  ;;  %v3584_v11 = vld [vmem:[#allocation2 + $0x122] sm:$0xff] }
 0x40a   : > { %v8055_v29 = vadd.f32 %v3715_v45, %v7981_v33  ;;  %v3922_v3 = vpop.f32.mrf.mxu1  ;;  %v3603_v40 = vpack.c.bf16 %v3585_v7, %v3584_v11  ;;  %v3817_v7 = vld [vmem:[#allocation2 + $0xa3] sm:$0xff] }
 0x40b   : > { %v8057_v5 = vadd.f32 %v3484_v32, %v3272_v28  ;;  %v8060_v31 = vadd.f32 %v3922_v3, %v7843_v36  ;;  %v4303_v32 = vld [vmem:[#allocation2 + $0x54] sm:$0xff] }
 0x40c   : > { %6002 = vmatmul.msk.bf16.gmra.mxu1 %vm2794_vm4, %v3843_v50  ;;  %v4336_v26 = vpack.c.bf16 %v4304_v6, %v4303_v32  ;;  %v4306_v32 = vld [vmem:[#allocation2 + $0x6c] sm:$0xff] }
 0x410   : > { %v3273_v27 = vpop.f32.mrf.mxu2 }
 0x411   : > { %v3274_v43 = vadd.f32 %v3273_v27, %v7912_v25  ;;  %v3486_v24 = vpop.f32.mrf.mxu3  ;;  %v3718_v35 = vpop.f32.mrf.mxu0  ;;  %v3818_v25 = vld [vmem:[#allocation2 + $0xab] sm:$0xff] }
 0x412   : > { %v8065_v33 = vadd.f32 %v3718_v35, %v7996_v63  ;;  %v3924_v45 = vpop.f32.mrf.mxu1 }
 0x413   : > { %v8067_v28 = vadd.f32 %v3486_v24, %v3274_v43  ;;  %v8070_v36 = vadd.f32 %v3924_v45, %v7858_v41  ;;  %v3844_v24 = vpack.c.bf16 %v3818_v25, %v3817_v7 }
 0x414   : > { %5992 = vmatmul.msk.bf16.gmra.mxu0 %vm2794_vm4, %v3603_v40 }
 0x415   : > { %6016 = vmatmul.msk.bf16.gmra.mxu2 %vm2794_vm4, %v4335_v34  ;;  %v4547_v34 = vld [vmem:[#allocation2 + $0x2d] sm:$0xff] }
 0x416   : > { %6035 = vmatmul.msk.bf16.gmra.mxu3 %vm2794_vm4, %v4336_v26 }
 0x418   : > { %v3276_v3 = vpop.f32.mrf.mxu2 }
 0x419   : > { %v3277_v63 = vadd.f32 %v3276_v3, %v7927_v52  ;;  %v3489_v50 = vpop.f32.mrf.mxu3  ;;  %v3720_v27 = vpop.f32.mrf.mxu0  ;;  %v4546_v3 = vld [vmem:[#allocation2 + $0x25] sm:$0xff] }
 0x41a   : > { %v8077_v43 = vadd.f32 %v3720_v27, %v8005_v62  ;;  %v3927_v41 = vpop.f32.mrf.mxu1  ;;  %v4582_v25 = vpack.c.bf16 %v4547_v34, %v4546_v3  ;;  %v3819_v34 = vld [vmem:[#allocation2 + $0xb3] sm:$0xff] }
 0x41b   : > { %v8079_v35 = vadd.f32 %v3489_v50, %v3277_v63  ;;  %v8082_v6 = vadd.f32 %v3927_v41, %v7867_v60  ;;  %v4305_v50 = vld [vmem:[#allocation2 + $0x64] sm:$0xff] }
 0x41c   : > { %6003 = vmatmul.msk.bf16.gmra.mxu1 %vm2794_vm4, %v3844_v24  ;;  %v4337_v7 = vpack.c.bf16 %v4306_v32, %v4305_v50  ;;  %v4308_v50 = vld [vmem:[#allocation2 + $0x7c] sm:$0xff] }
 0x420   : > { %v3278_v11 = vpop.f32.mrf.mxu2 }
 0x421   : > { %v3279_v45 = vadd.f32 %v3278_v11, %v7943_v19  ;;  %v3491_v52 = vpop.f32.mrf.mxu3  ;;  %v3723_v40 = vpop.f32.mrf.mxu0  ;;  %v3820_v19 = vld [vmem:[#allocation2 + $0xbb] sm:$0xff] }
 0x422   : > { %v8087_v62 = vadd.f32 %v3723_v40, %v8017_v1  ;;  %v3929_v27 = vpop.f32.mrf.mxu1 }
 0x423   : > { %v8089_v63 = vadd.f32 %v3491_v52, %v3279_v45  ;;  %v8092_v60 = vadd.f32 %v3929_v27, %v7882_v22  ;;  %v3845_v52 = vpack.c.bf16 %v3820_v19, %v3819_v34 }
 0x424   : > { %6051 = vmatmul.msk.bf16.vlgmr.msra.gmra.mxu0 %vm2794_vm4, %v4582_v25 }
 0x425   : > { %6017 = vmatmul.msk.bf16.gmra.mxu2 %vm2794_vm4, %v4336_v26  ;;  %v4549_v26 = vld [vmem:[#allocation2 + $0x3d] sm:$0xff] }
 0x426   : > { %6036 = vmatmul.msk.bf16.gmra.mxu3 %vm2794_vm4, %v4337_v7 }
 0x428   : > { %v3281_v41 = vpop.f32.mrf.mxu2 }
 0x429   : > { %v3282_v1 = vadd.f32 %v3281_v41, %v7959_v37  ;;  %v3494_v24 = vpop.f32.mrf.mxu3  ;;  %v3725_v11 = vpop.f32.mrf.mxu0  ;;  %v4548_v41 = vld [vmem:[#allocation2 + $0x35] sm:$0xff] }
 0x42a   : > { %v8099_v45 = vadd.f32 %v3725_v11, %v8026_v23  ;;  %v3932_v22 = vpop.f32.mrf.mxu1  ;;  %v4583_v19 = vpack.c.bf16 %v4549_v26, %v4548_v41  ;;  %v3821_v26 = vld [vmem:[#allocation2 + $0xc3] sm:$0xff] }
 0x42b   : > { %v8101_v40 = vadd.f32 %v3494_v24, %v3282_v1  ;;  %v8104_v32 = vadd.f32 %v3932_v22, %v7891_v57  ;;  %v4307_v24 = vld [vmem:[#allocation2 + $0x74] sm:$0xff] }
 0x42c   : > { %6004 = vmatmul.msk.bf16.gmra.mxu1 %vm2794_vm4, %v3845_v52  ;;  %v4338_v34 = vpack.c.bf16 %v4308_v50, %v4307_v24  ;;  %v4310_v24 = vld [vmem:[#allocation2 + $0x8c] sm:$0xff] }
 0x430   : > { %v3283_v3 = vpop.f32.mrf.mxu2 }
 0x431   : > { %v3284_v27 = vadd.f32 %v3283_v3, %v7976_v9  ;;  %v3496_v37 = vpop.f32.mrf.mxu3  ;;  %v3728_v25 = vpop.f32.mrf.mxu0  ;;  %v3822_v9 = vld [vmem:[#allocation2 + $0xcb] sm:$0xff] }
 0x432   : > { %v8109_v23 = vadd.f32 %v3728_v25, %v8038_v20  ;;  %v3934_v11 = vpop.f32.mrf.mxu1 }
 0x433   : > { %v8111_v1 = vadd.f32 %v3496_v37, %v3284_v27  ;;  %v8114_v57 = vadd.f32 %v3934_v11, %v7906_v15  ;;  %v3846_v37 = vpack.c.bf16 %v3822_v9, %v3821_v26 }
 0x434   : > { %6052 = vmatmul.msk.bf16.gmra.mxu0 %vm2794_vm4, %v4583_v19 }
 0x435   : > { %6018 = vmatmul.msk.bf16.gmra.mxu2 %vm2794_vm4, %v4337_v7  ;;  %v4551_v7 = vld [vmem:[#allocation2 + $0x4d] sm:$0xff] }
 0x436   : > { %6037 = vmatmul.msk.bf16.gmra.mxu3 %vm2794_vm4, %v4338_v34 }
 0x438   : > { %v3286_v22 = vpop.f32.mrf.mxu2 }
 0x439   : > { %v3287_v20 = vadd.f32 %v3286_v22, %v7991_v56  ;;  %v3499_v52 = vpop.f32.mrf.mxu3  ;;  %v3730_v3 = vpop.f32.mrf.mxu0  ;;  %v4550_v22 = vld [vmem:[#allocation2 + $0x45] sm:$0xff] }
 0x43a   : > { %v8121_v27 = vadd.f32 %v3730_v3, %v8047_v8  ;;  %v3937_v15 = vpop.f32.mrf.mxu1  ;;  %v4584_v9 = vpack.c.bf16 %v4551_v7, %v4550_v22  ;;  %v3823_v7 = vld [vmem:[#allocation2 + $0xd3] sm:$0xff] }
 0x43b   : > { %v8123_v25 = vadd.f32 %v3499_v52, %v3287_v20  ;;  %v8126_v50 = vadd.f32 %v3937_v15, %v7915_v59  ;;  %v4309_v52 = vld [vmem:[#allocation2 + $0x84] sm:$0xff] }
 0x43c   : > { %6005 = vmatmul.msk.bf16.gmra.mxu1 %vm2794_vm4, %v3846_v37  ;;  %v4339_v26 = vpack.c.bf16 %v4310_v24, %v4309_v52  ;;  %v4312_v52 = vld [vmem:[#allocation2 + $0x9c] sm:$0xff] }
 0x440   : > { %v3288_v41 = vpop.f32.mrf.mxu2 }
 0x441   : > { %v3289_v11 = vadd.f32 %v3288_v41, %v8000_v2  ;;  %v3501_v56 = vpop.f32.mrf.mxu3  ;;  %v3733_v19 = vpop.f32.mrf.mxu0  ;;  %v3824_v2 = vld [vmem:[#allocation2 + $0xdb] sm:$0xff] }
 0x442   : > { %v8131_v8 = vadd.f32 %v3733_v19, %v8057_v5  ;;  %v3939_v3 = vpop.f32.mrf.mxu1 }
 0x443   : > { %v8133_v20 = vadd.f32 %v3501_v56, %v3289_v11  ;;  %v8136_v59 = vadd.f32 %v3939_v3, %v7930_v58  ;;  %v3847_v56 = vpack.c.bf16 %v3824_v2, %v3823_v7 }
 0x444   : > { %6053 = vmatmul.msk.bf16.gmra.mxu0 %vm2794_vm4, %v4584_v9 }
 0x445   : > { %6019 = vmatmul.msk.bf16.gmra.mxu2 %vm2794_vm4, %v4338_v34  ;;  %v4553_v34 = vld [vmem:[#allocation2 + $0x5d] sm:$0xff] }
 0x446   : > { %6038 = vmatmul.msk.bf16.gmra.mxu3 %vm2794_vm4, %v4339_v26 }
 0x448   : > { %v3291_v15 = vpop.f32.mrf.mxu2 }
 0x449   : > { %v3292_v5 = vadd.f32 %v3291_v15, %v8012_v16  ;;  %v3504_v37 = vpop.f32.mrf.mxu3  ;;  %v3735_v41 = vpop.f32.mrf.mxu0  ;;  %v4552_v15 = vld [vmem:[#allocation2 + $0x55] sm:$0xff] }
 0x44a   : > { %v8143_v11 = vadd.f32 %v3735_v41, %v8067_v28  ;;  %v3942_v58 = vpop.f32.mrf.mxu1  ;;  %v4585_v2 = vpack.c.bf16 %v4553_v34, %v4552_v15  ;;  %v3825_v34 = vld [vmem:[#allocation2 + $0xe3] sm:$0xff] }
 0x44b   : > { %v8145_v19 = vadd.f32 %v3504_v37, %v3292_v5  ;;  %v8148_v24 = vadd.f32 %v3942_v58, %v7946_v4  ;;  %v4311_v37 = vld [vmem:[#allocation2 + $0x94] sm:$0xff] }
 0x44c   : > { %6006 = vmatmul.msk.bf16.gmra.mxu1 %vm2794_vm4, %v3847_v56  ;;  %v4340_v7 = vpack.c.bf16 %v4312_v52, %v4311_v37  ;;  %v4314_v37 = vld [vmem:[#allocation2 + $0xac] sm:$0xff] }
 0x450   : > { %v3293_v22 = vpop.f32.mrf.mxu2 }
 0x451   : > { %v3294_v3 = vadd.f32 %v3293_v22, %v8021_v13  ;;  %v3506_v16 = vpop.f32.mrf.mxu3  ;;  %v3738_v9 = vpop.f32.mrf.mxu0  ;;  %v3826_v13 = vld [vmem:[#allocation2 + $0xeb] sm:$0xff] }
 0x452   : > { %v8153_v28 = vadd.f32 %v3738_v9, %v8079_v35  ;;  %v3944_v41 = vpop.f32.mrf.mxu1 }
 0x453   : > { %v8155_v5 = vadd.f32 %v3506_v16, %v3294_v3  ;;  %v8158_v4 = vadd.f32 %v3944_v41, %v7962_v51  ;;  %v3848_v16 = vpack.c.bf16 %v3826_v13, %v3825_v34 }
 0x454   : > { %6054 = vmatmul.msk.bf16.gmra.mxu0 %vm2794_vm4, %v4585_v2 }
 0x455   : > { %6020 = vmatmul.msk.bf16.gmra.mxu2 %vm2794_vm4, %v4339_v26  ;;  %v4555_v26 = vld [vmem:[#allocation2 + $0x6d] sm:$0xff] }
 0x456   : > { %6039 = vmatmul.msk.bf16.gmra.mxu3 %vm2794_vm4, %v4340_v7 }
 0x458   : > { %v3296_v58 = vpop.f32.mrf.mxu2 }
 0x459   : > { %v3297_v35 = vadd.f32 %v3296_v58, %v8033_v10  ;;  %v3509_v56 = vpop.f32.mrf.mxu3  ;;  %v3740_v22 = vpop.f32.mrf.mxu0  ;;  %v4554_v58 = vld [vmem:[#allocation2 + $0x65] sm:$0xff] }
 0x45a   : > { %v8165_v3 = vadd.f32 %v3740_v22, %v8089_v63  ;;  %v3947_v51 = vpop.f32.mrf.mxu1  ;;  %v4586_v13 = vpack.c.bf16 %v4555_v26, %v4554_v58  ;;  %v3827_v26 = vld [vmem:[#allocation2 + $0xf3] sm:$0xff] }
 0x45b   : > { %v8167_v9 = vadd.f32 %v3509_v56, %v3297_v35  ;;  %v8170_v52 = vadd.f32 %v3947_v51, %v7979_v30  ;;  %v4313_v56 = vld [vmem:[#allocation2 + $0xa4] sm:$0xff] }
 0x45c   : > { %6007 = vmatmul.msk.bf16.gmra.mxu1 %vm2794_vm4, %v3848_v16  ;;  %v4341_v34 = vpack.c.bf16 %v4314_v37, %v4313_v56  ;;  %v4316_v56 = vld [vmem:[#allocation2 + $0xbc] sm:$0xff] }
 0x460   : > { %v3298_v15 = vpop.f32.mrf.mxu2 }
 0x461   : > { %v3299_v41 = vadd.f32 %v3298_v15, %v8042_v54  ;;  %v3511_v10 = vpop.f32.mrf.mxu3  ;;  %v3743_v2 = vpop.f32.mrf.mxu0  ;;  %v3828_v54 = vld [vmem:[#allocation2 + $0xfb] sm:$0xff] }
 0x462   : > { %v8175_v63 = vadd.f32 %v3743_v2, %v8101_v40  ;;  %v3949_v22 = vpop.f32.mrf.mxu1 }
 0x463   : > { %v8177_v35 = vadd.f32 %v3511_v10, %v3299_v41  ;;  %v8180_v30 = vadd.f32 %v3949_v22, %v7994_v46  ;;  %v3849_v10 = vpack.c.bf16 %v3828_v54, %v3827_v26 }
 0x464   : > { %6055 = vmatmul.msk.bf16.gmra.mxu0 %vm2794_vm4, %v4586_v13 }
 0x465   : > { %6021 = vmatmul.msk.bf16.gmra.mxu2 %vm2794_vm4, %v4340_v7  ;;  %v4557_v7 = vld [vmem:[#allocation2 + $0x7d] sm:$0xff] }
 0x466   : > { %6040 = vmatmul.msk.bf16.gmra.mxu3 %vm2794_vm4, %v4341_v34 }
 0x468   : > { %v4171_v51 = vpop.f32.mrf.mxu2 }
 0x469   : > { %v4261_v40 = vadd.f32 %v4171_v51, %v8060_v31  ;;  %v4420_v16 = vpop.f32.mrf.mxu3  ;;  %v3745_v15 = vpop.f32.mrf.mxu0  ;;  %v4556_v51 = vld [vmem:[#allocation2 + $0x75] sm:$0xff] }
 0x46a   : > { %v8187_v41 = vadd.f32 %v3745_v15, %v8111_v1  ;;  %v3952_v46 = vpop.f32.mrf.mxu1  ;;  %v4587_v54 = vpack.c.bf16 %v4557_v7, %v4556_v51  ;;  %v3829_v7 = vld [vmem:[#allocation2 + $0x103] sm:$0xff] }
 0x46b   : > { %v8189_v2 = vadd.f32 %v4420_v16, %v4261_v40  ;;  %v8192_v37 = vadd.f32 %v3952_v46, %v8003_v14  ;;  %v4315_v16 = vld [vmem:[#allocation2 + $0xb4] sm:$0xff] }
 0x46c   : > { %6008 = vmatmul.msk.bf16.gmra.mxu1 %vm2794_vm4, %v3849_v10  ;;  %v4342_v26 = vpack.c.bf16 %v4316_v56, %v4315_v16  ;;  %v4318_v16 = vld [vmem:[#allocation2 + $0xcc] sm:$0xff] }
 0x470   : > { %v4173_v58 = vpop.f32.mrf.mxu2 }
 0x471   : > { %v4262_v22 = vadd.f32 %v4173_v58, %v8070_v36  ;;  %v4422_v31 = vpop.f32.mrf.mxu3  ;;  %v3748_v13 = vpop.f32.mrf.mxu0  ;;  %v3830_v36 = vld [vmem:[#allocation2 + $0x10b] sm:$0xff] }
 0x472   : > { %v8197_v1 = vadd.f32 %v3748_v13, %v8123_v25  ;;  %v3954_v15 = vpop.f32.mrf.mxu1 }
 0x473   : > { %v8199_v40 = vadd.f32 %v4422_v31, %v4262_v22  ;;  %v8202_v14 = vadd.f32 %v3954_v15, %v8015_v39  ;;  %v3850_v31 = vpack.c.bf16 %v3830_v36, %v3829_v7 }
 0x474   : > { %6056 = vmatmul.msk.bf16.gmra.mxu0 %vm2794_vm4, %v4587_v54 }
 0x475   : > { %6022 = vmatmul.msk.bf16.gmra.mxu2 %vm2794_vm4, %v4341_v34  ;;  %v4559_v34 = vld [vmem:[#allocation2 + $0x8d] sm:$0xff] }
 0x476   : > { %6041 = vmatmul.msk.bf16.gmra.mxu3 %vm2794_vm4, %v4342_v26 }
 0x478   : > { %v4176_v46 = vpop.f32.mrf.mxu2 }
 0x479   : > { %v4263_v25 = vadd.f32 %v4176_v46, %v8082_v6  ;;  %v4425_v10 = vpop.f32.mrf.mxu3  ;;  %v3750_v58 = vpop.f32.mrf.mxu0  ;;  %v4558_v46 = vld [vmem:[#allocation2 + $0x85] sm:$0xff] }
 0x47a   : > { %v8209_v22 = vadd.f32 %v3750_v58, %v8133_v20  ;;  %v3957_v39 = vpop.f32.mrf.mxu1  ;;  %v4588_v36 = vpack.c.bf16 %v4559_v34, %v4558_v46  ;;  %v3831_v34 = vld [vmem:[#allocation2 + $0x113] sm:$0xff] }
 0x47b   : > { %v8211_v13 = vadd.f32 %v4425_v10, %v4263_v25  ;;  %v8214_v56 = vadd.f32 %v3957_v39, %v8024_v44  ;;  %v4317_v10 = vld [vmem:[#allocation2 + $0xc4] sm:$0xff] }
 0x47c   : > { %6009 = vmatmul.msk.bf16.gmra.mxu1 %vm2794_vm4, %v3850_v31  ;;  %v4343_v7 = vpack.c.bf16 %v4318_v16, %v4317_v10  ;;  %v4320_v10 = vld [vmem:[#allocation2 + $0xdc] sm:$0xff] }
 0x480   : > { %v4178_v51 = vpop.f32.mrf.mxu2 }
 0x481   : > { %v4264_v15 = vadd.f32 %v4178_v51, %v8092_v60  ;;  %v4427_v6 = vpop.f32.mrf.mxu3  ;;  %v3753_v54 = vpop.f32.mrf.mxu0  ;;  %v3832_v60 = vld [vmem:[#allocation2 + $0x11b] sm:$0xff] }
 0x482   : > { %v8219_v20 = vadd.f32 %v3753_v54, %v8145_v19  ;;  %v3959_v58 = vpop.f32.mrf.mxu1 }
 0x483   : > { %v8221_v25 = vadd.f32 %v4427_v6, %v4264_v15  ;;  %v8224_v44 = vadd.f32 %v3959_v58, %v8036_v42  ;;  %v3851_v6 = vpack.c.bf16 %v3832_v60, %v3831_v34 }
 0x484   : > { %6057 = vmatmul.msk.bf16.gmra.mxu0 %vm2794_vm4, %v4588_v36 }
 0x485   : > { %6023 = vmatmul.msk.bf16.gmra.mxu2 %vm2794_vm4, %v4342_v26  ;;  %v4561_v26 = vld [vmem:[#allocation2 + $0x9d] sm:$0xff] }
 0x486   : > { %6042 = vmatmul.msk.bf16.gmra.mxu3 %vm2794_vm4, %v4343_v7 }
 0x488   : > { %v4181_v39 = vpop.f32.mrf.mxu2 }
 0x489   : > { %v4265_v19 = vadd.f32 %v4181_v39, %v8104_v32  ;;  %v4430_v31 = vpop.f32.mrf.mxu3  ;;  %v3755_v51 = vpop.f32.mrf.mxu0  ;;  %v4560_v39 = vld [vmem:[#allocation2 + $0x95] sm:$0xff] }
 0x48a   : > { %v8231_v15 = vadd.f32 %v3755_v51, %v8155_v5  ;;  %v3962_v42 = vpop.f32.mrf.mxu1  ;;  %v4589_v60 = vpack.c.bf16 %v4561_v26, %v4560_v39  ;;  %v3833_v26 = vld [vmem:[#allocation2 + $0x123] sm:$0xff] }
 0x48b   : > { %v8233_v54 = vadd.f32 %v4430_v31, %v4265_v19  ;;  %v8236_v16 = vadd.f32 %v3962_v42, %v8045_v61  ;;  %v4319_v31 = vld [vmem:[#allocation2 + $0xd4] sm:$0xff] }
 0x48c   : > { %6010 = vmatmul.msk.bf16.gmra.mxu1 %vm2794_vm4, %v3851_v6  ;;  %v4344_v34 = vpack.c.bf16 %v4320_v10, %v4319_v31  ;;  %v4322_v31 = vld [vmem:[#allocation2 + $0xec] sm:$0xff] }
 0x490   : > { %v4183_v46 = vpop.f32.mrf.mxu2 }
 0x491   : > { %v4266_v58 = vadd.f32 %v4183_v46, %v8114_v57  ;;  %v4432_v32 = vpop.f32.mrf.mxu3  ;;  %v3758_v36 = vpop.f32.mrf.mxu0  ;;  %v3834_v57 = vld [vmem:[#allocation2 + $0x12b] sm:$0xff] }
 0x492   : > { %v8241_v5 = vadd.f32 %v3758_v36, %v8167_v9  ;;  %v3964_v51 = vpop.f32.mrf.mxu1 }
 0x493   : > { %v8243_v19 = vadd.f32 %v4432_v32, %v4266_v58  ;;  %v8246_v61 = vadd.f32 %v3964_v51, %v8055_v29  ;;  %v3852_v32 = vpack.c.bf16 %v3834_v57, %v3833_v26 }
 0x494   : > { %6058 = vmatmul.msk.bf16.gmra.mxu0 %vm2794_vm4, %v4589_v60 }
 0x495   : > { %6024 = vmatmul.msk.bf16.gmra.mxu2 %vm2794_vm4, %v4343_v7  ;;  %v4563_v7 = vld [vmem:[#allocation2 + $0xad] sm:$0xff] }
 0x496   : > { %6043 = vmatmul.msk.bf16.gmra.mxu3 %vm2794_vm4, %v4344_v34 }
 0x498   : > { %v4186_v42 = vpop.f32.mrf.mxu2 }
 0x499   : > { %v4267_v9 = vadd.f32 %v4186_v42, %v8126_v50  ;;  %v4435_v6 = vpop.f32.mrf.mxu3  ;;  %v3760_v46 = vpop.f32.mrf.mxu0  ;;  %v4562_v42 = vld [vmem:[#allocation2 + $0xa5] sm:$0xff] }
 0x49a   : > { %v8253_v58 = vadd.f32 %v3760_v46, %v8177_v35  ;;  %v3967_v29 = vpop.f32.mrf.mxu1  ;;  %v4590_v57 = vpack.c.bf16 %v4563_v7, %v4562_v42  ;;  %v4795_v7 = vld [vmem:[#allocation2 + $0x26] sm:$0xff]  ;;  %v4324_v42 = vld [vmem:[#allocation2 + $0xfc] sm:$0xff] }
 0x49b   : > { %v8255_v36 = vadd.f32 %v4435_v6, %v4267_v9  ;;  %v8258_v10 = vadd.f32 %v3967_v29, %v8065_v33  ;;  %v4321_v6 = vld [vmem:[#allocation2 + $0xe4] sm:$0xff] }
 0x49c   : > { %6011 = vmatmul.msk.bf16.gmra.mxu1 %vm2794_vm4, %v3852_v32  ;;  %v4345_v46 = vpack.c.bf16 %v4322_v31, %v4321_v6 }
 0x4a0   : > { %v4188_v39 = vpop.f32.mrf.mxu2 }
 0x4a1   : > { %v4268_v51 = vadd.f32 %v4188_v39, %v8136_v59  ;;  %v4437_v50 = vpop.f32.mrf.mxu3  ;;  %v4669_v60 = vpop.f32.mrf.mxu0  ;;  %v4796_v59 = vld [vmem:[#allocation2 + $0x2e] sm:$0xff] }
 0x4a2   : > { %v3969_v38 = vpop.f32.mrf.mxu1  ;;  %v8263_v35 = vadd.f32 %v4669_v60, %v8189_v2 }
 0x4a3   : > { %v8265_v9 = vadd.f32 %v4437_v50, %v4268_v51  ;;  %v8268_v33 = vadd.f32 %v3969_v38, %v8077_v43  ;;  %v4831_v43 = vpack.c.bf16 %v4796_v59, %v4795_v7 }
 0x4a4   : > { %6059 = vmatmul.msk.bf16.gmra.mxu0 %vm2794_vm4, %v4590_v57  ;;  %v4564_v57 = vld [vmem:[#allocation2 + $0xb5] sm:$0xff] }
 0x4a5   : > { %6025 = vmatmul.msk.bf16.gmra.mxu2 %vm2794_vm4, %v4344_v34 }
 0x4a6   : > { %6044 = vmatmul.msk.bf16.gmra.mxu3 %vm2794_vm4, %v4345_v46 }
 0x4a8   : > { %v4191_v26 = vpop.f32.mrf.mxu2 }
 0x4a9   : > { %v4269_v2 = vadd.f32 %v4191_v26, %v8148_v24  ;;  %v4440_v29 = vpop.f32.mrf.mxu3  ;;  %v4671_v32 = vpop.f32.mrf.mxu0  ;;  %v9065_v24 = vmov 0.0  }
 0x4aa   : > { %v3972_v39 = vpop.f32.mrf.mxu1  ;;  %v8275_v38 = vadd.f32 %v4671_v32, %v8199_v40  ;;  %5158 = vst.msk [vmem:[%s8287_s27 + $0x10] sm:$0xff] %vm2794_vm4, %v9065_v24 }
 0x4ab   : > { %v8277_v51 = vadd.f32 %v4440_v29, %v4269_v2  ;;  %v8280_v50 = vadd.f32 %v3972_v39, %v8087_v62  ;;  %5159 = vst.msk [vmem:[%s8287_s27 + $0x18] sm:$0xff] %vm2794_vm4, %v9065_v24  ;;  %v4565_v62 = vld [vmem:[#allocation2 + $0xbd] sm:$0xff]  ;;  %v4323_v29 = vld [vmem:[#allocation2 + $0xf4] sm:$0xff] }
 0x4ac   : > { %6070 = vmatmul.msk.bf16.vlgmr.msra.gmra.mxu1 %vm2794_vm4, %v4831_v43  ;;  %5156 = vst.msk [vmem:[%s8287_s27] sm:$0xff] %vm2794_vm4, %v9065_v24  ;;  %v4591_v26 = vpack.c.bf16 %v4565_v62, %v4564_v57  ;;  %v4346_v32 = vpack.c.bf16 %v4324_v42, %v4323_v29  ;;  %v4797_v43 = vld [vmem:[#allocation2 + $0x36] sm:$0xff]  ;;  %v4326_v57 = vld [vmem:[#allocation2 + $0x10c] sm:$0xff] }
 0x4ad   : > { %5157 = vst.msk [vmem:[%s8287_s27 + $0x8] sm:$0xff] %vm2794_vm4, %v9065_v24 }
 0x4ae   : > { %5160 = vst.msk [vmem:[%s8287_s27 + $0x20] sm:$0xff] %vm2794_vm4, %v9065_v24 }
 0x4af   : > { %5161 = vst.msk [vmem:[%s8287_s27 + $0x28] sm:$0xff] %vm2794_vm4, %v9065_v24 }
 0x4b0   : > { %v4193_v40 = vpop.f32.mrf.mxu2  ;;  %5162 = vst.msk [vmem:[%s8287_s27 + $0x30] sm:$0xff] %vm2794_vm4, %v9065_v24 }
 0x4b1   : > { %v4270_v34 = vadd.f32 %v4193_v40, %v8158_v4  ;;  %v4442_v60 = vpop.f32.mrf.mxu3  ;;  %v4674_v31 = vpop.f32.mrf.mxu0  ;;  %5163 = vst.msk [vmem:[%s8287_s27 + $0x38] sm:$0xff] %vm2794_vm4, %v9065_v24 }
 0x4b2   : > { %v3974_v6 = vpop.f32.mrf.mxu1  ;;  %v8310_v59 = vadd.f32 %v4674_v31, %v8211_v13  ;;  %5164 = vst.msk [vmem:[%s8287_s27 + $0x40] sm:$0xff] %vm2794_vm4, %v9065_v24 }
 0x4b3   : > { %v8315_v4 = vadd.f32 %v4442_v60, %v4270_v34  ;;  %v8318_v2 = vadd.f32 %v3974_v6, %v8099_v45  ;;  %5165 = vst.msk [vmem:[%s8287_s27 + $0x48] sm:$0xff] %vm2794_vm4, %v9065_v24  ;;  %v4798_v45 = vld [vmem:[#allocation2 + $0x3e] sm:$0xff] }
 0x4b4   : > { %6060 = vmatmul.msk.bf16.gmra.mxu0 %vm2794_vm4, %v4591_v26  ;;  %5166 = vst.msk [vmem:[%s8287_s27 + $0x50] sm:$0xff] %vm2794_vm4, %v9065_v24  ;;  %v4832_v34 = vpack.c.bf16 %v4798_v45, %v4797_v43  ;;  %v4566_v6 = vld [vmem:[#allocation2 + $0xc5] sm:$0xff] }
 0x4b5   : > { %6026 = vmatmul.msk.bf16.gmra.mxu2 %vm2794_vm4, %v4345_v46  ;;  %5167 = vst.msk [vmem:[%s8287_s27 + $0x58] sm:$0xff] %vm2794_vm4, %v9065_v24 }
 0x4b6   : > { %6045 = vmatmul.msk.bf16.gmra.mxu3 %vm2794_vm4, %v4346_v32  ;;  %5168 = vst.msk [vmem:[%s8287_s27 + $0x60] sm:$0xff] %vm2794_vm4, %v9065_v24 }
 0x4b7   : > { %5169 = vst.msk [vmem:[%s8287_s27 + $0x68] sm:$0xff] %vm2794_vm4, %v9065_v24 }
 0x4b8   : > { %v4196_v13 = vpop.f32.mrf.mxu2  ;;  %5170 = vst.msk [vmem:[%s8287_s27 + $0x70] sm:$0xff] %vm2794_vm4, %v9065_v24 }
 0x4b9   : > { %v4271_v46 = vadd.f32 %v4196_v13, %v8170_v52  ;;  %v4445_v7 = vpop.f32.mrf.mxu3  ;;  %v4676_v39 = vpop.f32.mrf.mxu0  ;;  %5171 = vst.msk [vmem:[%s8287_s27 + $0x78] sm:$0xff] %vm2794_vm4, %v9065_v24 }
 0x4ba   : > { %v3977_v62 = vpop.f32.mrf.mxu1  ;;  %v8346_v40 = vadd.f32 %v4676_v39, %v8221_v25  ;;  %5172 = vst.msk [vmem:[%s8287_s27 + $0x80] sm:$0xff] %vm2794_vm4, %v9065_v24  ;;  %v4567_v25 = vld [vmem:[#allocation2 + $0xcd] sm:$0xff] }
 0x4bb   : > { %v8351_v60 = vadd.f32 %v4445_v7, %v4271_v46  ;;  %v8354_v52 = vadd.f32 %v3977_v62, %v8109_v23  ;;  %5173 = vst.msk [vmem:[%s8287_s27 + $0x88] sm:$0xff] %vm2794_vm4, %v9065_v24  ;;  %v4592_v13 = vpack.c.bf16 %v4567_v25, %v4566_v6  ;;  %v4325_v7 = vld [vmem:[#allocation2 + $0x104] sm:$0xff] }
 0x4bc   : > { %6071 = vmatmul.msk.bf16.gmra.mxu1 %vm2794_vm4, %v4832_v34  ;;  %5174 = vst.msk [vmem:[%s8287_s27 + $0x90] sm:$0xff] %vm2794_vm4, %v9065_v24  ;;  %v4347_v39 = vpack.c.bf16 %v4326_v57, %v4325_v7  ;;  %v4801_v7 = vld [vmem:[#allocation2 + $0x56] sm:$0xff] }
 0x4bd   : > { %5175 = vst.msk [vmem:[%s8287_s27 + $0x98] sm:$0xff] %vm2794_vm4, %v9065_v24 }
 0x4be   : > { %5176 = vst.msk [vmem:[%s8287_s27 + $0xa0] sm:$0xff] %vm2794_vm4, %v9065_v24 }
 0x4bf   : > { %5177 = vst.msk [vmem:[%s8287_s27 + $0xa8] sm:$0xff] %vm2794_vm4, %v9065_v24 }
 0x4c0   : > { %v4198_v23 = vpop.f32.mrf.mxu2  ;;  %5178 = vst.msk [vmem:[%s8287_s27 + $0xb0] sm:$0xff] %vm2794_vm4, %v9065_v24 }
 0x4c1   : > { %v4272_v31 = vadd.f32 %v4198_v23, %v8180_v30  ;;  %v4679_v42 = vpop.f32.mrf.mxu0  ;;  %v4447_v26 = vpop.f32.mrf.mxu3  ;;  %5179 = vst.msk [vmem:[%s8287_s27 + $0xb8] sm:$0xff] %vm2794_vm4, %v9065_v24  ;;  %v4328_v23 = vld [vmem:[#allocation2 + $0x11c] sm:$0xff] }
 0x4c2   : > { %v3979_v29 = vpop.f32.mrf.mxu1  ;;  %v8380_v45 = vadd.f32 %v4679_v42, %v8233_v54  ;;  %5180 = vst.msk [vmem:[%s8287_s27 + $0xc0] sm:$0xff] %vm2794_vm4, %v9065_v24 }
 0x4c3   : > { %v8385_v30 = vadd.f32 %v4447_v26, %v4272_v31  ;;  %v8388_v46 = vadd.f32 %v3979_v29, %v8121_v27  ;;  %5181 = vst.msk [vmem:[%s8287_s27 + $0xc8] sm:$0xff] %vm2794_vm4, %v9065_v24  ;;  %v4800_v27 = vld [vmem:[#allocation2 + $0x4e] sm:$0xff] }
 0x4c4   : > { %6061 = vmatmul.msk.bf16.gmra.mxu0 %vm2794_vm4, %v4592_v13  ;;  %5182 = vst.msk [vmem:[%s8287_s27 + $0xd0] sm:$0xff] %vm2794_vm4, %v9065_v24  ;;  %v4568_v31 = vld [vmem:[#allocation2 + $0xd5] sm:$0xff] }
 0x4c5   : > { %6027 = vmatmul.msk.bf16.gmra.mxu2 %vm2794_vm4, %v4346_v32  ;;  %5183 = vst.msk [vmem:[%s8287_s27 + $0xd8] sm:$0xff] %vm2794_vm4, %v9065_v24  ;;  %v4799_v32 = vld [vmem:[#allocation2 + $0x46] sm:$0xff]  ;;  %v4327_v29 = vld [vmem:[#allocation2 + $0x114] sm:$0xff] }
 0x4c6   : > { %6046 = vmatmul.msk.bf16.gmra.mxu3 %vm2794_vm4, %v4347_v39  ;;  %5184 = vst.msk [vmem:[%s8287_s27 + $0xe0] sm:$0xff] %vm2794_vm4, %v9065_v24  ;;  %v4833_v34 = vpack.c.bf16 %v4800_v27, %v4799_v32  ;;  %v4348_v13 = vpack.c.bf16 %v4328_v23, %v4327_v29  ;;  %v4570_v23 = vld [vmem:[#allocation2 + $0xe5] sm:$0xff] }
 0x4c7   : > { %5185 = vst.msk [vmem:[%s8287_s27 + $0xe8] sm:$0xff] %vm2794_vm4, %v9065_v24 }
 0x4c8   : > { %5186 = vst.msk [vmem:[%s8287_s27 + $0xf0] sm:$0xff] %vm2794_vm4, %v9065_v24 }
 0x4c9   : > { %v4681_v54 = vpop.f32.mrf.mxu0  ;;  %5187 = vst.msk [vmem:[%s8287_s27 + $0xf8] sm:$0xff] %vm2794_vm4, %v9065_v24 }
 0x4ca   : > { %v3982_v43 = vpop.f32.mrf.mxu1  ;;  %v8415_v62 = vadd.f32 %v4681_v54, %v8243_v19  ;;  %5188 = vst.msk [vmem:[%s8287_s27 + $0x100] sm:$0xff] %vm2794_vm4, %v9065_v24  ;;  %v4569_v19 = vld [vmem:[#allocation2 + $0xdd] sm:$0xff] }
 0x4cb   : > { %v8421_v25 = vadd.f32 %v3982_v43, %v8131_v8  ;;  %5189 = vst.msk [vmem:[%s8287_s27 + $0x108] sm:$0xff] %vm2794_vm4, %v9065_v24  ;;  %v4593_v6 = vpack.c.bf16 %v4569_v19, %v4568_v31  ;;  %v4329_v19 = vld [vmem:[#allocation2 + $0x124] sm:$0xff] }
 0x4cc   : > { %6072 = vmatmul.msk.bf16.gmra.mxu1 %vm2794_vm4, %v4833_v34  ;;  %5190 = vst.msk [vmem:[%s8287_s27 + $0x110] sm:$0xff] %vm2794_vm4, %v9065_v24  ;;  %v4571_v34 = vld [vmem:[#allocation2 + $0xed] sm:$0xff] }
 0x4cd   : > { %5191 = vst.msk [vmem:[%s8287_s27 + $0x118] sm:$0xff] %vm2794_vm4, %v9065_v24 }
 0x4ce   : > { %5192 = vst.msk [vmem:[%s8287_s27 + $0x120] sm:$0xff] %vm2794_vm4, %v9065_v24 }
 0x4cf   : > { %5193 = vst.msk [vmem:[%s8287_s27 + $0x128] sm:$0xff] %vm2794_vm4, %v9065_v24 }
 0x4d0   : > { %5194 = vst.msk [vmem:[%s8287_s27 + $0x130] sm:$0xff] %vm2794_vm4, %v9065_v24 }
 0x4d1   : > { %v4684_v8 = vpop.f32.mrf.mxu0  ;;  %5195 = vst.msk [vmem:[%s8287_s27 + $0x138] sm:$0xff] %vm2794_vm4, %v9065_v24 }
 0x4d2   : > { %v3984_v42 = vpop.f32.mrf.mxu1  ;;  %v8446_v57 = vadd.f32 %v4684_v8, %v8255_v36  ;;  %5196 = vst.msk [vmem:[%s8287_s27 + $0x140] sm:$0xff] %vm2794_vm4, %v9065_v24  ;;  %v4802_v36 = vld [vmem:[#allocation2 + $0x5e] sm:$0xff]  ;;  %v4330_v8 = vld [vmem:[#allocation2 + $0x12c] sm:$0xff] }
 0x4d3   : > { %v8452_v26 = vadd.f32 %v3984_v42, %v8143_v11  ;;  %5197 = vst.msk [vmem:[%s8287_s27 + $0x148] sm:$0xff] %vm2794_vm4, %v9065_v24  ;;  %v4834_v32 = vpack.c.bf16 %v4802_v36, %v4801_v7 }
 0x4d4   : > { %6062 = vmatmul.msk.bf16.gmra.mxu0 %vm2794_vm4, %v4593_v6  ;;  %v4594_v6 = vpack.c.bf16 %v4571_v34, %v4570_v23  ;;  %v4331_v34 = vld [vmem:[#allocation2 + $0x134] sm:$0xff]  ;;  %5247 = vst.msk [vmem:[%s8799_s11] sm:$0xff] %vm2794_vm4, %v9065_v24 }
 0x4d5   : > { %6028 = vmatmul.msk.bf16.gmra.mxu2 %vm2794_vm4, %v4347_v39  ;;  %5248 = vst.msk [vmem:[%s8799_s11 + $0x8] sm:$0xff] %vm2794_vm4, %v9065_v24 }
 0x4d6   : > { %6047 = vmatmul.msk.bf16.gmra.mxu3 %vm2794_vm4, %v4348_v13  ;;  %5249 = vst.msk [vmem:[%s8799_s11 + $0x10] sm:$0xff] %vm2794_vm4, %v9065_v24 }
 0x4d7   : > { %5259 = vst.msk [vmem:[%s8799_s11 + $0x60] sm:$0xff] %vm2794_vm4, %v9065_v24 }
 0x4d8   : > { %5250 = vst.msk [vmem:[%s8799_s11 + $0x18] sm:$0xff] %vm2794_vm4, %v9065_v24 }
 0x4d9   : > { %v4686_v11 = vpop.f32.mrf.mxu0  ;;  %5251 = vst.msk [vmem:[%s8799_s11 + $0x20] sm:$0xff] %vm2794_vm4, %v9065_v24 }
 0x4da   : > { %v3987_v27 = vpop.f32.mrf.mxu1  ;;  %v8467_v54 = vadd.f32 %v4686_v11, %v8265_v9  ;;  %v4349_v9 = vpack.c.bf16 %v4330_v8, %v4329_v19  ;;  %v4803_v11 = vld [vmem:[#allocation2 + $0x66] sm:$0xff]  ;;  %5252 = vst.msk [vmem:[%s8799_s11 + $0x28] sm:$0xff] %vm2794_vm4, %v9065_v24 }
 0x4db   : > { %v8470_v43 = vadd.f32 %v3987_v27, %v8153_v28  ;;  %v4804_v28 = vld [vmem:[#allocation2 + $0x6e] sm:$0xff]  ;;  %5253 = vst.msk [vmem:[%s8799_s11 + $0x30] sm:$0xff] %vm2794_vm4, %v9065_v24 }
 0x4dc   : > { %6073 = vmatmul.msk.bf16.gmra.mxu1 %vm2794_vm4, %v4834_v32  ;;  %5254 = vst.msk [vmem:[%s8799_s11 + $0x38] sm:$0xff] %vm2794_vm4, %v9065_v24 }
 0x4dd   : > { %5255 = vst.msk [vmem:[%s8799_s11 + $0x40] sm:$0xff] %vm2794_vm4, %v9065_v24 }
 0x4de   : > { %5256 = vst.msk [vmem:[%s8799_s11 + $0x48] sm:$0xff] %vm2794_vm4, %v9065_v24 }
 0x4df   : > { %5257 = vst.msk [vmem:[%s8799_s11 + $0x50] sm:$0xff] %vm2794_vm4, %v9065_v24 }
 0x4e0   : > { %5258 = vst.msk [vmem:[%s8799_s11 + $0x58] sm:$0xff] %vm2794_vm4, %v9065_v24 }
 0x4e1   : > { %v4689_v39 = vpop.f32.mrf.mxu0  ;;  %5198 = vst.msk [vmem:[%s8287_s27 + $0x150] sm:$0x3f] %vm2837_vm8, %v9065_v24 }
 0x4e2   : > { %v3989_v31 = vpop.f32.mrf.mxu1  ;;  %v8474_v42 = vadd.f32 %v4689_v39, %v8277_v51  ;;  %v4835_v51 = vpack.c.bf16 %v4804_v28, %v4803_v11  ;;  %v4332_v39 = vld [vmem:[#allocation2 + $0x13c] sm:$0xff]  ;;  %5260 = vst.msk [vmem:[%s8799_s11 + $0x68] sm:$0x3f] %vm2837_vm8, %v9065_v24 }
 0x4e3   : > { %v8477_v29 = vadd.f32 %v3989_v31, %v8165_v3  ;;  %v4573_v3 = vld [vmem:[#allocation2 + $0xfd] sm:$0xff] }
 0x4e4   : > { %6063 = vmatmul.msk.bf16.gmra.mxu0 %vm2794_vm4, %v4594_v6  ;;  %v4350_v6 = vpack.c.bf16 %v4332_v39, %v4331_v34 }
 0x4e5   : > { %6029 = vmatmul.msk.bf16.gmra.mxu2 %vm2794_vm4, %v4348_v13  ;;  %v4572_v13 = vld [vmem:[#allocation2 + $0xf5] sm:$0xff] }
 0x4e6   : > { %6048 = vmatmul.msk.bf16.gmra.mxu3 %vm2794_vm4, %v4349_v9  ;;  %v4595_v31 = vpack.c.bf16 %v4573_v3, %v4572_v13  ;;  %v4574_v3 = vld [vmem:[#allocation2 + $0x105] sm:$0xff] }
 0x4e7   : > { %v4807_v13 = vld [vmem:[#allocation2 + $0x86] sm:$0xff] }
 0x4e9   : > { %v4691_v36 = vpop.f32.mrf.mxu0 }
 0x4ea   : > { %v3992_v7 = vpop.f32.mrf.mxu1  ;;  %v8483_v27 = vadd.f32 %v4691_v36, %v8315_v4  ;;  %v4805_v36 = vld [vmem:[#allocation2 + $0x76] sm:$0xff] }
 0x4eb   : > { %v8486_v32 = vadd.f32 %v3992_v7, %v8175_v63  ;;  %v4806_v63 = vld [vmem:[#allocation2 + $0x7e] sm:$0xff] }
 0x4ec   : > { %6074 = vmatmul.msk.bf16.gmra.mxu1 %vm2794_vm4, %v4835_v51 }
 0x4f1   : > { %v4694_v19 = vpop.f32.mrf.mxu0 }
 0x4f2   : > { %v3994_v8 = vpop.f32.mrf.mxu1  ;;  %v8490_v23 = vadd.f32 %v4694_v19, %v8351_v60  ;;  %v4836_v60 = vpack.c.bf16 %v4806_v63, %v4805_v36  ;;  %v4808_v19 = vld [vmem:[#allocation2 + $0x8e] sm:$0xff] }
 0x4f3   : > { %v8493_v4 = vadd.f32 %v3994_v8, %v8187_v41  ;;  %v4575_v41 = vld [vmem:[#allocation2 + $0x10d] sm:$0xff] }
 0x4f4   : > { %6064 = vmatmul.msk.bf16.gmra.mxu0 %vm2794_vm4, %v4595_v31  ;;  %v4596_v39 = vpack.c.bf16 %v4575_v41, %v4574_v3 }
 0x4f5   : > { %6030 = vmatmul.msk.bf16.gmra.mxu2 %vm2794_vm4, %v4349_v9 }
 0x4f6   : > { %6049 = vmatmul.msk.bf16.gmra.mxu3 %vm2794_vm4, %v4350_v6  ;;  %v4576_v6 = vld [vmem:[#allocation2 + $0x115] sm:$0xff] }
 0x4f9   : > { %v4696_v28 = vpop.f32.mrf.mxu0 }
 0x4fa   : > { %v3997_v11 = vpop.f32.mrf.mxu1  ;;  %v8499_v7 = vadd.f32 %v4696_v28, %v8385_v30  ;;  %v4837_v30 = vpack.c.bf16 %v4808_v19, %v4807_v13 }
 0x4fb   : > { %v8502_v51 = vadd.f32 %v3997_v11, %v8197_v1  ;;  %v4577_v1 = vld [vmem:[#allocation2 + $0x11d] sm:$0xff] }
 0x4fc   : > { %6075 = vmatmul.msk.bf16.gmra.mxu1 %vm2794_vm4, %v4836_v60  ;;  %v4597_v28 = vpack.c.bf16 %v4577_v1, %v4576_v6  ;;  %v4809_v11 = vld [vmem:[#allocation2 + $0x96] sm:$0xff] }
 0x502   : > { %v3999_v34 = vpop.f32.mrf.mxu1 }
 0x503   : > { %v8506_v9 = vadd.f32 %v3999_v34, %v8209_v22  ;;  %v4810_v22 = vld [vmem:[#allocation2 + $0x9e] sm:$0xff]  ;;  %v4579_v34 = vld [vmem:[#allocation2 + $0x12d] sm:$0xff] }
 0x504   : > { %6065 = vmatmul.msk.bf16.gmra.mxu0 %vm2794_vm4, %v4596_v39  ;;  %v4838_v41 = vpack.c.bf16 %v4810_v22, %v4809_v11 }
 0x50a   : > { %v4002_v8 = vpop.f32.mrf.mxu1 }
 0x50b   : > { %v8510_v31 = vadd.f32 %v4002_v8, %v8219_v20  ;;  %v4578_v20 = vld [vmem:[#allocation2 + $0x125] sm:$0xff]  ;;  %v8528_v8 = vld [vmem:[%s8979_s4] ss:$0 sm:$0xff] }
 0x50c   : > { %6076 = vmatmul.msk.bf16.gmra.mxu1 %vm2794_vm4, %v4837_v30  ;;  %v4598_v19 = vpack.c.bf16 %v4579_v34, %v4578_v20 }
 0x512   : > { %v4004_v63 = vpop.f32.mrf.mxu1 }
 0x513   : > { %v8514_v36 = vadd.f32 %v4004_v63, %v8231_v15  ;;  %v4812_v15 = vld [vmem:[#allocation2 + $0xae] sm:$0xff] }
 0x514   : > { %6066 = vmatmul.msk.bf16.gmra.mxu0 %vm2794_vm4, %v4597_v28  ;;  %v4581_v28 = vld [vmem:[#allocation2 + $0x13d] sm:$0xff] }
 0x51a   : > { %v4007_v60 = vpop.f32.mrf.mxu1 }
 0x51b   : > { %v8518_v3 = vadd.f32 %v4007_v60, %v8241_v5  ;;  %v4811_v5 = vld [vmem:[#allocation2 + $0xa6] sm:$0xff] }
 0x51c   : > { %6077 = vmatmul.msk.bf16.gmra.mxu1 %vm2794_vm4, %v4838_v41  ;;  %v4839_v1 = vpack.c.bf16 %v4812_v15, %v4811_v5  ;;  %v9067_v60 = vld [vmem:[#allocation17_spill] sm:$0xff]  ;;  %v9068_v15 = vld [vmem:[#allocation18_spill] sm:$0xff] }
 0x522   : > { %v4009_v39 = vpop.f32.mrf.mxu1 }
 0x523   : > { %v8522_v13 = vadd.f32 %v4009_v39, %v8253_v58  ;;  %v4580_v58 = vld [vmem:[#allocation2 + $0x135] sm:$0xff] }
 0x524   : > { %6067 = vmatmul.msk.bf16.gmra.mxu0 %vm2794_vm4, %v4598_v19  ;;  %v4599_v11 = vpack.c.bf16 %v4581_v28, %v4580_v58  ;;  %v4814_v19 = vld [vmem:[#allocation2 + $0xbe] sm:$0xff] }
 0x525   : > { %9066 = vst [vmem:[#allocation16_spill] sm:$0xff] %v8522_v13  ;;  %v9069_v28 = vld [vmem:[#allocation19_spill] sm:$0xff] }
 0x52a   : > { %v4918_v30 = vpop.f32.mrf.mxu1 }
 0x52b   : > { %v5008_v6 = vadd.f32 %v4918_v30, %v8263_v35  ;;  %v4813_v30 = vld [vmem:[#allocation2 + $0xb6] sm:$0xff] }
 0x52c   : > { %6078 = vmatmul.msk.bf16.gmra.mxu1 %vm2794_vm4, %v4839_v1 }
 0x52d   : > { %v5048_v63 = vadd.f32 %v8528_v8, %v5008_v6  ;;  %v4840_v6 = vpack.c.bf16 %v4814_v19, %v4813_v30  ;;  %v8551_v19 = vpop.f32.mrf.mxu2 }
 0x52f   : > { %v5084_v22 = vmax.f32 %v5048_v63, 0.0 }
 0x531   : > { %v5120_v41 = vmul.f32 %v5084_v22, %v9067_v60 }
 0x532   : > { %v4920_v20 = vpop.f32.mrf.mxu1 }
 0x533   : > { %5199 = vst.msk [vmem:[%s8287_s27 + $0x13] sm:$0xff] %vm2794_vm4, %v5120_v41  ;;  %v5009_v34 = vadd.f32 %v4920_v20, %v8275_v38 }
 0x534   : > { %6068 = vmatmul.msk.bf16.gmra.mxu0 %vm2794_vm4, %v4599_v11 }
 0x535   : > { %v5049_v35 = vadd.f32 %v8528_v8, %v5009_v34  ;;  %v4816_v34 = vld [vmem:[#allocation2 + $0xce] sm:$0xff] }
 0x537   : > { %v5085_v39 = vmax.f32 %v5049_v35, 0.0  ;;  %v9070_v35 = vld [vmem:[#allocation3_spill] sm:$0xff] }
 0x539   : > { %v5121_v5 = vmul.f32 %v5085_v39, %v9068_v15  ;;  %v4815_v39 = vld [vmem:[#allocation2 + $0xc6] sm:$0xff] }
 0x53a   : > { %v4923_v1 = vpop.f32.mrf.mxu1 }
 0x53b   : > { %5200 = vst.msk [vmem:[%s8287_s27 + $0x1b] sm:$0xff] %vm2794_vm4, %v5121_v5  ;;  %v5010_v63 = vadd.f32 %v4923_v1, %v8310_v59  ;;  %v4841_v5 = vpack.c.bf16 %v4816_v34, %v4815_v39  ;;  %v8556_v1 = vpop.f32.mrf.mxu3  ;;  %v9072_v34 = vld [vmem:[#allocation4_spill] sm:$0xff] }
 0x53c   : > { %6079 = vmatmul.msk.bf16.gmra.mxu1 %vm2794_vm4, %v4840_v6 }
 0x53d   : > { %v5050_v38 = vadd.f32 %v8528_v8, %v5010_v63  ;;  %v9071_v63 = vld [vmem:[#allocation20_spill] sm:$0xff] }
 0x53f   : > { %v5086_v58 = vmax.f32 %v5050_v38, 0.0 }
 0x541   : > { %v5122_v22 = vmul.f32 %v5086_v58, %v9069_v28 }
 0x542   : > { %v4925_v11 = vpop.f32.mrf.mxu1 }
 0x543   : > { %5201 = vst.msk [vmem:[%s8287_s27 + $0x23] sm:$0xff] %vm2794_vm4, %v5122_v22  ;;  %v5011_v60 = vadd.f32 %v4925_v11, %v8346_v40  ;;  %v8564_v22 = vpop.f32.mrf.mxu2  ;;  %v8567_v11 = vpop.f32.mrf.mxu3 }
 0x545   : > { %v5051_v41 = vadd.f32 %v8528_v8, %v5011_v60 }
 0x547   : > { %v5087_v20 = vmax.f32 %v5051_v41, 0.0  ;;  %v4818_v41 = vld [vmem:[#allocation2 + $0xde] sm:$0xff] }
 0x549   : > { %v5123_v59 = vmul.f32 %v5087_v20, %v9070_v35  ;;  %v8569_v20 = vpop.f32.mrf.mxu0 }
 0x54a   : > { %v4928_v15 = vpop.f32.mrf.mxu1 }
 0x54b   : > { %5202 = vst.msk [vmem:[%s8287_s27 + $0x2b] sm:$0xff] %vm2794_vm4, %v5123_v59  ;;  %v5012_v30 = vadd.f32 %v4928_v15, %v8380_v45  ;;  %v4817_v59 = vld [vmem:[#allocation2 + $0xd6] sm:$0xff] }
 0x54c   : > { %6080 = vmatmul.msk.bf16.gmra.mxu1 %vm2794_vm4, %v4841_v5  ;;  %v4842_v15 = vpack.c.bf16 %v4818_v41, %v4817_v59  ;;  %v5262_v5 = vld [vmem:[%s8287_s27 + $0x1b] sm:$0xff]  ;;  %v9073_v41 = vld [vmem:[#allocation5_spill] sm:$0xff] }
 0x54d   : > { %v5052_v40 = vadd.f32 %v8528_v8, %v5012_v30 }
 0x54f   : > { %v5088_v6 = vmax.f32 %v5052_v40, 0.0 }
 0x551   : > { %v5124_v38 = vmul.f32 %v5088_v6, %v9071_v63  ;;  %v5261_v63 = vld [vmem:[%s8287_s27 + $0x13] sm:$0xff] }
 0x552   : > { %v4930_v58 = vpop.f32.mrf.mxu1  ;;  %v5263_v40 = vld [vmem:[%s8287_s27 + $0x25] sm:$0xff] }
 0x553   : > { %5203 = vst.msk [vmem:[%s8287_s27 + $0x33] sm:$0xff] %vm2794_vm4, %v5124_v38  ;;  %v5013_v28 = vadd.f32 %v4930_v58, %v8415_v62  ;;  %v5265_v58 = vmax.f32 %v5261_v63, %v5263_v40  ;;  %v9074_v40 = vld [vmem:[#allocation6_spill] sm:$0xff] }
 0x555   : > { %v5053_v45 = vadd.f32 %v8528_v8, %v5013_v28  ;;  %v8581_v28 = vpop.f32.mrf.mxu2 }
 0x557   : > { %v5089_v60 = vmax.f32 %v5053_v45, 0.0 }
 0x559   : > { %v5125_v35 = vmul.f32 %v5089_v60, %v9072_v34  ;;  %v8583_v60 = vpop.f32.mrf.mxu3  ;;  %v8586_v34 = vpop.f32.mrf.mxu0 }
 0x55a   : > { %v4933_v39 = vpop.f32.mrf.mxu1  ;;  %v5264_v30 = vld [vmem:[%s8287_s27 + $0x2d] sm:$0xff] }
 0x55b   : > { %5204 = vst.msk [vmem:[%s8287_s27 + $0x3b] sm:$0xff] %vm2794_vm4, %v5125_v35  ;;  %v5014_v62 = vadd.f32 %v4933_v39, %v8446_v57  ;;  %v5266_v6 = vmax.f32 %v5262_v5, %v5264_v30  ;;  %v4820_v5 = vld [vmem:[#allocation2 + $0xee] sm:$0xff] }
 0x55c   : > { %6081 = vmatmul.msk.bf16.gmra.mxu1 %vm2794_vm4, %v4842_v15 }
 0x55d   : > { %v5054_v38 = vadd.f32 %v8528_v8, %v5014_v62  ;;  %5285 = vmatpush.msrb.mxu2 %v5266_v6  ;;  %5308 = vmatpush.msrb.mxu3 %v5266_v6  ;;  %v8592_v30 = vpop.f32.mrf.mxu2  ;;  %v4819_v6 = vld [vmem:[#allocation2 + $0xe6] sm:$0xff] }
 0x55f   : > { %v5090_v45 = vmax.f32 %v5054_v38, 0.0  ;;  %5286 = vmatpush.msrb.mxu2 %v5265_v58  ;;  %5309 = vmatpush.msrb.mxu3 %v5265_v58  ;;  %v4843_v58 = vpack.c.bf16 %v4820_v5, %v4819_v6  ;;  %v4822_v6 = vld [vmem:[#allocation2 + $0xfe] sm:$0xff] }
 0x561   : > { %v5126_v57 = vmul.f32 %v5090_v45, %v9073_v41  ;;  %v8595_v63 = vpop.f32.mrf.mxu3  ;;  %v8600_v41 = vpop.f32.mrf.mxu0 }
 0x562   : > { %v4935_v35 = vpop.f32.mrf.mxu1 }
 0x563   : > { %5205 = vst.msk [vmem:[%s8287_s27 + $0x43] sm:$0xff] %vm2794_vm4, %v5126_v57  ;;  %v5015_v59 = vadd.f32 %v4935_v35, %v8467_v54 }
 0x565   : > { %v5055_v39 = vadd.f32 %v8528_v8, %v5015_v59  ;;  %v8605_v59 = vpop.f32.mrf.mxu2 }
 0x567   : > { %v5091_v15 = vmax.f32 %v5055_v39, 0.0 }
 0x569   : > { %v5127_v62 = vmul.f32 %v5091_v15, %v9074_v40  ;;  %v8610_v15 = vpop.f32.mrf.mxu3  ;;  %v8613_v40 = vpop.f32.mrf.mxu0 }
 0x56a   : > { %v4938_v38 = vpop.f32.mrf.mxu1 }
 0x56b   : > { %5206 = vst.msk [vmem:[%s8287_s27 + $0x4b] sm:$0xff] %vm2794_vm4, %v5127_v62  ;;  %v5016_v45 = vadd.f32 %v4938_v38, %v8474_v42  ;;  %v4821_v38 = vld [vmem:[#allocation2 + $0xf6] sm:$0xff] }
 0x56c   : > { %6082 = vmatmul.msk.bf16.gmra.mxu1 %vm2794_vm4, %v4843_v58 }
 0x56d   : > { %v5056_v54 = vadd.f32 %v8528_v8, %v5016_v45  ;;  %v4844_v45 = vpack.c.bf16 %v4822_v6, %v4821_v38  ;;  %v5235_v6 = vlaneseq }
 0x56f   : > { %v5092_v57 = vmax.f32 %v5056_v54, 0.0  ;;  %v5317_v54 = vld [vmem:[%s8287_s27 + $0x3f] sm:$0xff] }
 0x571   : > { %v5128_v35 = vmul.f32 %v5092_v57, %v7347_v48 }
 0x572   : > { %v4940_v39 = vpop.f32.mrf.mxu1  ;;  %v5318_v13 = vld [vmem:[%s8287_s27 + $0x49] sm:$0xff] }
 0x573   : > { %5207 = vst.msk [vmem:[%s8287_s27 + $0x53] sm:$0xff] %vm2794_vm4, %v5128_v35  ;;  %v5017_v42 = vadd.f32 %v4940_v39, %v8483_v27  ;;  %v8622_v39 = vpop.f32.mrf.mxu2 }
 0x575   : > { %v5057_v5 = vadd.f32 %v8528_v8, %v5017_v42  ;;  %v5316_v42 = vld [vmem:[%s8287_s27 + $0x37] sm:$0xff] }
 0x577   : > { %v5093_v62 = vmax.f32 %v5057_v5, 0.0 }
 0x579   : > { %v5129_v48 = vmul.f32 %v5093_v62, %v7368_v12  ;;  %v5320_v12 = vmax.f32 %v5316_v42, %v5318_v13  ;;  %v8627_v62 = vpop.f32.mrf.mxu3 }
 0x57a   : > { %v4943_v58 = vpop.f32.mrf.mxu1  ;;  %v5319_v57 = vld [vmem:[%s8287_s27 + $0x51] sm:$0xff] }
 0x57b   : > { %5208 = vst.msk [vmem:[%s8287_s27 + $0x5b] sm:$0xff] %vm2794_vm4, %v5129_v48  ;;  %v5018_v27 = vadd.f32 %v4943_v58, %v8490_v23  ;;  %v5321_v35 = vmax.f32 %v5317_v54, %v5319_v57  ;;  %v8629_v48 = vpop.f32.mrf.mxu0  ;;  %v5236_v23 = vshrl.u32 %v5235_v6, 7 }
 0x57c   : > { %6083 = vmatmul.msk.bf16.gmra.mxu1 %vm2794_vm4, %v4844_v45  ;;  %v4273_v45 = vadd.f32 %v8551_v19, %v8192_v37 }
 0x57d   : > { %v5058_v5 = vadd.f32 %v8528_v8, %v5018_v27  ;;  %5336 = vmatpush.msra.mxu2 %v5321_v35  ;;  %5356 = vmatpush.msra.mxu3 %v5321_v35  ;;  %v5239_v57 = vmul.u32 2, %v5236_v23  ;;  %v5238_v27 = vand.u32 127, %v5235_v6  ;;  %v4823_v23 = vld [vmem:[#allocation2 + $0x106] sm:$0xff] }
 0x57f   : > { %v5094_v38 = vmax.f32 %v5058_v5, 0.0  ;;  %5337 = vmatpush.msra.mxu2 %v5320_v12  ;;  %5357 = vmatpush.msra.mxu3 %v5320_v12  ;;  %v5243_v35 = vadd.s32 1, %v5239_v57  ;;  %v4522_v5 = vadd.f32 %v8556_v1, %v4273_v45  ;;  %v8639_v12 = vpop.f32.mrf.mxu2  ;;  %vm5240_vm5 = vcmp.eq.s32.totalorder %v5238_v27, %v5239_v57 }
 0x580   : > { %v8642_v37 = vsel %vm5240_vm5, 1.0, %v9065_v24  ;;  %v4274_v57 = vadd.f32 %v8564_v22, %v8202_v14 }
 0x581   : > { %v5130_v58 = vmul.f32 %v5094_v38, %v7389_v53  ;;  %vm5244_vm6 = vcmp.eq.s32.totalorder %v5238_v27, %v5243_v35  ;;  %v4824_v38 = vld [vmem:[#allocation2 + $0x10e] sm:$0xff]  ;;  %6090 = vmatmul.msk.f32.vlgmr.msrb.gmra.mxu2 %vm5267_vm7, %v8642_v37  ;;  %v4771_v1 = vadd.f32 %v8569_v20, %v4522_v5 }
 0x582   : > { %v4945_v54 = vpop.f32.mrf.mxu1  ;;  %v8645_v19 = vsel %vm5244_vm6, 1.0, %v9065_v24  ;;  %v4523_v20 = vadd.f32 %v8567_v11, %v4274_v57  ;;  %v4275_v11 = vadd.f32 %v8581_v28, %v8214_v56 }
 0x583   : > { %5209 = vst.msk [vmem:[%s8287_s27 + $0x63] sm:$0xff] %vm2794_vm4, %v5130_v58  ;;  %v5019_v13 = vadd.f32 %v4945_v54, %v8499_v7  ;;  %v8647_v7 = vpop.f32.mrf.mxu3  ;;  %6091 = vmatmul.msk.f32.vlgmr.msrb.gmra.mxu3 %vm5267_vm7, %v8645_v19  ;;  %v8655_v58 = vpop.f32.mrf.mxu0  ;;  %v4845_v54 = vpack.c.bf16 %v4824_v38, %v4823_v23 }
 0x584   : > { %v4772_v14 = vadd.f32 %v8586_v34, %v4523_v20  ;;  %v4826_v34 = vld [vmem:[#allocation2 + $0x11e] sm:$0xff] }
 0x585   : > { %v5059_v42 = vadd.f32 %v8528_v8, %v5019_v13 }
 0x587   : > { %v5095_v53 = vmax.f32 %v5059_v42, 0.0 }
 0x589   : > { %v5131_v6 = vmul.f32 %v5095_v53, %v7404_v17  ;;  %v8664_v17 = vpop.f32.mrf.mxu2  ;;  %6092 = vmatmul.msk.f32.vlgmr.msra.gmra.mxu2 %vm5267_vm7, %v8642_v37 }
 0x58a   : > { %v4948_v45 = vpop.f32.mrf.mxu1 }
 0x58b   : > { %5210 = vst.msk [vmem:[%s8287_s27 + $0x6b] sm:$0xff] %vm2794_vm4, %v5131_v6  ;;  %v5020_v13 = vadd.f32 %v4948_v45, %v4771_v1  ;;  %6093 = vmatmul.msk.f32.vlgmr.msra.gmra.mxu3 %vm5267_vm7, %v8645_v19  ;;  %v8672_v42 = vpop.f32.mrf.mxu3  ;;  %v8678_v38 = vpop.f32.mrf.mxu0  ;;  %v4524_v6 = vadd.f32 %v8583_v60, %v4275_v11 }
 0x58c   : > { %6084 = vmatmul.msk.bf16.gmra.mxu1 %vm2794_vm4, %v4845_v54  ;;  %v4825_v54 = vld [vmem:[#allocation2 + $0x116] sm:$0xff] }
 0x58d   : > { %v5060_v27 = vadd.f32 %v8528_v8, %v5020_v13  ;;  %v4846_v28 = vpack.c.bf16 %v4826_v34, %v4825_v54  ;;  %v4276_v13 = vadd.f32 %v8592_v30, %v8224_v44  ;;  %v5364_v34 = vld [vmem:[%s8287_s27 + $0x5b] sm:$0xff] }
 0x58f   : > { %v5096_v35 = vmax.f32 %v5060_v27, 0.0  ;;  %v4525_v20 = vadd.f32 %v8595_v63, %v4276_v13 }
 0x591   : > { %v5132_v22 = vmul.f32 %v5096_v35, %v7420_v18  ;;  %v4773_v18 = vadd.f32 %v8600_v41, %v4524_v6  ;;  %v8684_v57 = vpop.f32.mrf.mxu2 }
 0x592   : > { %v4950_v5 = vpop.f32.mrf.mxu1 }
 0x593   : > { %5211 = vst.msk [vmem:[%s8287_s27 + $0x73] sm:$0xff] %vm2794_vm4, %v5132_v22  ;;  %v5021_v53 = vadd.f32 %v4950_v5, %v4772_v14  ;;  %v8690_v27 = vpop.f32.mrf.mxu3  ;;  %v8694_v41 = vpop.f32.mrf.mxu0  ;;  %v4774_v14 = vadd.f32 %v8613_v40, %v4525_v20  ;;  %v5365_v22 = vld [vmem:[%s8287_s27 + $0x63] sm:$0xff] }
 0x595   : > { %v5061_v1 = vadd.f32 %v8528_v8, %v5021_v53  ;;  %v4277_v53 = vadd.f32 %v8605_v59, %v8236_v16  ;;  %v4827_v16 = vld [vmem:[#allocation2 + $0x126] sm:$0xff]  ;;  %v4828_v59 = vld [vmem:[#allocation2 + $0x12e] sm:$0xff] }
 0x597   : > { %v5097_v23 = vmax.f32 %v5061_v1, 0.0 }
 0x599   : > { %v5133_v45 = vmul.f32 %v5097_v23, %v7435_v21  ;;  %v8706_v23 = vpop.f32.mrf.mxu2 }
 0x59a   : > { %v4953_v56 = vpop.f32.mrf.mxu1  ;;  %v5366_v11 = vld [vmem:[%s8287_s27 + $0x6d] sm:$0xff] }
 0x59b   : > { %5212 = vst.msk [vmem:[%s8287_s27 + $0x7b] sm:$0xff] %vm2794_vm4, %v5133_v45  ;;  %v5022_v60 = vadd.f32 %v4953_v56, %v4773_v18  ;;  %v5368_v40 = vmax.f32 %v5364_v34, %v5366_v11  ;;  %v4526_v18 = vadd.f32 %v8610_v15, %v4277_v53  ;;  %v8713_v54 = vpop.f32.mrf.mxu0  ;;  %v4847_v15 = vpack.c.bf16 %v4828_v59, %v4827_v16  ;;  %v4829_v53 = vld [vmem:[#allocation2 + $0x136] sm:$0xff] }
 0x59c   : > { %6085 = vmatmul.msk.bf16.gmra.mxu1 %vm2794_vm4, %v4846_v28  ;;  %v9075_v59 = vld [vmem:[#allocation7_spill] sm:$0xff] }
 0x59d   : > { %v5062_v21 = vadd.f32 %v8528_v8, %v5022_v60  ;;  %v4775_v56 = vadd.f32 %v8629_v48, %v4526_v18  ;;  %v4278_v60 = vadd.f32 %v8622_v39, %v8246_v61  ;;  %v4279_v39 = vadd.f32 %v8639_v12, %v8258_v10 }
 0x59f   : > { %v5098_v35 = vmax.f32 %v5062_v21, 0.0 }
 0x5a1   : > { %v5134_v44 = vmul.f32 %v5098_v35, %v7454_v49  ;;  %v8710_v49 = vpop.f32.mrf.mxu3  ;;  %v8727_v35 = vpop.f32.mrf.mxu2 }
 0x5a2   : > { %v4955_v30 = vpop.f32.mrf.mxu1  ;;  %v5367_v5 = vld [vmem:[%s8287_s27 + $0x75] sm:$0xff] }
 0x5a3   : > { %5213 = vst.msk [vmem:[%s8287_s27 + $0x83] sm:$0xff] %vm2794_vm4, %v5134_v44  ;;  %v5023_v1 = vadd.f32 %v4955_v30, %v4774_v14  ;;  %v5369_v6 = vmax.f32 %v5365_v22, %v5367_v5  ;;  %v4527_v14 = vadd.f32 %v8627_v62, %v4278_v60  ;;  %v4721_v22 = vpop.f32.mrf.mxu0  ;;  %v4830_v62 = vld [vmem:[#allocation2 + $0x13e] sm:$0xff]  ;;  %v4281_v60 = vadd.f32 %v8684_v57, %v8280_v50  ;;  %v9076_v57 = vld [vmem:[#allocation21_spill] sm:$0xff] }
 0x5a5   : > { %v5063_v63 = vadd.f32 %v8528_v8, %v5023_v1  ;;  %5384 = vmatpush.msrb.mxu2 %v5369_v6  ;;  %5404 = vmatpush.msrb.mxu3 %v5369_v6  ;;  %v4528_v1 = vadd.f32 %v8647_v7, %v4279_v39 }
 0x5a7   : > { %v5099_v45 = vmax.f32 %v5063_v63, 0.0  ;;  %5385 = vmatpush.msrb.mxu2 %v5368_v40  ;;  %5405 = vmatpush.msrb.mxu3 %v5368_v40  ;;  %v4280_v40 = vadd.f32 %v8664_v17, %v8268_v33 }
 0x5a8   : > { %6094 = vmatmul.msk.f32.vlgmr.msrb.gmra.mxu2 %vm5267_vm7, %v8642_v37  ;;  %6095 = vmatmul.msk.f32.vlgmr.msrb.gmra.mxu3 %vm5267_vm7, %v8645_v19 }
 0x5a9   : > { %v5135_v28 = vmul.f32 %v5099_v45, %v7469_v0  ;;  %v8730_v44 = vpop.f32.mrf.mxu3  ;;  %v4776_v0 = vadd.f32 %v8655_v58, %v4527_v14  ;;  %v8740_v34 = vpop.f32.mrf.mxu2  ;;  %v4848_v58 = vpack.c.bf16 %v4830_v62, %v4829_v53 }
 0x5aa   : > { %v4958_v13 = vpop.f32.mrf.mxu1 }
 0x5ab   : > { %5214 = vst.msk [vmem:[%s8287_s27 + $0x8b] sm:$0xff] %vm2794_vm4, %v5135_v28  ;;  %v5024_v21 = vadd.f32 %v4958_v13, %v4775_v56  ;;  %v4724_v18 = vpop.f32.mrf.mxu0 }
 0x5ac   : > { %6086 = vmatmul.msk.bf16.gmra.mxu1 %vm2794_vm4, %v4847_v15 }
 0x5ad   : > { %v5064_v20 = vadd.f32 %v8528_v8, %v5024_v21 }
 0x5af   : > { %v5100_v48 = vmax.f32 %v5064_v20, 0.0 }
 0x5b1   : > { %v5136_v30 = vmul.f32 %v5100_v48, %v7490_v47  ;;  %v4777_v47 = vadd.f32 %v8678_v38, %v4528_v1  ;;  %v8744_v10 = vpop.f32.mrf.mxu3  ;;  %v8755_v28 = vpop.f32.mrf.mxu2 }
 0x5b2   : > { %v4960_v61 = vpop.f32.mrf.mxu1  ;;  %v5413_v17 = vld [vmem:[%s8287_s27 + $0x87] sm:$0xff] }
 0x5b3   : > { %5215 = vst.msk [vmem:[%s8287_s27 + $0x93] sm:$0xff] %vm2794_vm4, %v5136_v30  ;;  %v5025_v5 = vadd.f32 %v4960_v61, %v4776_v0  ;;  %v4726_v0 = vpop.f32.mrf.mxu0  ;;  %v4530_v30 = vadd.f32 %v8690_v27, %v4281_v60 }
 0x5b5   : > { %v5065_v11 = vadd.f32 %v8528_v8, %v5025_v5  ;;  %v4779_v50 = vadd.f32 %v8713_v54, %v4530_v30 }
 0x5b7   : > { %v5101_v6 = vmax.f32 %v5065_v11, 0.0  ;;  %v4282_v11 = vadd.f32 %v8706_v23, %v8318_v2  ;;  %v4283_v2 = vadd.f32 %v8727_v35, %v8354_v52  ;;  %v4284_v52 = vadd.f32 %v8740_v34, %v8388_v46 }
 0x5b9   : > { %v5137_v63 = vmul.f32 %v5101_v6, %v7507_v55  ;;  %v4529_v55 = vadd.f32 %v8672_v42, %v4280_v40  ;;  %v8764_v14 = vpop.f32.mrf.mxu3  ;;  %v5412_v42 = vld [vmem:[%s8287_s27 + $0x7f] sm:$0xff]  ;;  %v4233_v53 = vpop.f32.mrf.mxu2  ;;  %v4531_v6 = vadd.f32 %v8710_v49, %v4282_v11 }
 0x5ba   : > { %v4963_v12 = vpop.f32.mrf.mxu1  ;;  %v5414_v15 = vld [vmem:[%s8287_s27 + $0x91] sm:$0xff] }
 0x5bb   : > { %5216 = vst.msk [vmem:[%s8287_s27 + $0x9b] sm:$0xff] %vm2794_vm4, %v5137_v63  ;;  %v5026_v7 = vadd.f32 %v4963_v12, %v4777_v47  ;;  %v4778_v16 = vadd.f32 %v8694_v41, %v4529_v55  ;;  %v5416_v48 = vmax.f32 %v5412_v42, %v5414_v15  ;;  %v4729_v54 = vpop.f32.mrf.mxu0  ;;  %v4780_v47 = vadd.f32 %v4721_v22, %v4531_v6  ;;  %v9077_v63 = vld [vmem:[#allocation22_spill] sm:$0xff] }
 0x5bc   : > { %6087 = vmatmul.msk.bf16.gmra.mxu1 %vm2794_vm4, %v4848_v58  ;;  %v4532_v55 = vadd.f32 %v8730_v44, %v4283_v2 }
 0x5bd   : > { %v5066_v38 = vadd.f32 %v8528_v8, %v5026_v7 }
 0x5be   : > { %v4781_v22 = vadd.f32 %v4724_v18, %v4532_v55  ;;  %v4533_v18 = vadd.f32 %v8744_v10, %v4284_v52 }
 0x5bf   : > { %v5102_v45 = vmax.f32 %v5066_v38, 0.0 }
 0x5c1   : > { %v5138_v56 = vmul.f32 %v5102_v45, %v9075_v59  ;;  %v8780_v1 = vpop.f32.mrf.mxu3  ;;  %v8789_v38 = vpop.f32.mrf.mxu2 }
 0x5c2   : > { %v4965_v33 = vpop.f32.mrf.mxu1  ;;  %v5415_v13 = vld [vmem:[%s8287_s27 + $0x99] sm:$0xff] }
 0x5c3   : > { %5217 = vst.msk [vmem:[%s8287_s27 + $0xa3] sm:$0xff] %vm2794_vm4, %v5138_v56  ;;  %v5027_v21 = vadd.f32 %v4965_v33, %v4778_v16  ;;  %v5417_v20 = vmax.f32 %v5413_v17, %v5415_v13  ;;  %v9078_v16 = vld [vmem:[#allocation23_spill] sm:$0xff]  ;;  %v4731_v56 = vpop.f32.mrf.mxu0  ;;  %v4782_v17 = vadd.f32 %v4726_v0, %v4533_v18  ;;  %v9079_v13 = vld [vmem:[#allocation24_spill] sm:$0xff]  ;;  %v9080_v0 = vld [vmem:[#allocation25_spill] sm:$0xff] }
 0x5c5   : > { %v5067_v41 = vadd.f32 %v8528_v8, %v5027_v21  ;;  %5432 = vmatpush.msra.mxu2 %v5417_v20  ;;  %5452 = vmatpush.msra.mxu3 %v5417_v20  ;;  %v4285_v21 = vadd.f32 %v8755_v28, %v8421_v25 }
 0x5c7   : > { %v5103_v61 = vmax.f32 %v5067_v41, 0.0  ;;  %5433 = vmatpush.msra.mxu2 %v5416_v48  ;;  %5453 = vmatpush.msra.mxu3 %v5416_v48  ;;  %v4534_v25 = vadd.f32 %v8764_v14, %v4285_v21  ;;  %v4286_v14 = vadd.f32 %v4233_v53, %v8452_v26  ;;  %v9081_v53 = vld [vmem:[#allocation26_spill] sm:$0xff] }
 0x5c8   : > { %6096 = vmatmul.msk.f32.vlgmr.msra.gmra.mxu2 %vm5267_vm7, %v8642_v37  ;;  %6097 = vmatmul.msk.f32.vlgmr.msra.gmra.mxu3 %vm5267_vm7, %v8645_v19 }
 0x5c9   : > { %v5139_v39 = vmul.f32 %v5103_v61, %v9076_v57  ;;  %v8792_v45 = vpop.f32.mrf.mxu3  ;;  %v4238_v34 = vpop.f32.mrf.mxu2  ;;  %v4783_v48 = vadd.f32 %v4729_v54, %v4534_v25 }
 0x5ca   : > { %v4968_v5 = vpop.f32.mrf.mxu1  ;;  %v5460_v6 = vld [vmem:[%s8287_s27 + $0xa3] sm:$0xff] }
 0x5cb   : > { %5218 = vst.msk [vmem:[%s8287_s27 + $0xab] sm:$0xff] %vm2794_vm4, %v5139_v39  ;;  %v5028_v27 = vadd.f32 %v4968_v5, %v4779_v50  ;;  %v4734_v42 = vpop.f32.mrf.mxu0 }
 0x5cd   : > { %v5068_v62 = vadd.f32 %v8528_v8, %v5028_v27 }
 0x5cf   : > { %v5104_v58 = vmax.f32 %v5068_v62, 0.0 }
 0x5d1   : > { %v5140_v12 = vmul.f32 %v5104_v58, %v9077_v63  ;;  %v4487_v60 = vpop.f32.mrf.mxu3  ;;  %v4241_v61 = vpop.f32.mrf.mxu2  ;;  %v4535_v63 = vadd.f32 %v8780_v1, %v4286_v14 }
 0x5d2   : > { %v4970_v40 = vpop.f32.mrf.mxu1  ;;  %v5461_v57 = vld [vmem:[%s8287_s27 + $0xab] sm:$0xff] }
 0x5d3   : > { %5219 = vst.msk [vmem:[%s8287_s27 + $0xb3] sm:$0xff] %vm2794_vm4, %v5140_v12  ;;  %v5029_v23 = vadd.f32 %v4970_v40, %v4780_v47  ;;  %v4736_v47 = vpop.f32.mrf.mxu0  ;;  %v4784_v26 = vadd.f32 %v4731_v56, %v4535_v63  ;;  %v9082_v56 = vld [vmem:[#allocation27_spill] sm:$0xff] }
 0x5d5   : > { %v5069_v7 = vadd.f32 %v8528_v8, %v5029_v23  ;;  %v4287_v23 = vadd.f32 %v8789_v38, %v8470_v43 }
 0x5d7   : > { %v5105_v49 = vmax.f32 %v5069_v7, 0.0 }
 0x5d9   : > { %v5141_v59 = vmul.f32 %v5105_v49, %v9078_v16  ;;  %v4490_v62 = vpop.f32.mrf.mxu3  ;;  %v4243_v7 = vpop.f32.mrf.mxu2 }
 0x5da   : > { %v4973_v33 = vpop.f32.mrf.mxu1  ;;  %v4290_v14 = vadd.f32 %v4243_v7, %v8493_v4 }
 0x5db   : > { %5220 = vst.msk [vmem:[%s8287_s27 + $0xbb] sm:$0xff] %vm2794_vm4, %v5141_v59  ;;  %v5030_v35 = vadd.f32 %v4973_v33, %v4781_v22  ;;  %v4536_v22 = vadd.f32 %v8792_v45, %v4287_v23  ;;  %v4739_v59 = vpop.f32.mrf.mxu0 }
 0x5dd   : > { %v5070_v44 = vadd.f32 %v8528_v8, %v5030_v35  ;;  %v4785_v33 = vadd.f32 %v4734_v42, %v4536_v22  ;;  %v9086_v22 = vld [vmem:[#allocation9_spill] sm:$0xff] }
 0x5df   : > { %v5106_v46 = vmax.f32 %v5070_v44, 0.0  ;;  %v4288_v44 = vadd.f32 %v4238_v34, %v8477_v29  ;;  %v4289_v29 = vadd.f32 %v4241_v61, %v8486_v32 }
 0x5e1   : > { %v5142_v15 = vmul.f32 %v5106_v46, %v9079_v13  ;;  %v4492_v49 = vpop.f32.mrf.mxu3  ;;  %v4246_v18 = vpop.f32.mrf.mxu2  ;;  %v4537_v46 = vadd.f32 %v4487_v60, %v4288_v44  ;;  %v4538_v60 = vadd.f32 %v4490_v62, %v4289_v29 }
 0x5e2   : > { %v4975_v10 = vpop.f32.mrf.mxu1  ;;  %v5462_v5 = vld [vmem:[%s8287_s27 + $0xb5] sm:$0xff] }
 0x5e3   : > { %5221 = vst.msk [vmem:[%s8287_s27 + $0xc3] sm:$0xff] %vm2794_vm4, %v5142_v15  ;;  %v5031_v20 = vadd.f32 %v4975_v10, %v4782_v17  ;;  %v5464_v54 = vmax.f32 %v5460_v6, %v5462_v5  ;;  %v4786_v45 = vadd.f32 %v4736_v47, %v4537_v46  ;;  %v9083_v15 = vld [vmem:[#allocation28_spill] sm:$0xff]  ;;  %v4741_v21 = vpop.f32.mrf.mxu0  ;;  %v9087_v46 = vld [vmem:[#allocation10_spill] sm:$0xff] }
 0x5e4   : > { %v9085_v47 = vld [vmem:[#allocation8_spill] sm:$0xff] }
 0x5e5   : > { %v5071_v41 = vadd.f32 %v8528_v8, %v5031_v20 }
 0x5e7   : > { %v5107_v28 = vmax.f32 %v5071_v41, 0.0 }
 0x5e9   : > { %v5143_v30 = vmul.f32 %v5107_v28, %v9080_v0  ;;  %v4495_v13 = vpop.f32.mrf.mxu3  ;;  %v4248_v25 = vpop.f32.mrf.mxu2  ;;  %v4787_v28 = vadd.f32 %v4739_v59, %v4538_v60 }
 0x5ea   : > { %v4978_v50 = vpop.f32.mrf.mxu1  ;;  %v5463_v39 = vld [vmem:[%s8287_s27 + $0xbd] sm:$0xff] }
 0x5eb   : > { %5222 = vst.msk [vmem:[%s8287_s27 + $0xcb] sm:$0xff] %vm2794_vm4, %v5143_v30  ;;  %v5032_v11 = vadd.f32 %v4978_v50, %v4783_v48  ;;  %v5465_v27 = vmax.f32 %v5461_v57, %v5463_v39  ;;  %v9084_v48 = vld [vmem:[#allocation29_spill] sm:$0xff] }
 0x5ed   : > { %v5072_v58 = vadd.f32 %v8528_v8, %v5032_v11  ;;  %5480 = vmatpush.msrb.mxu2 %v5465_v27  ;;  %5500 = vmatpush.msrb.mxu3 %v5465_v27  ;;  %v4744_v11 = vpop.f32.mrf.mxu0 }
 0x5ef   : > { %v5108_v12 = vmax.f32 %v5072_v58, 0.0  ;;  %5481 = vmatpush.msrb.mxu2 %v5464_v54  ;;  %5501 = vmatpush.msrb.mxu3 %v5464_v54  ;;  %v4539_v58 = vadd.f32 %v4492_v49, %v4290_v14 }
 0x5f0   : > { %6098 = vmatmul.msk.f32.vlgmr.msrb.gmra.mxu2 %vm5267_vm7, %v8642_v37  ;;  %6099 = vmatmul.msk.f32.vlgmr.msrb.gmra.mxu3 %vm5267_vm7, %v8645_v19 }
 0x5f1   : > { %v5144_v40 = vmul.f32 %v5108_v12, %v9081_v53  ;;  %v4497_v30 = vpop.f32.mrf.mxu3  ;;  %v4788_v4 = vadd.f32 %v4741_v21, %v4539_v58  ;;  %v4251_v12 = vpop.f32.mrf.mxu2  ;;  %v4291_v53 = vadd.f32 %v4246_v18, %v8502_v51 }
 0x5f2   : > { %v4980_v2 = vpop.f32.mrf.mxu1  ;;  %v5508_v27 = vld [vmem:[%s8287_s27 + $0xc7] sm:$0xff] }
 0x5f3   : > { %5223 = vst.msk [vmem:[%s8287_s27 + $0xd3] sm:$0xff] %vm2794_vm4, %v5144_v40  ;;  %v5033_v1 = vadd.f32 %v4980_v2, %v4784_v26  ;;  %v4540_v7 = vadd.f32 %v4495_v13, %v4291_v53 }
 0x5f5   : > { %v5073_v55 = vadd.f32 %v8528_v8, %v5033_v1  ;;  %v4746_v1 = vpop.f32.mrf.mxu0  ;;  %v4789_v49 = vadd.f32 %v4744_v11, %v4540_v7  ;;  %v9091_v7 = vld [vmem:[#allocation16_spill] sm:$0xff] }
 0x5f7   : > { %v5109_v16 = vmax.f32 %v5073_v55, 0.0 }
 0x5f9   : > { %v5145_v52 = vmul.f32 %v5109_v16, %v9082_v56  ;;  %v4500_v2 = vpop.f32.mrf.mxu3  ;;  %v4253_v51 = vpop.f32.mrf.mxu2 }
 0x5fa   : > { %v4983_v35 = vpop.f32.mrf.mxu1  ;;  %v5509_v57 = vld [vmem:[%s8287_s27 + $0xcf] sm:$0xff] }
 0x5fb   : > { %5224 = vst.msk [vmem:[%s8287_s27 + $0xdb] sm:$0xff] %vm2794_vm4, %v5145_v52  ;;  %v5034_v43 = vadd.f32 %v4983_v35, %v4785_v33  ;;  %v4292_v33 = vadd.f32 %v4248_v25, %v8506_v9 }
 0x5fd   : > { %v5074_v38 = vadd.f32 %v8528_v8, %v5034_v43  ;;  %v4541_v44 = vadd.f32 %v4497_v30, %v4292_v33 }
 0x5ff   : > { %v5110_v17 = vmax.f32 %v5074_v38, 0.0  ;;  %v4749_v38 = vpop.f32.mrf.mxu0  ;;  %v4790_v18 = vadd.f32 %v4746_v1, %v4541_v44 }
 0x601   : > { %v5146_v10 = vmul.f32 %v5110_v17, %v9083_v15  ;;  %v4502_v35 = vpop.f32.mrf.mxu3 }
 0x602   : > { %v4985_v20 = vpop.f32.mrf.mxu1  ;;  %v5510_v5 = vld [vmem:[%s8287_s27 + $0xd9] sm:$0xff] }
 0x603   : > { %5225 = vst.msk [vmem:[%s8287_s27 + $0xe3] sm:$0xff] %vm2794_vm4, %v5146_v10  ;;  %v5035_v34 = vadd.f32 %v4985_v20, %v4786_v45  ;;  %v5512_v6 = vmax.f32 %v5508_v27, %v5510_v5  ;;  %v4293_v45 = vadd.f32 %v4251_v12, %v8510_v31  ;;  %v4256_v10 = vpop.f32.mrf.mxu2  ;;  %v4294_v31 = vadd.f32 %v4253_v51, %v8514_v36  ;;  %v9089_v5 = vld [vmem:[#allocation12_spill] sm:$0xff] }
 0x605   : > { %v5075_v42 = vadd.f32 %v8528_v8, %v5035_v34  ;;  %v4542_v20 = vadd.f32 %v4500_v2, %v4293_v45  ;;  %v9093_v45 = vld [vmem:[#allocation15_spill] sm:$0xff] }
 0x607   : > { %v5111_v41 = vmax.f32 %v5075_v42, 0.0  ;;  %v4791_v34 = vadd.f32 %v4749_v38, %v4542_v20  ;;  %v9088_v42 = vld [vmem:[#allocation11_spill] sm:$0xff] }
 0x609   : > { %v5147_v0 = vmul.f32 %v5111_v41, %v9084_v48  ;;  %v4505_v21 = vpop.f32.mrf.mxu3  ;;  %v4751_v41 = vpop.f32.mrf.mxu0 }
 0x60a   : > { %v4988_v50 = vpop.f32.mrf.mxu1  ;;  %v5511_v39 = vld [vmem:[%s8287_s27 + $0xe1] sm:$0xff] }
 0x60b   : > { %5226 = vst.msk [vmem:[%s8287_s27 + $0xeb] sm:$0xff] %vm2794_vm4, %v5147_v0  ;;  %v5036_v32 = vadd.f32 %v4988_v50, %v4787_v28  ;;  %v5513_v61 = vmax.f32 %v5509_v57, %v5511_v39  ;;  %v4543_v0 = vadd.f32 %v4502_v35, %v4294_v31  ;;  %v4258_v50 = vpop.f32.mrf.mxu2  ;;  %v9092_v35 = vld [vmem:[#allocation14_spill] sm:$0xff] }
 0x60d   : > { %v5076_v62 = vadd.f32 %v8528_v8, %v5036_v32  ;;  %5528 = vmatpush.msra.mxu2 %v5513_v61  ;;  %5548 = vmatpush.msra.mxu3 %v5513_v61  ;;  %v4792_v39 = vadd.f32 %v4751_v41, %v4543_v0 }
 0x60f   : > { %v5112_v54 = vmax.f32 %v5076_v62, 0.0  ;;  %5529 = vmatpush.msra.mxu2 %v5512_v6  ;;  %5549 = vmatpush.msra.mxu3 %v5512_v6  ;;  %v4295_v62 = vadd.f32 %v4256_v10, %v8518_v3 }
 0x610   : > { %6100 = vmatmul.msk.f32.vlgmr.msra.gmra.mxu2 %vm5267_vm7, %v8642_v37  ;;  %6101 = vmatmul.msk.f32.vlgmr.msra.gmra.mxu3 %vm5267_vm7, %v8645_v19 }
 0x611   : > { %v5148_v63 = vmul.f32 %v5112_v54, %v9085_v47  ;;  %v4507_v57 = vpop.f32.mrf.mxu3  ;;  %v4754_v58 = vpop.f32.mrf.mxu0 }
 0x612   : > { %v4990_v26 = vpop.f32.mrf.mxu1  ;;  %v5556_v54 = vld [vmem:[%s8287_s27 + $0xeb] sm:$0xff] }
 0x613   : > { %5227 = vst.msk [vmem:[%s8287_s27 + $0xf3] sm:$0xff] %vm2794_vm4, %v5148_v63  ;;  %v5037_v40 = vadd.f32 %v4990_v26, %v4788_v4  ;;  %v4544_v63 = vadd.f32 %v4505_v21, %v4295_v62  ;;  %v5288_v3 = vpop.f32.mrf.mxu2 }
 0x615   : > { %v5077_v23 = vadd.f32 %v8528_v8, %v5037_v40  ;;  %v4793_v53 = vadd.f32 %v4754_v58, %v4544_v63  ;;  %v9090_v40 = vld [vmem:[#allocation13_spill] sm:$0xff] }
 0x617   : > { %v5113_v55 = vmax.f32 %v5077_v23, 0.0 }
 0x619   : > { %v5149_v16 = vmul.f32 %v5113_v55, %v9086_v22  ;;  %v5311_v26 = vpop.f32.mrf.mxu3  ;;  %v4296_v55 = vadd.f32 %v4258_v50, %v9091_v7 }
 0x61a   : > { %v4993_v59 = vpop.f32.mrf.mxu1  ;;  %v5557_v61 = vld [vmem:[%s8287_s27 + $0xf3] sm:$0xff]  ;;  %v5314_v23 = vmax.f32 %v5288_v3, %v5311_v26 }
 0x61b   : > { %5228 = vst.msk [vmem:[%s8287_s27 + $0xfb] sm:$0xff] %vm2794_vm4, %v5149_v16  ;;  %v5038_v56 = vadd.f32 %v4993_v59, %v4789_v49  ;;  %v4756_v16 = vpop.f32.mrf.mxu0  ;;  %v4545_v59 = vadd.f32 %v4507_v57, %v4296_v55 }
 0x61c   : > { %5315 = vst.msk [vmem:[%s8799_s11 + $0xb] sm:$0xff] %vm2794_vm4, %v5314_v23 }
 0x61d   : > { %v5078_v52 = vadd.f32 %v8528_v8, %v5038_v56  ;;  %v5339_v56 = vpop.f32.mrf.mxu2 }
 0x61f   : > { %v5114_v43 = vmax.f32 %v5078_v52, 0.0  ;;  %v4794_v52 = vadd.f32 %v4756_v16, %v4545_v59 }
 0x621   : > { %v5150_v17 = vmul.f32 %v5114_v43, %v9087_v46  ;;  %v5359_v51 = vpop.f32.mrf.mxu3 }
 0x622   : > { %v4995_v13 = vpop.f32.mrf.mxu1  ;;  %v5362_v43 = vmax.f32 %v5339_v56, %v5359_v51 }
 0x623   : > { %5229 = vst.msk [vmem:[%s8287_s27 + $0x103] sm:$0xff] %vm2794_vm4, %v5150_v17  ;;  %v5039_v9 = vadd.f32 %v4995_v13, %v4790_v18 }
 0x624   : > { %5363 = vst.msk [vmem:[%s8799_s11 + $0x15] sm:$0xff] %vm2794_vm4, %v5362_v43 }
 0x625   : > { %v5079_v15 = vadd.f32 %v8528_v8, %v5039_v9 }
 0x627   : > { %v5115_v29 = vmax.f32 %v5079_v15, 0.0 }
 0x629   : > { %v5151_v60 = vmul.f32 %v5115_v29, %v9088_v42 }
 0x62a   : > { %v4998_v25 = vpop.f32.mrf.mxu1  ;;  %v5558_v27 = vld [vmem:[%s8287_s27 + $0xfd] sm:$0xff] }
 0x62b   : > { %5230 = vst.msk [vmem:[%s8287_s27 + $0x10b] sm:$0xff] %vm2794_vm4, %v5151_v60  ;;  %v5040_v28 = vadd.f32 %v4998_v25, %v4791_v34  ;;  %v5560_v47 = vmax.f32 %v5556_v54, %v5558_v27  ;;  %v5387_v17 = vpop.f32.mrf.mxu2  ;;  %v5407_v13 = vpop.f32.mrf.mxu3 }
 0x62c   : > { %v5410_v15 = vmax.f32 %v5387_v17, %v5407_v13 }
 0x62d   : > { %v5080_v48 = vadd.f32 %v8528_v8, %v5040_v28 }
 0x62e   : > { %5411 = vst.msk [vmem:[%s8799_s11 + $0x1f] sm:$0xff] %vm2794_vm4, %v5410_v15 }
 0x62f   : > { %v5116_v30 = vmax.f32 %v5080_v48, 0.0 }
 0x631   : > { %v5152_v14 = vmul.f32 %v5116_v30, %v9089_v5 }
 0x632   : > { %v5000_v32 = vpop.f32.mrf.mxu1  ;;  %v5559_v11 = vld [vmem:[%s8287_s27 + $0x105] sm:$0xff] }
 0x633   : > { %5231 = vst.msk [vmem:[%s8287_s27 + $0x113] sm:$0xff] %vm2794_vm4, %v5152_v14  ;;  %v5041_v36 = vadd.f32 %v5000_v32, %v4792_v39  ;;  %v5561_v6 = vmax.f32 %v5557_v61, %v5559_v11 }
 0x635   : > { %v5081_v4 = vadd.f32 %v8528_v8, %v5041_v36  ;;  %5576 = vmatpush.msrb.mxu2 %v5561_v6  ;;  %5596 = vmatpush.msrb.mxu3 %v5561_v6 }
 0x637   : > { %v5117_v12 = vmax.f32 %v5081_v4, 0.0  ;;  %5577 = vmatpush.msrb.mxu2 %v5560_v47  ;;  %5597 = vmatpush.msrb.mxu3 %v5560_v47 }
 0x638   : > { %6102 = vmatmul.msk.f32.vlgmr.msrb.gmra.mxu2 %vm5267_vm7, %v8642_v37  ;;  %6103 = vmatmul.msk.f32.vlgmr.msrb.gmra.mxu3 %vm5267_vm7, %v8645_v19 }
 0x639   : > { %v5153_v2 = vmul.f32 %v5117_v12, %v9090_v40 }
 0x63a   : > { %v5003_v1 = vpop.f32.mrf.mxu1  ;;  %v5604_v41 = vld [vmem:[%s8287_s27 + $0x10f] sm:$0xff] }
 0x63b   : > { %5232 = vst.msk [vmem:[%s8287_s27 + $0x11b] sm:$0xff] %vm2794_vm4, %v5153_v2  ;;  %v5042_v49 = vadd.f32 %v5003_v1, %v4793_v53 }
 0x63d   : > { %v5082_v22 = vadd.f32 %v8528_v8, %v5042_v49  ;;  %v6129_v8 = vld [vmem:[%s8979_s4] ss:$0 sm:$0xff] }
 0x63f   : > { %v5118_v33 = vmax.f32 %v5082_v22, 0.0 }
 0x641   : > { %v5154_v44 = vmul.f32 %v5118_v33, %v9092_v35 }
 0x642   : > { %v5005_v38 = vpop.f32.mrf.mxu1  ;;  %v5605_v29 = vld [vmem:[%s8287_s27 + $0x117] sm:$0xff] }
 0x643   : > { %5233 = vst.msk [vmem:[%s8287_s27 + $0x123] sm:$0xff] %vm2794_vm4, %v5154_v44  ;;  %v5043_v24 = vadd.f32 %v5005_v38, %v4794_v52 }
 0x645   : > { %v5083_v18 = vadd.f32 %v6129_v8, %v5043_v24 }
 0x647   : > { %v5119_v46 = vmax.f32 %v5083_v18, 0.0 }
 0x649   : > { %v5155_v9 = vmul.f32 %v5119_v46, %v9093_v45 }
 0x64a   : > { %v5606_v42 = vld [vmem:[%s8287_s27 + $0x121] sm:$0xff] }
 0x64b   : > { %5234 = vst.msk [vmem:[%s8287_s27 + $0x12b] sm:$0xff] %vm2794_vm4, %v5155_v9  ;;  %v5435_v10 = vpop.f32.mrf.mxu2  ;;  %v5455_v21 = vpop.f32.mrf.mxu3  ;;  %v5608_v25 = vmax.f32 %v5604_v41, %v5606_v42 }
 0x64c   : > { %v5458_v20 = vmax.f32 %v5435_v10, %v5455_v21 }
 0x64e   : > { %5459 = vst.msk [vmem:[%s8799_s11 + $0x29] sm:$0xff] %vm2794_vm4, %v5458_v20 }
 0x652   : > { %v5607_v34 = vld [vmem:[%s8287_s27 + $0x129] sm:$0xff] }
 0x653   : > { %v5609_v60 = vmax.f32 %v5605_v29, %v5607_v34 }
 0x655   : > { %5624 = vmatpush.msra.mxu2 %v5609_v60  ;;  %5644 = vmatpush.msra.mxu3 %v5609_v60 }
 0x657   : > { %5625 = vmatpush.msra.mxu2 %v5608_v25  ;;  %5645 = vmatpush.msra.mxu3 %v5608_v25 }
 0x658   : > { %6104 = vmatmul.msk.f32.vlgmr.msra.gmra.mxu2 %vm5267_vm7, %v8642_v37  ;;  %6105 = vmatmul.msk.f32.vlgmr.msra.gmra.mxu3 %vm5267_vm7, %v8645_v19 }
 0x673   : > { %v5483_v31 = vpop.f32.mrf.mxu2  ;;  %v5503_v28 = vpop.f32.mrf.mxu3 }
 0x674   : > { %v5506_v48 = vmax.f32 %v5483_v31, %v5503_v28 }
 0x676   : > { %5507 = vst.msk [vmem:[%s8799_s11 + $0x33] sm:$0xff] %vm2794_vm4, %v5506_v48 }
 0x693   : > { %v5531_v0 = vpop.f32.mrf.mxu2  ;;  %v5551_v30 = vpop.f32.mrf.mxu3 }
 0x694   : > { %v5554_v50 = vmax.f32 %v5531_v0, %v5551_v30 }
 0x696   : > { %5555 = vst.msk [vmem:[%s8799_s11 + $0x3d] sm:$0xff] %vm2794_vm4, %v5554_v50 }
 0x6bb   : > { %v5579_v57 = vpop.f32.mrf.mxu2  ;;  %v5599_v39 = vpop.f32.mrf.mxu3 }
 0x6bc   : > { %v5602_v5 = vmax.f32 %v5579_v57, %v5599_v39 }
 0x6be   : > { %5603 = vst.msk [vmem:[%s8799_s11 + $0x47] sm:$0xff] %vm2794_vm4, %v5602_v5 }
 0x6db   : > { %v5627_v37 = vpop.f32.mrf.mxu2  ;;  %v5647_v14 = vpop.f32.mrf.mxu3 }
 0x6dc   : > { %v5650_v32 = vmax.f32 %v5627_v37, %v5647_v14 }
 0x6de   : > { %5651 = vst.msk [vmem:[%s8799_s11 + $0x51] sm:$0xff] %vm2794_vm4, %v5650_v32 }
 0x6df PF: > { %s18_s24 = sadd.s32 1, %s6136_s24  }
 0x6e0   : > { %p15_p4 = scmp.ge.s32.totalorder %s18_s24, 4  }
 0x6e2   :  { %17 = sbr.rel (!%p15_p4) target bundleno = 1 (0x1), region = 102 }

</bundles_post_ra>
